<compile_context>
chip_gen: v6e
topology: v6e:2x2x1
jax: 0.10.0
libtpu: 0.0.40
codegen_flags: <defaults>
</compile_context>

<pallas_src>
import functools

import numpy as np
import jax
import jax.numpy as jnp
from jax.experimental import pallas as pl
from jax.experimental.pallas import tpu as pltpu


# --------------------------- in-kernel helpers --------------------------------

def _conv3x3(src_ref, wmat_ref, b_ref, H, extra=None):
    """3x3 "same" conv in the lane-dense (w, c) layout.

    src_ref  : (N, H+2, W*Cin) ref; rows 0 and H+1 are a zero halo.
    wmat_ref : (3, W*Cin, W*Cout) banded weight (dy-major); dx taps and the
               W-boundary zero padding are folded into the band structure.
    b_ref    : (1, W*Cout) bias, tiled over w.
    extra    : optional (src_ref2, wmat_ref2) accumulated into the same output
               (concat-free decoder conv1: up path + bridge path).
    returns  : (N*H, W*Cout) f32 pre-activation.
    """
    N = src_ref.shape[0]
    L = wmat_ref.shape[2]
    M = N * H
    acc = jnp.zeros((M, L), jnp.float32)
    sources = [(src_ref, wmat_ref)]
    if extra is not None:
        sources.append(extra)
    for s_ref, m_ref in sources:
        K = s_ref.shape[2]
        for dy in range(3):
            xs = s_ref[:, dy:dy + H, :].reshape(M, K)
            acc = acc + jnp.dot(xs, m_ref[dy],
                                preferred_element_type=jnp.float32)
    return acc + b_ref[...]


def _maxpool2x2(y, psel0_ref, psel1_ref, N, H):
    """2x2/stride-2 max pool in the lane-dense layout.

    y           : (N*H, W*C) value.
    psel0/psel1 : (W*C, (W//2)*C) 0/1 block-selection matrices (even / odd w).
    returns     : (N*(H//2), (W//2)*C).
    """
    WC = y.shape[1]
    y3 = y.reshape(N * H // 2, 2, WC)
    yr = jnp.maximum(y3[:, 0, :], y3[:, 1, :])              # row pairs (sublanes)
    a = jnp.dot(yr, psel0_ref[...], preferred_element_type=jnp.float32)
    b = jnp.dot(yr, psel1_ref[...], preferred_element_type=jnp.float32)
    return jnp.maximum(a, b)                                # column pairs (lanes)


def _upconv2x2(y, umat_ref, ub_ref, dst_ref, N, Hc):
    """ConvTranspose2d(k=2, s=2) fully in-kernel (lane-dense).

    y        : (N*Hc, Wc*Cin) coarse feature map (value).
    umat_ref : (2, Wc*Cin, 2*Wc*Cout); umat[dy] produces the full fine row of
               parity dy (channel mixing + column interleave in one matmul).
    ub_ref   : (1, 2*Wc*Cout) bias tiled over the fine columns.
    dst_ref  : (N, 2*Hc+2, 2*Wc*Cout) buffer with zero halo rows; the row
               interleave is a stack+reshape followed by ONE interior store.
    """
    L = umat_ref.shape[2]
    z0 = jnp.dot(y, umat_ref[0], preferred_element_type=jnp.float32)
    z1 = jnp.dot(y, umat_ref[1], preferred_element_type=jnp.float32)
    z = jnp.stack([z0, z1], axis=1).reshape(N, 2 * Hc, L) + ub_ref[...]
    dst_ref[:, 1:1 + 2 * Hc, :] = z


# --------------------------- fused UNet kernel --------------------------------

def _make_unet_kernel(N, H0, W0, c_in, chans, n_classes):
    depth = len(chans)
    Hs = [H0 // 2 ** i for i in range(depth)]
    Ws = [W0 // 2 ** i for i in range(depth)]
    n_inputs = 1 + 4 * depth + 2 * (depth - 1) + 7 * (depth - 1) + 2

    def kernel(*refs):
        it = iter(refs)
        x_ref = next(it)
        down_p = []
        for i in range(depth):
            n_p = 6 if i < depth - 1 else 4
            down_p.append(tuple(next(it) for _ in range(n_p)))
        up_p = [tuple(next(it) for _ in range(7)) for _ in range(depth - 1)]
        lw_ref = next(it)
        lb_ref = next(it)
        out_ref = next(it)
        scratch = list(it)

        si = iter(scratch)
        s_down = []
        for i in range(depth):
            a_buf = next(si)
            br_buf = next(si) if i < depth - 1 else None
            p_buf = next(si) if i < depth - 1 else None
            s_down.append((a_buf, br_buf, p_buf))
        s_up = [(next(si), next(si)) for _ in range(depth - 1)]

        # Halo-only zero init: interiors are always fully written before read.
        for buf in scratch:
            hp = buf.shape[1]
            zrow = jnp.zeros((N, 1, buf.shape[2]), jnp.float32)
            buf[:, 0:1, :] = zrow
            buf[:, hp - 1:hp, :] = zrow

        # ------------------------------ encoder ------------------------------
        bridges = [None] * depth
        cur = x_ref
        y = None
        for i in range(depth):
            H, W, C = Hs[i], Ws[i], chans[i]
            a_buf, br_buf, p_buf = s_down[i]
            if i < depth - 1:
                w1m, b1, w2m, b2, ps0, ps1 = down_p[i]
            else:
                w1m, b1, w2m, b2 = down_p[i]
            y = jnp.maximum(_conv3x3(cur, w1m, b1, H), 0.0)
            a_buf[:, 1:1 + H, :] = y.reshape(N, H, W * C)
            y = jnp.maximum(_conv3x3(a_buf, w2m, b2, H), 0.0)
            if i < depth - 1:
                br_buf[:, 1:1 + H, :] = y.reshape(N, H, W * C)   # skip (center_crop
                bridges[i] = br_buf                               # is identity here)
                y = _maxpool2x2(y, ps0, ps1, N, H)                # fused pool
                p_buf[:, 1:1 + H // 2, :] = y.reshape(N, H // 2, (W // 2) * C)
                cur = p_buf

        # ------------------------------ decoder ------------------------------
        for j in range(depth - 1):
            lvl = depth - 2 - j
            Hc = Hs[lvl + 1]                                  # coarse resolution
            Hf, Wf, Cf = Hs[lvl], Ws[lvl], chans[lvl]         # fine resolution
            um, ub, w1um, w1bm, b1, w2m, b2 = up_p[j]
            up_buf, c1_buf = s_up[j]
            _upconv2x2(y, um, ub, up_buf, N, Hc)
            # concat-free conv1: accumulate up-path and skip-path matmul groups.
            z = jnp.maximum(
                _conv3x3(up_buf, w1um, b1, Hf, extra=(bridges[lvl], w1bm)), 0.0)
            c1_buf[:, 1:1 + Hf, :] = z.reshape(N, Hf, Wf * Cf)
            y = jnp.maximum(_conv3x3(c1_buf, w2m, b2, Hf), 0.0)

        # ----------------------- fused 1x1 classification --------------------
        out = jnp.dot(y, lw_ref[...],
                      preferred_element_type=jnp.float32) + lb_ref[...]
        out_ref[...] = out.reshape(N, H0, W0 * n_classes)

    return kernel, n_inputs


def _scratch_shapes(N, H0, W0, c_in, chans):
    depth = len(chans)
    Hs = [H0 // 2 ** i for i in range(depth)]
    Ws = [W0 // 2 ** i for i in range(depth)]

    def pbuf(H, L):
        return pltpu.VMEM((N, H + 2, L), jnp.float32)

    shapes = []
    for i in range(depth):
        L = Ws[i] * chans[i]
        shapes.append(pbuf(Hs[i], L))                              # conv1 output
        if i < depth - 1:
            shapes.append(pbuf(Hs[i], L))                          # bridge
            shapes.append(pbuf(Hs[i + 1], Ws[i + 1] * chans[i]))   # pooled
    for j in range(depth - 1):
        lvl = depth - 2 - j
        L = Ws[lvl] * chans[lvl]
        shapes.append(pbuf(Hs[lvl], L))                            # upconv output
        shapes.append(pbuf(Hs[lvl], L))                            # decoder conv1
    return shapes


# --------------------------- parameters ---------------------------------------

def _uniform(key, shape, bound):
    return jax.random.uniform(key, shape, jnp.float32, -bound, bound)


def init_unet_params(key, in_channels=3, depth=3, wf=3, num_classes=3):
    """Same layer structure as the PyTorch module.

    Conv weights are stored HWIO (3,3,Cin,Cout); ConvTranspose weights as
    (dy, dx, Cin, Cout) (torch's (Cin,Cout,2,2) with kernel taps leading).
    """
    params = {'down': [], 'up': []}
    prev = in_channels
    for i in range(depth):
        cout = 2 ** (wf + i)
        key, k1, k2, k3, k4 = jax.random.split(key, 5)
        bd1 = 1.0 / (prev * 9) ** 0.5
        bd2 = 1.0 / (cout * 9) ** 0.5
        params['down'].append({
            'w1': _uniform(k1, (3, 3, prev, cout), bd1),
            'b1': _uniform(k2, (cout,), bd1),
            'w2': _uniform(k3, (3, 3, cout, cout), bd2),
            'b2': _uniform(k4, (cout,), bd2)})
        prev = cout
    for i in reversed(range(depth - 1)):
        cout = 2 ** (wf + i)
        key, ku1, ku2, k1, k2, k3, k4 = jax.random.split(key, 7)
        ubd = 1.0 / (cout * 4) ** 0.5
        bd1 = 1.0 / (prev * 9) ** 0.5
        bd2 = 1.0 / (cout * 9) ** 0.5
        params['up'].append({
            'up_w': _uniform(ku1, (2, 2, prev, cout), ubd),
            'up_b': _uniform(ku2, (cout,), ubd),
            'w1': _uniform(k1, (3, 3, prev, cout), bd1),  # conv over cat(up, bridge)
            'b1': _uniform(k2, (cout,), bd1),
            'w2': _uniform(k3, (3, 3, cout, cout), bd2),
            'b2': _uniform(k4, (cout,), bd2)})
        prev = cout
    key, kl1, kl2 = jax.random.split(key, 3)
    bl = 1.0 / prev ** 0.5
    params['last_w'] = _uniform(kl1, (prev, num_classes), bl)
    params['last_b'] = _uniform(kl2, (num_classes,), bl)
    return params


# --------------------------- host-side weight packing --------------------------

def _banded_conv_mat(w_hwio, W):
    """(3, W*Cin, W*Cout) banded matrix for a padding=1 3x3 conv in the
    lane-dense (w, c) layout: mat[dy][(w+dx-1)*Cin+ci, w*Cout+co] = w[dy,dx,ci,co]."""
    w = np.asarray(w_hwio, np.float32)
    cin, cout = w.shape[2], w.shape[3]
    mat = np.zeros((3, W * cin, W * cout), np.float32)
    for dy in range(3):
        for dx in range(3):
            for wo in range(W):
                wi = wo + dx - 1
                if 0 <= wi < W:
                    mat[dy, wi * cin:(wi + 1) * cin,
                        wo * cout:(wo + 1) * cout] = w[dy, dx]
    return jnp.asarray(mat)


def _upconv_mat(w_t, Wc):
    """(2, Wc*Cin, 2*Wc*Cout) matrix for ConvTranspose2d(k=2, s=2):
    mat[dy][j*Cin+ci, (2j+dx)*Cout+co] = w_t[dy,dx,ci,co]."""
    w = np.asarray(w_t, np.float32)
    cin, cout = w.shape[2], w.shape[3]
    mat = np.zeros((2, Wc * cin, 2 * Wc * cout), np.float32)
    for dy in range(2):
        for dx in range(2):
            for j in range(Wc):
                mat[dy, j * cin:(j + 1) * cin,
                    (2 * j + dx) * cout:(2 * j + dx + 1) * cout] = w[dy, dx]
    return jnp.asarray(mat)


def _blockdiag_mat(w, W):
    """(W*Cin, W*Cout) block-diagonal matrix for a 1x1 conv."""
    w = np.asarray(w, np.float32)
    cin, cout = w.shape
    mat = np.zeros((W * cin, W * cout), np.float32)
    for j in range(W):
        mat[j * cin:(j + 1) * cin, j * cout:(j + 1) * cout] = w
    return jnp.asarray(mat)


def _pool_select_mat(W, C, parity):
    """(W*C, (W//2)*C) 0/1 matrix selecting every other (parity) w-block."""
    mat = np.zeros((W * C, (W // 2) * C), np.float32)
    eye = np.eye(C, dtype=np.float32)
    for k in range(W // 2):
        s = (2 * k + parity) * C
        mat[s:s + C, k * C:(k + 1) * C] = eye
    return jnp.asarray(mat)


def _tile_bias(b, reps):
    return jnp.asarray(np.tile(np.asarray(b, np.float32), reps).reshape(1, -1))


def pack_unet_params(params, H0, W0):
    """Pre-pack parameters into lane-dense banded matrices (kernel input order)."""
    depth = len(params['down'])
    Ws = [W0 // 2 ** i for i in range(depth)]
    packed = []
    for i, p in enumerate(params['down']):
        W = Ws[i]
        packed += [_banded_conv_mat(p['w1'], W), _tile_bias(p['b1'], W),
                   _banded_conv_mat(p['w2'], W), _tile_bias(p['b2'], W)]
        if i < depth - 1:
            C = p['w2'].shape[-1]
            packed += [_pool_select_mat(W, C, 0), _pool_select_mat(W, C, 1)]
    for j, p in enumerate(params['up']):
        lvl = depth - 2 - j
        Wc, Wf = Ws[lvl + 1], Ws[lvl]
        ch = p['w2'].shape[-1]
        packed += [
            _upconv_mat(p['up_w'], Wc), _tile_bias(p['up_b'], 2 * Wc),
            _banded_conv_mat(p['w1'][:, :, :ch, :], Wf),   # up-sampled channels
            _banded_conv_mat(p['w1'][:, :, ch:, :], Wf),   # bridge channels
            _tile_bias(p['b1'], Wf),
            _banded_conv_mat(p['w2'], Wf), _tile_bias(p['b2'], Wf),
        ]
    packed += [_blockdiag_mat(params['last_w'], W0),
               _tile_bias(params['last_b'], W0)]
    return packed


# --------------------------- forward (wrapper) ---------------------------------

def unet_forward(packed, x_nchw, *, c_in, chans, n_classes):
    N, _, H0, W0 = x_nchw.shape
    # NCHW -> lane-dense (N, H, W*C) with a one-row zero halo above and below.
    x = jnp.transpose(x_nchw, (0, 2, 3, 1)).astype(jnp.float32)
    x = jnp.pad(x.reshape(N, H0, W0 * c_in), ((0, 0), (1, 1), (0, 0)))
    kernel, n_inputs = _make_unet_kernel(N, H0, W0, c_in, chans, n_classes)
    assert len(packed) + 1 == n_inputs
    y = pl.pallas_call(
        kernel,
        out_shape=jax.ShapeDtypeStruct((N, H0, W0 * n_classes), jnp.float32),
        in_specs=[pl.BlockSpec(memory_space=pltpu.MemorySpace.VMEM)] * n_inputs,
        out_specs=pl.BlockSpec(memory_space=pltpu.MemorySpace.VMEM),
        scratch_shapes=_scratch_shapes(N, H0, W0, c_in, chans),
    )(x, *packed)
    y = y.reshape(N, H0, W0, n_classes)
    return jnp.transpose(y, (0, 3, 1, 2))                    # -> NCHW


# --------------------------- pure-JAX reference --------------------------------

def unet_reference(params, x_nchw):
    hp = jax.lax.Precision.HIGHEST
    x = jnp.transpose(x_nchw, (0, 2, 3, 1)).astype(jnp.float32)

    def conv3(h, w, b):
        y = jax.lax.conv_general_dilated(
            h, w, window_strides=(1, 1), padding='SAME',
            dimension_numbers=('NHWC', 'HWIO', 'NHWC'), precision=hp)
        return jax.nn.relu(y + b)

    depth = len(params['down'])
    blocks = []
    for i, p in enumerate(params['down']):
        x = conv3(x, p['w1'], p['b1'])
        x = conv3(x, p['w2'], p['b2'])
        if i != depth - 1:
            blocks.append(x)
            x = jax.lax.reduce_window(x, -jnp.inf, jax.lax.max,
                                      (1, 2, 2, 1), (1, 2, 2, 1), 'VALID')
    for j, p in enumerate(params['up']):
        n, hc, wc, _ = x.shape
        cout = p['up_w'].shape[-1]
        up = jnp.zeros((n, 2 * hc, 2 * wc, cout), jnp.float32)
        for dy in range(2):
            for dx in range(2):
                t = jnp.einsum('nhwc,cd->nhwd', x, p['up_w'][dy, dx], precision=hp)
                up = up.at[:, dy::2, dx::2, :].set(t)
        up = up + p['up_b']
        bridge = blocks[-j - 1]                      # center_crop is identity here
        x = jnp.concatenate([up, bridge], axis=-1)
        x = conv3(x, p['w1'], p['b1'])
        x = conv3(x, p['w2'], p['b2'])
    y = jnp.einsum('nhwc,cd->nhwd', x, params['last_w'],
                   precision=hp) + params['last_b']
    return jnp.transpose(y, (0, 3, 1, 2))


# ------------------------------------ main -------------------------------------

if __name__ == "__main__":
    key = jax.random.PRNGKey(0)
    kp, kx = jax.random.split(key)

    labelclassMap = {'background': 0, 'foreground': 1, 'boundary': 2}
    in_channels, depth, wf = 3, 3, 3
    n_classes = len(labelclassMap)
    params = init_unet_params(kp, in_channels=in_channels, depth=depth, wf=wf,
                              num_classes=n_classes)

    N, H, W = 2, 16, 16
    x = jax.random.normal(kx, (N, in_channels, H, W), jnp.float32)  # PyTorch NCHW

    chans = tuple(2 ** (wf + i) for i in range(depth))
    packed = pack_unet_params(params, H, W)          # one-time weight packing

    fwd = jax.jit(functools.partial(unet_forward, c_in=in_channels,
                                    chans=chans, n_classes=n_classes))
    out = jax.block_until_ready(fwd(packed, x))

    assert out.shape == (N, n_classes, H, W), out.shape
    assert out.dtype == jnp.float32

    # Tolerance: layout/indexing bugs would give O(0.1-1) errors; observed f32
    # error is ~1e-3 or below, 2e-2 leaves margin for MXU f32 pass rounding.
    ref = unet_reference(params, x)
    err = float(jnp.max(jnp.abs(out - ref)))
    assert err < 2e-2, f"max abs error vs reference: {err}"
    print("KERNEL_OK")
</pallas_src>

<mosaic_0001>
module attributes {stable_mosaic.version = 11 : i64} {
  func.func @kernel(%arg0: memref<2x18x48xf32, #tpu.memory_space<vmem>>, %arg1: memref<3x48x128xf32, #tpu.memory_space<vmem>>, %arg2: memref<1x128xf32, #tpu.memory_space<vmem>>, %arg3: memref<3x128x128xf32, #tpu.memory_space<vmem>>, %arg4: memref<1x128xf32, #tpu.memory_space<vmem>>, %arg5: memref<128x64xf32, #tpu.memory_space<vmem>>, %arg6: memref<128x64xf32, #tpu.memory_space<vmem>>, %arg7: memref<3x64x128xf32, #tpu.memory_space<vmem>>, %arg8: memref<1x128xf32, #tpu.memory_space<vmem>>, %arg9: memref<3x128x128xf32, #tpu.memory_space<vmem>>, %arg10: memref<1x128xf32, #tpu.memory_space<vmem>>, %arg11: memref<128x64xf32, #tpu.memory_space<vmem>>, %arg12: memref<128x64xf32, #tpu.memory_space<vmem>>, %arg13: memref<3x64x128xf32, #tpu.memory_space<vmem>>, %arg14: memref<1x128xf32, #tpu.memory_space<vmem>>, %arg15: memref<3x128x128xf32, #tpu.memory_space<vmem>>, %arg16: memref<1x128xf32, #tpu.memory_space<vmem>>, %arg17: memref<2x128x128xf32, #tpu.memory_space<vmem>>, %arg18: memref<1x128xf32, #tpu.memory_space<vmem>>, %arg19: memref<3x128x128xf32, #tpu.memory_space<vmem>>, %arg20: memref<3x128x128xf32, #tpu.memory_space<vmem>>, %arg21: memref<1x128xf32, #tpu.memory_space<vmem>>, %arg22: memref<3x128x128xf32, #tpu.memory_space<vmem>>, %arg23: memref<1x128xf32, #tpu.memory_space<vmem>>, %arg24: memref<2x128x128xf32, #tpu.memory_space<vmem>>, %arg25: memref<1x128xf32, #tpu.memory_space<vmem>>, %arg26: memref<3x128x128xf32, #tpu.memory_space<vmem>>, %arg27: memref<3x128x128xf32, #tpu.memory_space<vmem>>, %arg28: memref<1x128xf32, #tpu.memory_space<vmem>>, %arg29: memref<3x128x128xf32, #tpu.memory_space<vmem>>, %arg30: memref<1x128xf32, #tpu.memory_space<vmem>>, %arg31: memref<128x48xf32, #tpu.memory_space<vmem>>, %arg32: memref<1x48xf32, #tpu.memory_space<vmem>>, %arg33: memref<2x16x48xf32, #tpu.memory_space<vmem>>, %arg34: memref<2x18x128xf32, #tpu.memory_space<vmem>>, %arg35: memref<2x18x128xf32, #tpu.memory_space<vmem>>, %arg36: memref<2x10x64xf32, #tpu.memory_space<vmem>>, %arg37: memref<2x10x128xf32, #tpu.memory_space<vmem>>, %arg38: memref<2x10x128xf32, #tpu.memory_space<vmem>>, %arg39: memref<2x6x64xf32, #tpu.memory_space<vmem>>, %arg40: memref<2x6x128xf32, #tpu.memory_space<vmem>>, %arg41: memref<2x10x128xf32, #tpu.memory_space<vmem>>, %arg42: memref<2x10x128xf32, #tpu.memory_space<vmem>>, %arg43: memref<2x18x128xf32, #tpu.memory_space<vmem>>, %arg44: memref<2x18x128xf32, #tpu.memory_space<vmem>>) attributes {dimension_semantics = [], scalar_prefetch = 0 : i64, scratch_operands = 11 : i64, tpu.core_type = #tpu.core_type<tc>} {
    %cst = arith.constant 0.000000e+00 : f32
    %0 = vector.broadcast %cst : f32 to vector<2x1x128xf32>
    %c0 = arith.constant 0 : index
    %c0_0 = arith.constant 0 : index
    %c0_1 = arith.constant 0 : index
    %1 = vector.load %arg34[%c0, %c0_0, %c0_1] : memref<2x18x128xf32, #tpu.memory_space<vmem>>, vector<2x1x128xf32>
    tpu.vector_store %arg34[%c0, %c0_0, %c0_1], %0 {strides = array<i32>} : memref<2x18x128xf32, #tpu.memory_space<vmem>>, vector<2x1x128xf32>,
    %c0_2 = arith.constant 0 : index
    %c17 = arith.constant 17 : index
    %c0_3 = arith.constant 0 : index
    %2 = vector.load %arg34[%c0_2, %c17, %c0_3] : memref<2x18x128xf32, #tpu.memory_space<vmem>>, vector<2x1x128xf32>
    tpu.vector_store %arg34[%c0_2, %c17, %c0_3], %0 {strides = array<i32>} : memref<2x18x128xf32, #tpu.memory_space<vmem>>, vector<2x1x128xf32>,
    %cst_4 = arith.constant 0.000000e+00 : f32
    %3 = vector.broadcast %cst_4 : f32 to vector<2x1x128xf32>
    %c0_5 = arith.constant 0 : index
    %c0_6 = arith.constant 0 : index
    %c0_7 = arith.constant 0 : index
    %4 = vector.load %arg35[%c0_5, %c0_6, %c0_7] : memref<2x18x128xf32, #tpu.memory_space<vmem>>, vector<2x1x128xf32>
    tpu.vector_store %arg35[%c0_5, %c0_6, %c0_7], %3 {strides = array<i32>} : memref<2x18x128xf32, #tpu.memory_space<vmem>>, vector<2x1x128xf32>,
    %c0_8 = arith.constant 0 : index
    %c17_9 = arith.constant 17 : index
    %c0_10 = arith.constant 0 : index
    %5 = vector.load %arg35[%c0_8, %c17_9, %c0_10] : memref<2x18x128xf32, #tpu.memory_space<vmem>>, vector<2x1x128xf32>
    tpu.vector_store %arg35[%c0_8, %c17_9, %c0_10], %3 {strides = array<i32>} : memref<2x18x128xf32, #tpu.memory_space<vmem>>, vector<2x1x128xf32>,
    %cst_11 = arith.constant 0.000000e+00 : f32
    %6 = vector.broadcast %cst_11 : f32 to vector<2x1x64xf32>
    %c0_12 = arith.constant 0 : index
    %c0_13 = arith.constant 0 : index
    %c0_14 = arith.constant 0 : index
    %7 = vector.load %arg36[%c0_12, %c0_13, %c0_14] : memref<2x10x64xf32, #tpu.memory_space<vmem>>, vector<2x1x64xf32>
    tpu.vector_store %arg36[%c0_12, %c0_13, %c0_14], %6 {strides = array<i32>} : memref<2x10x64xf32, #tpu.memory_space<vmem>>, vector<2x1x64xf32>,
    %c0_15 = arith.constant 0 : index
    %c9 = arith.constant 9 : index
    %c0_16 = arith.constant 0 : index
    %8 = vector.load %arg36[%c0_15, %c9, %c0_16] : memref<2x10x64xf32, #tpu.memory_space<vmem>>, vector<2x1x64xf32>
    tpu.vector_store %arg36[%c0_15, %c9, %c0_16], %6 {strides = array<i32>} : memref<2x10x64xf32, #tpu.memory_space<vmem>>, vector<2x1x64xf32>,
    %cst_17 = arith.constant 0.000000e+00 : f32
    %9 = vector.broadcast %cst_17 : f32 to vector<2x1x128xf32>
    %c0_18 = arith.constant 0 : index
    %c0_19 = arith.constant 0 : index
    %c0_20 = arith.constant 0 : index
    %10 = vector.load %arg37[%c0_18, %c0_19, %c0_20] : memref<2x10x128xf32, #tpu.memory_space<vmem>>, vector<2x1x128xf32>
    tpu.vector_store %arg37[%c0_18, %c0_19, %c0_20], %9 {strides = array<i32>} : memref<2x10x128xf32, #tpu.memory_space<vmem>>, vector<2x1x128xf32>,
    %c0_21 = arith.constant 0 : index
    %c9_22 = arith.constant 9 : index
    %c0_23 = arith.constant 0 : index
    %11 = vector.load %arg37[%c0_21, %c9_22, %c0_23] : memref<2x10x128xf32, #tpu.memory_space<vmem>>, vector<2x1x128xf32>
    tpu.vector_store %arg37[%c0_21, %c9_22, %c0_23], %9 {strides = array<i32>} : memref<2x10x128xf32, #tpu.memory_space<vmem>>, vector<2x1x128xf32>,
    %cst_24 = arith.constant 0.000000e+00 : f32
    %12 = vector.broadcast %cst_24 : f32 to vector<2x1x128xf32>
    %c0_25 = arith.constant 0 : index
    %c0_26 = arith.constant 0 : index
    %c0_27 = arith.constant 0 : index
    %13 = vector.load %arg38[%c0_25, %c0_26, %c0_27] : memref<2x10x128xf32, #tpu.memory_space<vmem>>, vector<2x1x128xf32>
    tpu.vector_store %arg38[%c0_25, %c0_26, %c0_27], %12 {strides = array<i32>} : memref<2x10x128xf32, #tpu.memory_space<vmem>>, vector<2x1x128xf32>,
    %c0_28 = arith.constant 0 : index
    %c9_29 = arith.constant 9 : index
    %c0_30 = arith.constant 0 : index
    %14 = vector.load %arg38[%c0_28, %c9_29, %c0_30] : memref<2x10x128xf32, #tpu.memory_space<vmem>>, vector<2x1x128xf32>
    tpu.vector_store %arg38[%c0_28, %c9_29, %c0_30], %12 {strides = array<i32>} : memref<2x10x128xf32, #tpu.memory_space<vmem>>, vector<2x1x128xf32>,
    %cst_31 = arith.constant 0.000000e+00 : f32
    %15 = vector.broadcast %cst_31 : f32 to vector<2x1x64xf32>
    %c0_32 = arith.constant 0 : index
    %c0_33 = arith.constant 0 : index
    %c0_34 = arith.constant 0 : index
    %16 = vector.load %arg39[%c0_32, %c0_33, %c0_34] : memref<2x6x64xf32, #tpu.memory_space<vmem>>, vector<2x1x64xf32>
    tpu.vector_store %arg39[%c0_32, %c0_33, %c0_34], %15 {strides = array<i32>} : memref<2x6x64xf32, #tpu.memory_space<vmem>>, vector<2x1x64xf32>,
    %c0_35 = arith.constant 0 : index
    %c5 = arith.constant 5 : index
    %c0_36 = arith.constant 0 : index
    %17 = vector.load %arg39[%c0_35, %c5, %c0_36] : memref<2x6x64xf32, #tpu.memory_space<vmem>>, vector<2x1x64xf32>
    tpu.vector_store %arg39[%c0_35, %c5, %c0_36], %15 {strides = array<i32>} : memref<2x6x64xf32, #tpu.memory_space<vmem>>, vector<2x1x64xf32>,
    %cst_37 = arith.constant 0.000000e+00 : f32
    %18 = vector.broadcast %cst_37 : f32 to vector<2x1x128xf32>
    %c0_38 = arith.constant 0 : index
    %c0_39 = arith.constant 0 : index
    %c0_40 = arith.constant 0 : index
    %19 = vector.load %arg40[%c0_38, %c0_39, %c0_40] : memref<2x6x128xf32, #tpu.memory_space<vmem>>, vector<2x1x128xf32>
    tpu.vector_store %arg40[%c0_38, %c0_39, %c0_40], %18 {strides = array<i32>} : memref<2x6x128xf32, #tpu.memory_space<vmem>>, vector<2x1x128xf32>,
    %c0_41 = arith.constant 0 : index
    %c5_42 = arith.constant 5 : index
    %c0_43 = arith.constant 0 : index
    %20 = vector.load %arg40[%c0_41, %c5_42, %c0_43] : memref<2x6x128xf32, #tpu.memory_space<vmem>>, vector<2x1x128xf32>
    tpu.vector_store %arg40[%c0_41, %c5_42, %c0_43], %18 {strides = array<i32>} : memref<2x6x128xf32, #tpu.memory_space<vmem>>, vector<2x1x128xf32>,
    %cst_44 = arith.constant 0.000000e+00 : f32
    %21 = vector.broadcast %cst_44 : f32 to vector<2x1x128xf32>
    %c0_45 = arith.constant 0 : index
    %c0_46 = arith.constant 0 : index
    %c0_47 = arith.constant 0 : index
    %22 = vector.load %arg41[%c0_45, %c0_46, %c0_47] : memref<2x10x128xf32, #tpu.memory_space<vmem>>, vector<2x1x128xf32>
    tpu.vector_store %arg41[%c0_45, %c0_46, %c0_47], %21 {strides = array<i32>} : memref<2x10x128xf32, #tpu.memory_space<vmem>>, vector<2x1x128xf32>,
    %c0_48 = arith.constant 0 : index
    %c9_49 = arith.constant 9 : index
    %c0_50 = arith.constant 0 : index
    %23 = vector.load %arg41[%c0_48, %c9_49, %c0_50] : memref<2x10x128xf32, #tpu.memory_space<vmem>>, vector<2x1x128xf32>
    tpu.vector_store %arg41[%c0_48, %c9_49, %c0_50], %21 {strides = array<i32>} : memref<2x10x128xf32, #tpu.memory_space<vmem>>, vector<2x1x128xf32>,
    %cst_51 = arith.constant 0.000000e+00 : f32
    %24 = vector.broadcast %cst_51 : f32 to vector<2x1x128xf32>
    %c0_52 = arith.constant 0 : index
    %c0_53 = arith.constant 0 : index
    %c0_54 = arith.constant 0 : index
    %25 = vector.load %arg42[%c0_52, %c0_53, %c0_54] : memref<2x10x128xf32, #tpu.memory_space<vmem>>, vector<2x1x128xf32>
    tpu.vector_store %arg42[%c0_52, %c0_53, %c0_54], %24 {strides = array<i32>} : memref<2x10x128xf32, #tpu.memory_space<vmem>>, vector<2x1x128xf32>,
    %c0_55 = arith.constant 0 : index
    %c9_56 = arith.constant 9 : index
    %c0_57 = arith.constant 0 : index
    %26 = vector.load %arg42[%c0_55, %c9_56, %c0_57] : memref<2x10x128xf32, #tpu.memory_space<vmem>>, vector<2x1x128xf32>
    tpu.vector_store %arg42[%c0_55, %c9_56, %c0_57], %24 {strides = array<i32>} : memref<2x10x128xf32, #tpu.memory_space<vmem>>, vector<2x1x128xf32>,
    %cst_58 = arith.constant 0.000000e+00 : f32
    %27 = vector.broadcast %cst_58 : f32 to vector<2x1x128xf32>
    %c0_59 = arith.constant 0 : index
    %c0_60 = arith.constant 0 : index
    %c0_61 = arith.constant 0 : index
    %28 = vector.load %arg43[%c0_59, %c0_60, %c0_61] : memref<2x18x128xf32, #tpu.memory_space<vmem>>, vector<2x1x128xf32>
    tpu.vector_store %arg43[%c0_59, %c0_60, %c0_61], %27 {strides = array<i32>} : memref<2x18x128xf32, #tpu.memory_space<vmem>>, vector<2x1x128xf32>,
    %c0_62 = arith.constant 0 : index
    %c17_63 = arith.constant 17 : index
    %c0_64 = arith.constant 0 : index
    %29 = vector.load %arg43[%c0_62, %c17_63, %c0_64] : memref<2x18x128xf32, #tpu.memory_space<vmem>>, vector<2x1x128xf32>
    tpu.vector_store %arg43[%c0_62, %c17_63, %c0_64], %27 {strides = array<i32>} : memref<2x18x128xf32, #tpu.memory_space<vmem>>, vector<2x1x128xf32>,
    %cst_65 = arith.constant 0.000000e+00 : f32
    %30 = vector.broadcast %cst_65 : f32 to vector<2x1x128xf32>
    %c0_66 = arith.constant 0 : index
    %c0_67 = arith.constant 0 : index
    %c0_68 = arith.constant 0 : index
    %31 = vector.load %arg44[%c0_66, %c0_67, %c0_68] : memref<2x18x128xf32, #tpu.memory_space<vmem>>, vector<2x1x128xf32>
    tpu.vector_store %arg44[%c0_66, %c0_67, %c0_68], %30 {strides = array<i32>} : memref<2x18x128xf32, #tpu.memory_space<vmem>>, vector<2x1x128xf32>,
    %c0_69 = arith.constant 0 : index
    %c17_70 = arith.constant 17 : index
    %c0_71 = arith.constant 0 : index
    %32 = vector.load %arg44[%c0_69, %c17_70, %c0_71] : memref<2x18x128xf32, #tpu.memory_space<vmem>>, vector<2x1x128xf32>
    tpu.vector_store %arg44[%c0_69, %c17_70, %c0_71], %30 {strides = array<i32>} : memref<2x18x128xf32, #tpu.memory_space<vmem>>, vector<2x1x128xf32>,
    %cst_72 = arith.constant 0.000000e+00 : f32
    %33 = vector.broadcast %cst_72 : f32 to vector<32x128xf32>
    %c0_73 = arith.constant 0 : index
    %c0_74 = arith.constant 0 : index
    %c0_75 = arith.constant 0 : index
    %34 = vector.load %arg0[%c0_73, %c0_74, %c0_75] : memref<2x18x48xf32, #tpu.memory_space<vmem>>, vector<2x16x48xf32>
    %35 = vector.shape_cast %34 : vector<2x16x48xf32> to vector<32x48xf32>
    %c0_76 = arith.constant 0 : index
    %c0_77 = arith.constant 0 : index
    %c0_78 = arith.constant 0 : index
    %36 = vector.load %arg1[%c0_76, %c0_77, %c0_78] : memref<3x48x128xf32, #tpu.memory_space<vmem>>, vector<1x48x128xf32>
    %37 = vector.shape_cast %36 : vector<1x48x128xf32> to vector<48x128xf32>
    %cst_79 = arith.constant dense<0.000000e+00> : vector<32x128xf32>
    %38 = tpu.matmul %35, %37, %cst_79 {dimension_numbers = #tpu.dot_dimension_numbers<[1], [0], [0], [1], [0, 0, 1, 1], [], []>} : vector<32x48xf32>, vector<48x128xf32>, vector<32x128xf32> -> vector<32x128xf32>
    %39 = arith.addf %33, %38 : vector<32x128xf32>
    %c0_80 = arith.constant 0 : index
    %c1 = arith.constant 1 : index
    %c0_81 = arith.constant 0 : index
    %40 = vector.load %arg0[%c0_80, %c1, %c0_81] : memref<2x18x48xf32, #tpu.memory_space<vmem>>, vector<2x16x48xf32>
    %41 = vector.shape_cast %40 : vector<2x16x48xf32> to vector<32x48xf32>
    %c1_82 = arith.constant 1 : index
    %c0_83 = arith.constant 0 : index
    %c0_84 = arith.constant 0 : index
    %42 = vector.load %arg1[%c1_82, %c0_83, %c0_84] : memref<3x48x128xf32, #tpu.memory_space<vmem>>, vector<1x48x128xf32>
    %43 = vector.shape_cast %42 : vector<1x48x128xf32> to vector<48x128xf32>
    %cst_85 = arith.constant dense<0.000000e+00> : vector<32x128xf32>
    %44 = tpu.matmul %41, %43, %cst_85 {dimension_numbers = #tpu.dot_dimension_numbers<[1], [0], [0], [1], [0, 0, 1, 1], [], []>} : vector<32x48xf32>, vector<48x128xf32>, vector<32x128xf32> -> vector<32x128xf32>
    %45 = arith.addf %39, %44 : vector<32x128xf32>
    %c0_86 = arith.constant 0 : index
    %c2 = arith.constant 2 : index
    %c0_87 = arith.constant 0 : index
    %46 = vector.load %arg0[%c0_86, %c2, %c0_87] : memref<2x18x48xf32, #tpu.memory_space<vmem>>, vector<2x16x48xf32>
    %47 = vector.shape_cast %46 : vector<2x16x48xf32> to vector<32x48xf32>
    %c2_88 = arith.constant 2 : index
    %c0_89 = arith.constant 0 : index
    %c0_90 = arith.constant 0 : index
    %48 = vector.load %arg1[%c2_88, %c0_89, %c0_90] : memref<3x48x128xf32, #tpu.memory_space<vmem>>, vector<1x48x128xf32>
    %49 = vector.shape_cast %48 : vector<1x48x128xf32> to vector<48x128xf32>
    %cst_91 = arith.constant dense<0.000000e+00> : vector<32x128xf32>
    %50 = tpu.matmul %47, %49, %cst_91 {dimension_numbers = #tpu.dot_dimension_numbers<[1], [0], [0], [1], [0, 0, 1, 1], [], []>} : vector<32x48xf32>, vector<48x128xf32>, vector<32x128xf32> -> vector<32x128xf32>
    %51 = arith.addf %45, %50 : vector<32x128xf32>
    %c0_92 = arith.constant 0 : index
    %c0_93 = arith.constant 0 : index
    %52 = vector.load %arg2[%c0_92, %c0_93] : memref<1x128xf32, #tpu.memory_space<vmem>>, vector<1x128xf32>
    %53 = vector.broadcast %52 : vector<1x128xf32> to vector<32x128xf32>
    %54 = arith.addf %51, %53 : vector<32x128xf32>
    %cst_94 = arith.constant 0.000000e+00 : f32
    %55 = vector.broadcast %cst_94 : f32 to vector<32x128xf32>
    %56 = arith.maximumf %54, %55 : vector<32x128xf32>
    %57 = vector.shape_cast %56 : vector<32x128xf32> to vector<2x16x128xf32>
    %c0_95 = arith.constant 0 : index
    %c1_96 = arith.constant 1 : index
    %c0_97 = arith.constant 0 : index
    %58 = vector.load %arg34[%c0_95, %c1_96, %c0_97] : memref<2x18x128xf32, #tpu.memory_space<vmem>>, vector<2x16x128xf32>
    tpu.vector_store %arg34[%c0_95, %c1_96, %c0_97], %57 {strides = array<i32>} : memref<2x18x128xf32, #tpu.memory_space<vmem>>, vector<2x16x128xf32>,
    %cst_98 = arith.constant 0.000000e+00 : f32
    %59 = vector.broadcast %cst_98 : f32 to vector<32x128xf32>
    %c0_99 = arith.constant 0 : index
    %c0_100 = arith.constant 0 : index
    %c0_101 = arith.constant 0 : index
    %60 = vector.load %arg34[%c0_99, %c0_100, %c0_101] : memref<2x18x128xf32, #tpu.memory_space<vmem>>, vector<2x16x128xf32>
    %61 = vector.shape_cast %60 : vector<2x16x128xf32> to vector<32x128xf32>
    %c0_102 = arith.constant 0 : index
    %c0_103 = arith.constant 0 : index
    %c0_104 = arith.constant 0 : index
    %62 = vector.load %arg3[%c0_102, %c0_103, %c0_104] : memref<3x128x128xf32, #tpu.memory_space<vmem>>, vector<1x128x128xf32>
    %63 = vector.shape_cast %62 : vector<1x128x128xf32> to vector<128x128xf32>
    %cst_105 = arith.constant dense<0.000000e+00> : vector<32x128xf32>
    %64 = tpu.matmul %61, %63, %cst_105 {dimension_numbers = #tpu.dot_dimension_numbers<[1], [0], [0], [1], [0, 0, 1, 1], [], []>} : vector<32x128xf32>, vector<128x128xf32>, vector<32x128xf32> -> vector<32x128xf32>
    %65 = arith.addf %59, %64 : vector<32x128xf32>
    %c0_106 = arith.constant 0 : index
    %c1_107 = arith.constant 1 : index
    %c0_108 = arith.constant 0 : index
    %66 = vector.load %arg34[%c0_106, %c1_107, %c0_108] : memref<2x18x128xf32, #tpu.memory_space<vmem>>, vector<2x16x128xf32>
    %67 = vector.shape_cast %66 : vector<2x16x128xf32> to vector<32x128xf32>
    %c1_109 = arith.constant 1 : index
    %c0_110 = arith.constant 0 : index
    %c0_111 = arith.constant 0 : index
    %68 = vector.load %arg3[%c1_109, %c0_110, %c0_111] : memref<3x128x128xf32, #tpu.memory_space<vmem>>, vector<1x128x128xf32>
    %69 = vector.shape_cast %68 : vector<1x128x128xf32> to vector<128x128xf32>
    %cst_112 = arith.constant dense<0.000000e+00> : vector<32x128xf32>
    %70 = tpu.matmul %67, %69, %cst_112 {dimension_numbers = #tpu.dot_dimension_numbers<[1], [0], [0], [1], [0, 0, 1, 1], [], []>} : vector<32x128xf32>, vector<128x128xf32>, vector<32x128xf32> -> vector<32x128xf32>
    %71 = arith.addf %65, %70 : vector<32x128xf32>
    %c0_113 = arith.constant 0 : index
    %c2_114 = arith.constant 2 : index
    %c0_115 = arith.constant 0 : index
    %72 = vector.load %arg34[%c0_113, %c2_114, %c0_115] : memref<2x18x128xf32, #tpu.memory_space<vmem>>, vector<2x16x128xf32>
    %73 = vector.shape_cast %72 : vector<2x16x128xf32> to vector<32x128xf32>
    %c2_116 = arith.constant 2 : index
    %c0_117 = arith.constant 0 : index
    %c0_118 = arith.constant 0 : index
    %74 = vector.load %arg3[%c2_116, %c0_117, %c0_118] : memref<3x128x128xf32, #tpu.memory_space<vmem>>, vector<1x128x128xf32>
    %75 = vector.shape_cast %74 : vector<1x128x128xf32> to vector<128x128xf32>
    %cst_119 = arith.constant dense<0.000000e+00> : vector<32x128xf32>
    %76 = tpu.matmul %73, %75, %cst_119 {dimension_numbers = #tpu.dot_dimension_numbers<[1], [0], [0], [1], [0, 0, 1, 1], [], []>} : vector<32x128xf32>, vector<128x128xf32>, vector<32x128xf32> -> vector<32x128xf32>
    %77 = arith.addf %71, %76 : vector<32x128xf32>
    %c0_120 = arith.constant 0 : index
    %c0_121 = arith.constant 0 : index
    %78 = vector.load %arg4[%c0_120, %c0_121] : memref<1x128xf32, #tpu.memory_space<vmem>>, vector<1x128xf32>
    %79 = vector.broadcast %78 : vector<1x128xf32> to vector<32x128xf32>
    %80 = arith.addf %77, %79 : vector<32x128xf32>
    %cst_122 = arith.constant 0.000000e+00 : f32
    %81 = vector.broadcast %cst_122 : f32 to vector<32x128xf32>
    %82 = arith.maximumf %80, %81 : vector<32x128xf32>
    %83 = vector.shape_cast %82 : vector<32x128xf32> to vector<2x16x128xf32>
    %c0_123 = arith.constant 0 : index
    %c1_124 = arith.constant 1 : index
    %c0_125 = arith.constant 0 : index
    %84 = vector.load %arg35[%c0_123, %c1_124, %c0_125] : memref<2x18x128xf32, #tpu.memory_space<vmem>>, vector<2x16x128xf32>
    tpu.vector_store %arg35[%c0_123, %c1_124, %c0_125], %83 {strides = array<i32>} : memref<2x18x128xf32, #tpu.memory_space<vmem>>, vector<2x16x128xf32>,
    %85 = vector.shape_cast %82 : vector<32x128xf32> to vector<16x2x128xf32>
    %86 = vector.extract_strided_slice %85 {offsets = [0, 0, 0], sizes = [16, 1, 128], strides = [1, 1, 1]} : vector<16x2x128xf32> to vector<16x1x128xf32>
    %87 = vector.shape_cast %86 : vector<16x1x128xf32> to vector<16x128xf32>
    %88 = vector.extract_strided_slice %85 {offsets = [0, 1, 0], sizes = [16, 1, 128], strides = [1, 1, 1]} : vector<16x2x128xf32> to vector<16x1x128xf32>
    %89 = vector.shape_cast %88 : vector<16x1x128xf32> to vector<16x128xf32>
    %90 = arith.maximumf %87, %89 : vector<16x128xf32>
    %c0_126 = arith.constant 0 : index
    %c0_127 = arith.constant 0 : index
    %91 = vector.load %arg5[%c0_126, %c0_127] : memref<128x64xf32, #tpu.memory_space<vmem>>, vector<128x64xf32>
    %cst_128 = arith.constant dense<0.000000e+00> : vector<16x64xf32>
    %92 = tpu.matmul %90, %91, %cst_128 {dimension_numbers = #tpu.dot_dimension_numbers<[1], [0], [0], [1], [0, 0, 1, 1], [], []>} : vector<16x128xf32>, vector<128x64xf32>, vector<16x64xf32> -> vector<16x64xf32>
    %c0_129 = arith.constant 0 : index
    %c0_130 = arith.constant 0 : index
    %93 = vector.load %arg6[%c0_129, %c0_130] : memref<128x64xf32, #tpu.memory_space<vmem>>, vector<128x64xf32>
    %cst_131 = arith.constant dense<0.000000e+00> : vector<16x64xf32>
    %94 = tpu.matmul %90, %93, %cst_131 {dimension_numbers = #tpu.dot_dimension_numbers<[1], [0], [0], [1], [0, 0, 1, 1], [], []>} : vector<16x128xf32>, vector<128x64xf32>, vector<16x64xf32> -> vector<16x64xf32>
    %95 = arith.maximumf %92, %94 : vector<16x64xf32>
    %96 = vector.shape_cast %95 : vector<16x64xf32> to vector<2x8x64xf32>
    %c0_132 = arith.constant 0 : index
    %c1_133 = arith.constant 1 : index
    %c0_134 = arith.constant 0 : index
    %97 = vector.load %arg36[%c0_132, %c1_133, %c0_134] : memref<2x10x64xf32, #tpu.memory_space<vmem>>, vector<2x8x64xf32>
    tpu.vector_store %arg36[%c0_132, %c1_133, %c0_134], %96 {strides = array<i32>} : memref<2x10x64xf32, #tpu.memory_space<vmem>>, vector<2x8x64xf32>,
    %cst_135 = arith.constant 0.000000e+00 : f32
    %98 = vector.broadcast %cst_135 : f32 to vector<16x128xf32>
    %c0_136 = arith.constant 0 : index
    %c0_137 = arith.constant 0 : index
    %c0_138 = arith.constant 0 : index
    %99 = vector.load %arg36[%c0_136, %c0_137, %c0_138] : memref<2x10x64xf32, #tpu.memory_space<vmem>>, vector<2x8x64xf32>
    %100 = vector.shape_cast %99 : vector<2x8x64xf32> to vector<16x64xf32>
    %c0_139 = arith.constant 0 : index
    %c0_140 = arith.constant 0 : index
    %c0_141 = arith.constant 0 : index
    %101 = vector.load %arg7[%c0_139, %c0_140, %c0_141] : memref<3x64x128xf32, #tpu.memory_space<vmem>>, vector<1x64x128xf32>
    %102 = vector.shape_cast %101 : vector<1x64x128xf32> to vector<64x128xf32>
    %cst_142 = arith.constant dense<0.000000e+00> : vector<16x128xf32>
    %103 = tpu.matmul %100, %102, %cst_142 {dimension_numbers = #tpu.dot_dimension_numbers<[1], [0], [0], [1], [0, 0, 1, 1], [], []>} : vector<16x64xf32>, vector<64x128xf32>, vector<16x128xf32> -> vector<16x128xf32>
    %104 = arith.addf %98, %103 : vector<16x128xf32>
    %c0_143 = arith.constant 0 : index
    %c1_144 = arith.constant 1 : index
    %c0_145 = arith.constant 0 : index
    %105 = vector.load %arg36[%c0_143, %c1_144, %c0_145] : memref<2x10x64xf32, #tpu.memory_space<vmem>>, vector<2x8x64xf32>
    %106 = vector.shape_cast %105 : vector<2x8x64xf32> to vector<16x64xf32>
    %c1_146 = arith.constant 1 : index
    %c0_147 = arith.constant 0 : index
    %c0_148 = arith.constant 0 : index
    %107 = vector.load %arg7[%c1_146, %c0_147, %c0_148] : memref<3x64x128xf32, #tpu.memory_space<vmem>>, vector<1x64x128xf32>
    %108 = vector.shape_cast %107 : vector<1x64x128xf32> to vector<64x128xf32>
    %cst_149 = arith.constant dense<0.000000e+00> : vector<16x128xf32>
    %109 = tpu.matmul %106, %108, %cst_149 {dimension_numbers = #tpu.dot_dimension_numbers<[1], [0], [0], [1], [0, 0, 1, 1], [], []>} : vector<16x64xf32>, vector<64x128xf32>, vector<16x128xf32> -> vector<16x128xf32>
    %110 = arith.addf %104, %109 : vector<16x128xf32>
    %c0_150 = arith.constant 0 : index
    %c2_151 = arith.constant 2 : index
    %c0_152 = arith.constant 0 : index
    %111 = vector.load %arg36[%c0_150, %c2_151, %c0_152] : memref<2x10x64xf32, #tpu.memory_space<vmem>>, vector<2x8x64xf32>
    %112 = vector.shape_cast %111 : vector<2x8x64xf32> to vector<16x64xf32>
    %c2_153 = arith.constant 2 : index
    %c0_154 = arith.constant 0 : index
    %c0_155 = arith.constant 0 : index
    %113 = vector.load %arg7[%c2_153, %c0_154, %c0_155] : memref<3x64x128xf32, #tpu.memory_space<vmem>>, vector<1x64x128xf32>
    %114 = vector.shape_cast %113 : vector<1x64x128xf32> to vector<64x128xf32>
    %cst_156 = arith.constant dense<0.000000e+00> : vector<16x128xf32>
    %115 = tpu.matmul %112, %114, %cst_156 {dimension_numbers = #tpu.dot_dimension_numbers<[1], [0], [0], [1], [0, 0, 1, 1], [], []>} : vector<16x64xf32>, vector<64x128xf32>, vector<16x128xf32> -> vector<16x128xf32>
    %116 = arith.addf %110, %115 : vector<16x128xf32>
    %c0_157 = arith.constant 0 : index
    %c0_158 = arith.constant 0 : index
    %117 = vector.load %arg8[%c0_157, %c0_158] : memref<1x128xf32, #tpu.memory_space<vmem>>, vector<1x128xf32>
    %118 = vector.broadcast %117 : vector<1x128xf32> to vector<16x128xf32>
    %119 = arith.addf %116, %118 : vector<16x128xf32>
    %cst_159 = arith.constant 0.000000e+00 : f32
    %120 = vector.broadcast %cst_159 : f32 to vector<16x128xf32>
    %121 = arith.maximumf %119, %120 : vector<16x128xf32>
    %122 = vector.shape_cast %121 : vector<16x128xf32> to vector<2x8x128xf32>
    %c0_160 = arith.constant 0 : index
    %c1_161 = arith.constant 1 : index
    %c0_162 = arith.constant 0 : index
    %123 = vector.load %arg37[%c0_160, %c1_161, %c0_162] : memref<2x10x128xf32, #tpu.memory_space<vmem>>, vector<2x8x128xf32>
    tpu.vector_store %arg37[%c0_160, %c1_161, %c0_162], %122 {strides = array<i32>} : memref<2x10x128xf32, #tpu.memory_space<vmem>>, vector<2x8x128xf32>,
    %cst_163 = arith.constant 0.000000e+00 : f32
    %124 = vector.broadcast %cst_163 : f32 to vector<16x128xf32>
    %c0_164 = arith.constant 0 : index
    %c0_165 = arith.constant 0 : index
    %c0_166 = arith.constant 0 : index
    %125 = vector.load %arg37[%c0_164, %c0_165, %c0_166] : memref<2x10x128xf32, #tpu.memory_space<vmem>>, vector<2x8x128xf32>
    %126 = vector.shape_cast %125 : vector<2x8x128xf32> to vector<16x128xf32>
    %c0_167 = arith.constant 0 : index
    %c0_168 = arith.constant 0 : index
    %c0_169 = arith.constant 0 : index
    %127 = vector.load %arg9[%c0_167, %c0_168, %c0_169] : memref<3x128x128xf32, #tpu.memory_space<vmem>>, vector<1x128x128xf32>
    %128 = vector.shape_cast %127 : vector<1x128x128xf32> to vector<128x128xf32>
    %cst_170 = arith.constant dense<0.000000e+00> : vector<16x128xf32>
    %129 = tpu.matmul %126, %128, %cst_170 {dimension_numbers = #tpu.dot_dimension_numbers<[1], [0], [0], [1], [0, 0, 1, 1], [], []>} : vector<16x128xf32>, vector<128x128xf32>, vector<16x128xf32> -> vector<16x128xf32>
    %130 = arith.addf %124, %129 : vector<16x128xf32>
    %c0_171 = arith.constant 0 : index
    %c1_172 = arith.constant 1 : index
    %c0_173 = arith.constant 0 : index
    %131 = vector.load %arg37[%c0_171, %c1_172, %c0_173] : memref<2x10x128xf32, #tpu.memory_space<vmem>>, vector<2x8x128xf32>
    %132 = vector.shape_cast %131 : vector<2x8x128xf32> to vector<16x128xf32>
    %c1_174 = arith.constant 1 : index
    %c0_175 = arith.constant 0 : index
    %c0_176 = arith.constant 0 : index
    %133 = vector.load %arg9[%c1_174, %c0_175, %c0_176] : memref<3x128x128xf32, #tpu.memory_space<vmem>>, vector<1x128x128xf32>
    %134 = vector.shape_cast %133 : vector<1x128x128xf32> to vector<128x128xf32>
    %cst_177 = arith.constant dense<0.000000e+00> : vector<16x128xf32>
    %135 = tpu.matmul %132, %134, %cst_177 {dimension_numbers = #tpu.dot_dimension_numbers<[1], [0], [0], [1], [0, 0, 1, 1], [], []>} : vector<16x128xf32>, vector<128x128xf32>, vector<16x128xf32> -> vector<16x128xf32>
    %136 = arith.addf %130, %135 : vector<16x128xf32>
    %c0_178 = arith.constant 0 : index
    %c2_179 = arith.constant 2 : index
    %c0_180 = arith.constant 0 : index
    %137 = vector.load %arg37[%c0_178, %c2_179, %c0_180] : memref<2x10x128xf32, #tpu.memory_space<vmem>>, vector<2x8x128xf32>
    %138 = vector.shape_cast %137 : vector<2x8x128xf32> to vector<16x128xf32>
    %c2_181 = arith.constant 2 : index
    %c0_182 = arith.constant 0 : index
    %c0_183 = arith.constant 0 : index
    %139 = vector.load %arg9[%c2_181, %c0_182, %c0_183] : memref<3x128x128xf32, #tpu.memory_space<vmem>>, vector<1x128x128xf32>
    %140 = vector.shape_cast %139 : vector<1x128x128xf32> to vector<128x128xf32>
    %cst_184 = arith.constant dense<0.000000e+00> : vector<16x128xf32>
    %141 = tpu.matmul %138, %140, %cst_184 {dimension_numbers = #tpu.dot_dimension_numbers<[1], [0], [0], [1], [0, 0, 1, 1], [], []>} : vector<16x128xf32>, vector<128x128xf32>, vector<16x128xf32> -> vector<16x128xf32>
    %142 = arith.addf %136, %141 : vector<16x128xf32>
    %c0_185 = arith.constant 0 : index
    %c0_186 = arith.constant 0 : index
    %143 = vector.load %arg10[%c0_185, %c0_186] : memref<1x128xf32, #tpu.memory_space<vmem>>, vector<1x128xf32>
    %144 = vector.broadcast %143 : vector<1x128xf32> to vector<16x128xf32>
    %145 = arith.addf %142, %144 : vector<16x128xf32>
    %cst_187 = arith.constant 0.000000e+00 : f32
    %146 = vector.broadcast %cst_187 : f32 to vector<16x128xf32>
    %147 = arith.maximumf %145, %146 : vector<16x128xf32>
    %148 = vector.shape_cast %147 : vector<16x128xf32> to vector<2x8x128xf32>
    %c0_188 = arith.constant 0 : index
    %c1_189 = arith.constant 1 : index
    %c0_190 = arith.constant 0 : index
    %149 = vector.load %arg38[%c0_188, %c1_189, %c0_190] : memref<2x10x128xf32, #tpu.memory_space<vmem>>, vector<2x8x128xf32>
    tpu.vector_store %arg38[%c0_188, %c1_189, %c0_190], %148 {strides = array<i32>} : memref<2x10x128xf32, #tpu.memory_space<vmem>>, vector<2x8x128xf32>,
    %150 = vector.shape_cast %147 : vector<16x128xf32> to vector<8x2x128xf32>
    %151 = vector.extract_strided_slice %150 {offsets = [0, 0, 0], sizes = [8, 1, 128], strides = [1, 1, 1]} : vector<8x2x128xf32> to vector<8x1x128xf32>
    %152 = vector.shape_cast %151 : vector<8x1x128xf32> to vector<8x128xf32>
    %153 = vector.extract_strided_slice %150 {offsets = [0, 1, 0], sizes = [8, 1, 128], strides = [1, 1, 1]} : vector<8x2x128xf32> to vector<8x1x128xf32>
    %154 = vector.shape_cast %153 : vector<8x1x128xf32> to vector<8x128xf32>
    %155 = arith.maximumf %152, %154 : vector<8x128xf32>
    %c0_191 = arith.constant 0 : index
    %c0_192 = arith.constant 0 : index
    %156 = vector.load %arg11[%c0_191, %c0_192] : memref<128x64xf32, #tpu.memory_space<vmem>>, vector<128x64xf32>
    %cst_193 = arith.constant dense<0.000000e+00> : vector<8x64xf32>
    %157 = tpu.matmul %155, %156, %cst_193 {dimension_numbers = #tpu.dot_dimension_numbers<[1], [0], [0], [1], [0, 0, 1, 1], [], []>} : vector<8x128xf32>, vector<128x64xf32>, vector<8x64xf32> -> vector<8x64xf32>
    %c0_194 = arith.constant 0 : index
    %c0_195 = arith.constant 0 : index
    %158 = vector.load %arg12[%c0_194, %c0_195] : memref<128x64xf32, #tpu.memory_space<vmem>>, vector<128x64xf32>
    %cst_196 = arith.constant dense<0.000000e+00> : vector<8x64xf32>
    %159 = tpu.matmul %155, %158, %cst_196 {dimension_numbers = #tpu.dot_dimension_numbers<[1], [0], [0], [1], [0, 0, 1, 1], [], []>} : vector<8x128xf32>, vector<128x64xf32>, vector<8x64xf32> -> vector<8x64xf32>
    %160 = arith.maximumf %157, %159 : vector<8x64xf32>
    %161 = vector.shape_cast %160 : vector<8x64xf32> to vector<2x4x64xf32>
    %c0_197 = arith.constant 0 : index
    %c1_198 = arith.constant 1 : index
    %c0_199 = arith.constant 0 : index
    %162 = vector.load %arg39[%c0_197, %c1_198, %c0_199] : memref<2x6x64xf32, #tpu.memory_space<vmem>>, vector<2x4x64xf32>
    tpu.vector_store %arg39[%c0_197, %c1_198, %c0_199], %161 {strides = array<i32>} : memref<2x6x64xf32, #tpu.memory_space<vmem>>, vector<2x4x64xf32>,
    %cst_200 = arith.constant 0.000000e+00 : f32
    %163 = vector.broadcast %cst_200 : f32 to vector<8x128xf32>
    %c0_201 = arith.constant 0 : index
    %c0_202 = arith.constant 0 : index
    %c0_203 = arith.constant 0 : index
    %164 = vector.load %arg39[%c0_201, %c0_202, %c0_203] : memref<2x6x64xf32, #tpu.memory_space<vmem>>, vector<2x4x64xf32>
    %165 = vector.shape_cast %164 : vector<2x4x64xf32> to vector<8x64xf32>
    %c0_204 = arith.constant 0 : index
    %c0_205 = arith.constant 0 : index
    %c0_206 = arith.constant 0 : index
    %166 = vector.load %arg13[%c0_204, %c0_205, %c0_206] : memref<3x64x128xf32, #tpu.memory_space<vmem>>, vector<1x64x128xf32>
    %167 = vector.shape_cast %166 : vector<1x64x128xf32> to vector<64x128xf32>
    %cst_207 = arith.constant dense<0.000000e+00> : vector<8x128xf32>
    %168 = tpu.matmul %165, %167, %cst_207 {dimension_numbers = #tpu.dot_dimension_numbers<[1], [0], [0], [1], [0, 0, 1, 1], [], []>} : vector<8x64xf32>, vector<64x128xf32>, vector<8x128xf32> -> vector<8x128xf32>
    %169 = arith.addf %163, %168 : vector<8x128xf32>
    %c0_208 = arith.constant 0 : index
    %c1_209 = arith.constant 1 : index
    %c0_210 = arith.constant 0 : index
    %170 = vector.load %arg39[%c0_208, %c1_209, %c0_210] : memref<2x6x64xf32, #tpu.memory_space<vmem>>, vector<2x4x64xf32>
    %171 = vector.shape_cast %170 : vector<2x4x64xf32> to vector<8x64xf32>
    %c1_211 = arith.constant 1 : index
    %c0_212 = arith.constant 0 : index
    %c0_213 = arith.constant 0 : index
    %172 = vector.load %arg13[%c1_211, %c0_212, %c0_213] : memref<3x64x128xf32, #tpu.memory_space<vmem>>, vector<1x64x128xf32>
    %173 = vector.shape_cast %172 : vector<1x64x128xf32> to vector<64x128xf32>
    %cst_214 = arith.constant dense<0.000000e+00> : vector<8x128xf32>
    %174 = tpu.matmul %171, %173, %cst_214 {dimension_numbers = #tpu.dot_dimension_numbers<[1], [0], [0], [1], [0, 0, 1, 1], [], []>} : vector<8x64xf32>, vector<64x128xf32>, vector<8x128xf32> -> vector<8x128xf32>
    %175 = arith.addf %169, %174 : vector<8x128xf32>
    %c0_215 = arith.constant 0 : index
    %c2_216 = arith.constant 2 : index
    %c0_217 = arith.constant 0 : index
    %176 = vector.load %arg39[%c0_215, %c2_216, %c0_217] : memref<2x6x64xf32, #tpu.memory_space<vmem>>, vector<2x4x64xf32>
    %177 = vector.shape_cast %176 : vector<2x4x64xf32> to vector<8x64xf32>
    %c2_218 = arith.constant 2 : index
    %c0_219 = arith.constant 0 : index
    %c0_220 = arith.constant 0 : index
    %178 = vector.load %arg13[%c2_218, %c0_219, %c0_220] : memref<3x64x128xf32, #tpu.memory_space<vmem>>, vector<1x64x128xf32>
    %179 = vector.shape_cast %178 : vector<1x64x128xf32> to vector<64x128xf32>
    %cst_221 = arith.constant dense<0.000000e+00> : vector<8x128xf32>
    %180 = tpu.matmul %177, %179, %cst_221 {dimension_numbers = #tpu.dot_dimension_numbers<[1], [0], [0], [1], [0, 0, 1, 1], [], []>} : vector<8x64xf32>, vector<64x128xf32>, vector<8x128xf32> -> vector<8x128xf32>
    %181 = arith.addf %175, %180 : vector<8x128xf32>
    %c0_222 = arith.constant 0 : index
    %c0_223 = arith.constant 0 : index
    %182 = vector.load %arg14[%c0_222, %c0_223] : memref<1x128xf32, #tpu.memory_space<vmem>>, vector<1x128xf32>
    %183 = vector.broadcast %182 : vector<1x128xf32> to vector<8x128xf32>
    %184 = arith.addf %181, %183 : vector<8x128xf32>
    %cst_224 = arith.constant 0.000000e+00 : f32
    %185 = vector.broadcast %cst_224 : f32 to vector<8x128xf32>
    %186 = arith.maximumf %184, %185 : vector<8x128xf32>
    %187 = vector.shape_cast %186 : vector<8x128xf32> to vector<2x4x128xf32>
    %c0_225 = arith.constant 0 : index
    %c1_226 = arith.constant 1 : index
    %c0_227 = arith.constant 0 : index
    %188 = vector.load %arg40[%c0_225, %c1_226, %c0_227] : memref<2x6x128xf32, #tpu.memory_space<vmem>>, vector<2x4x128xf32>
    tpu.vector_store %arg40[%c0_225, %c1_226, %c0_227], %187 {strides = array<i32>} : memref<2x6x128xf32, #tpu.memory_space<vmem>>, vector<2x4x128xf32>,
    %cst_228 = arith.constant 0.000000e+00 : f32
    %189 = vector.broadcast %cst_228 : f32 to vector<8x128xf32>
    %c0_229 = arith.constant 0 : index
    %c0_230 = arith.constant 0 : index
    %c0_231 = arith.constant 0 : index
    %190 = vector.load %arg40[%c0_229, %c0_230, %c0_231] : memref<2x6x128xf32, #tpu.memory_space<vmem>>, vector<2x4x128xf32>
    %191 = vector.shape_cast %190 : vector<2x4x128xf32> to vector<8x128xf32>
    %c0_232 = arith.constant 0 : index
    %c0_233 = arith.constant 0 : index
    %c0_234 = arith.constant 0 : index
    %192 = vector.load %arg15[%c0_232, %c0_233, %c0_234] : memref<3x128x128xf32, #tpu.memory_space<vmem>>, vector<1x128x128xf32>
    %193 = vector.shape_cast %192 : vector<1x128x128xf32> to vector<128x128xf32>
    %cst_235 = arith.constant dense<0.000000e+00> : vector<8x128xf32>
    %194 = tpu.matmul %191, %193, %cst_235 {dimension_numbers = #tpu.dot_dimension_numbers<[1], [0], [0], [1], [0, 0, 1, 1], [], []>} : vector<8x128xf32>, vector<128x128xf32>, vector<8x128xf32> -> vector<8x128xf32>
    %195 = arith.addf %189, %194 : vector<8x128xf32>
    %c0_236 = arith.constant 0 : index
    %c1_237 = arith.constant 1 : index
    %c0_238 = arith.constant 0 : index
    %196 = vector.load %arg40[%c0_236, %c1_237, %c0_238] : memref<2x6x128xf32, #tpu.memory_space<vmem>>, vector<2x4x128xf32>
    %197 = vector.shape_cast %196 : vector<2x4x128xf32> to vector<8x128xf32>
    %c1_239 = arith.constant 1 : index
    %c0_240 = arith.constant 0 : index
    %c0_241 = arith.constant 0 : index
    %198 = vector.load %arg15[%c1_239, %c0_240, %c0_241] : memref<3x128x128xf32, #tpu.memory_space<vmem>>, vector<1x128x128xf32>
    %199 = vector.shape_cast %198 : vector<1x128x128xf32> to vector<128x128xf32>
    %cst_242 = arith.constant dense<0.000000e+00> : vector<8x128xf32>
    %200 = tpu.matmul %197, %199, %cst_242 {dimension_numbers = #tpu.dot_dimension_numbers<[1], [0], [0], [1], [0, 0, 1, 1], [], []>} : vector<8x128xf32>, vector<128x128xf32>, vector<8x128xf32> -> vector<8x128xf32>
    %201 = arith.addf %195, %200 : vector<8x128xf32>
    %c0_243 = arith.constant 0 : index
    %c2_244 = arith.constant 2 : index
    %c0_245 = arith.constant 0 : index
    %202 = vector.load %arg40[%c0_243, %c2_244, %c0_245] : memref<2x6x128xf32, #tpu.memory_space<vmem>>, vector<2x4x128xf32>
    %203 = vector.shape_cast %202 : vector<2x4x128xf32> to vector<8x128xf32>
    %c2_246 = arith.constant 2 : index
    %c0_247 = arith.constant 0 : index
    %c0_248 = arith.constant 0 : index
    %204 = vector.load %arg15[%c2_246, %c0_247, %c0_248] : memref<3x128x128xf32, #tpu.memory_space<vmem>>, vector<1x128x128xf32>
    %205 = vector.shape_cast %204 : vector<1x128x128xf32> to vector<128x128xf32>
    %cst_249 = arith.constant dense<0.000000e+00> : vector<8x128xf32>
    %206 = tpu.matmul %203, %205, %cst_249 {dimension_numbers = #tpu.dot_dimension_numbers<[1], [0], [0], [1], [0, 0, 1, 1], [], []>} : vector<8x128xf32>, vector<128x128xf32>, vector<8x128xf32> -> vector<8x128xf32>
    %207 = arith.addf %201, %206 : vector<8x128xf32>
    %c0_250 = arith.constant 0 : index
    %c0_251 = arith.constant 0 : index
    %208 = vector.load %arg16[%c0_250, %c0_251] : memref<1x128xf32, #tpu.memory_space<vmem>>, vector<1x128xf32>
    %209 = vector.broadcast %208 : vector<1x128xf32> to vector<8x128xf32>
    %210 = arith.addf %207, %209 : vector<8x128xf32>
    %cst_252 = arith.constant 0.000000e+00 : f32
    %211 = vector.broadcast %cst_252 : f32 to vector<8x128xf32>
    %212 = arith.maximumf %210, %211 : vector<8x128xf32>
    %c0_253 = arith.constant 0 : index
    %c0_254 = arith.constant 0 : index
    %c0_255 = arith.constant 0 : index
    %213 = vector.load %arg17[%c0_253, %c0_254, %c0_255] : memref<2x128x128xf32, #tpu.memory_space<vmem>>, vector<1x128x128xf32>
    %214 = vector.shape_cast %213 : vector<1x128x128xf32> to vector<128x128xf32>
    %cst_256 = arith.constant dense<0.000000e+00> : vector<8x128xf32>
    %215 = tpu.matmul %212, %214, %cst_256 {dimension_numbers = #tpu.dot_dimension_numbers<[1], [0], [0], [1], [0, 0, 1, 1], [], []>} : vector<8x128xf32>, vector<128x128xf32>, vector<8x128xf32> -> vector<8x128xf32>
    %c1_257 = arith.constant 1 : index
    %c0_258 = arith.constant 0 : index
    %c0_259 = arith.constant 0 : index
    %216 = vector.load %arg17[%c1_257, %c0_258, %c0_259] : memref<2x128x128xf32, #tpu.memory_space<vmem>>, vector<1x128x128xf32>
    %217 = vector.shape_cast %216 : vector<1x128x128xf32> to vector<128x128xf32>
    %cst_260 = arith.constant dense<0.000000e+00> : vector<8x128xf32>
    %218 = tpu.matmul %212, %217, %cst_260 {dimension_numbers = #tpu.dot_dimension_numbers<[1], [0], [0], [1], [0, 0, 1, 1], [], []>} : vector<8x128xf32>, vector<128x128xf32>, vector<8x128xf32> -> vector<8x128xf32>
    %219 = vector.shape_cast %215 : vector<8x128xf32> to vector<8x1x128xf32>
    %220 = vector.shape_cast %218 : vector<8x128xf32> to vector<8x1x128xf32>
    %221 = tpu.concatenate %219, %220 in 1 : vector<8x1x128xf32>, vector<8x1x128xf32> -> vector<8x2x128xf32>
    %222 = vector.shape_cast %221 : vector<8x2x128xf32> to vector<2x8x128xf32>
    %c0_261 = arith.constant 0 : index
    %c0_262 = arith.constant 0 : index
    %223 = vector.load %arg18[%c0_261, %c0_262] : memref<1x128xf32, #tpu.memory_space<vmem>>, vector<1x128xf32>
    %224 = vector.shape_cast %223 : vector<1x128xf32> to vector<1x1x128xf32>
    %225 = vector.broadcast %224 : vector<1x1x128xf32> to vector<2x8x128xf32>
    %226 = arith.addf %222, %225 : vector<2x8x128xf32>
    %c0_263 = arith.constant 0 : index
    %c1_264 = arith.constant 1 : index
    %c0_265 = arith.constant 0 : index
    %227 = vector.load %arg41[%c0_263, %c1_264, %c0_265] : memref<2x10x128xf32, #tpu.memory_space<vmem>>, vector<2x8x128xf32>
    tpu.vector_store %arg41[%c0_263, %c1_264, %c0_265], %226 {strides = array<i32>} : memref<2x10x128xf32, #tpu.memory_space<vmem>>, vector<2x8x128xf32>,
    %cst_266 = arith.constant 0.000000e+00 : f32
    %228 = vector.broadcast %cst_266 : f32 to vector<16x128xf32>
    %c0_267 = arith.constant 0 : index
    %c0_268 = arith.constant 0 : index
    %c0_269 = arith.constant 0 : index
    %229 = vector.load %arg41[%c0_267, %c0_268, %c0_269] : memref<2x10x128xf32, #tpu.memory_space<vmem>>, vector<2x8x128xf32>
    %230 = vector.shape_cast %229 : vector<2x8x128xf32> to vector<16x128xf32>
    %c0_270 = arith.constant 0 : index
    %c0_271 = arith.constant 0 : index
    %c0_272 = arith.constant 0 : index
    %231 = vector.load %arg19[%c0_270, %c0_271, %c0_272] : memref<3x128x128xf32, #tpu.memory_space<vmem>>, vector<1x128x128xf32>
    %232 = vector.shape_cast %231 : vector<1x128x128xf32> to vector<128x128xf32>
    %cst_273 = arith.constant dense<0.000000e+00> : vector<16x128xf32>
    %233 = tpu.matmul %230, %232, %cst_273 {dimension_numbers = #tpu.dot_dimension_numbers<[1], [0], [0], [1], [0, 0, 1, 1], [], []>} : vector<16x128xf32>, vector<128x128xf32>, vector<16x128xf32> -> vector<16x128xf32>
    %234 = arith.addf %228, %233 : vector<16x128xf32>
    %c0_274 = arith.constant 0 : index
    %c1_275 = arith.constant 1 : index
    %c0_276 = arith.constant 0 : index
    %235 = vector.load %arg41[%c0_274, %c1_275, %c0_276] : memref<2x10x128xf32, #tpu.memory_space<vmem>>, vector<2x8x128xf32>
    %236 = vector.shape_cast %235 : vector<2x8x128xf32> to vector<16x128xf32>
    %c1_277 = arith.constant 1 : index
    %c0_278 = arith.constant 0 : index
    %c0_279 = arith.constant 0 : index
    %237 = vector.load %arg19[%c1_277, %c0_278, %c0_279] : memref<3x128x128xf32, #tpu.memory_space<vmem>>, vector<1x128x128xf32>
    %238 = vector.shape_cast %237 : vector<1x128x128xf32> to vector<128x128xf32>
    %cst_280 = arith.constant dense<0.000000e+00> : vector<16x128xf32>
    %239 = tpu.matmul %236, %238, %cst_280 {dimension_numbers = #tpu.dot_dimension_numbers<[1], [0], [0], [1], [0, 0, 1, 1], [], []>} : vector<16x128xf32>, vector<128x128xf32>, vector<16x128xf32> -> vector<16x128xf32>
    %240 = arith.addf %234, %239 : vector<16x128xf32>
    %c0_281 = arith.constant 0 : index
    %c2_282 = arith.constant 2 : index
    %c0_283 = arith.constant 0 : index
    %241 = vector.load %arg41[%c0_281, %c2_282, %c0_283] : memref<2x10x128xf32, #tpu.memory_space<vmem>>, vector<2x8x128xf32>
    %242 = vector.shape_cast %241 : vector<2x8x128xf32> to vector<16x128xf32>
    %c2_284 = arith.constant 2 : index
    %c0_285 = arith.constant 0 : index
    %c0_286 = arith.constant 0 : index
    %243 = vector.load %arg19[%c2_284, %c0_285, %c0_286] : memref<3x128x128xf32, #tpu.memory_space<vmem>>, vector<1x128x128xf32>
    %244 = vector.shape_cast %243 : vector<1x128x128xf32> to vector<128x128xf32>
    %cst_287 = arith.constant dense<0.000000e+00> : vector<16x128xf32>
    %245 = tpu.matmul %242, %244, %cst_287 {dimension_numbers = #tpu.dot_dimension_numbers<[1], [0], [0], [1], [0, 0, 1, 1], [], []>} : vector<16x128xf32>, vector<128x128xf32>, vector<16x128xf32> -> vector<16x128xf32>
    %246 = arith.addf %240, %245 : vector<16x128xf32>
    %c0_288 = arith.constant 0 : index
    %c0_289 = arith.constant 0 : index
    %c0_290 = arith.constant 0 : index
    %247 = vector.load %arg38[%c0_288, %c0_289, %c0_290] : memref<2x10x128xf32, #tpu.memory_space<vmem>>, vector<2x8x128xf32>
    %248 = vector.shape_cast %247 : vector<2x8x128xf32> to vector<16x128xf32>
    %c0_291 = arith.constant 0 : index
    %c0_292 = arith.constant 0 : index
    %c0_293 = arith.constant 0 : index
    %249 = vector.load %arg20[%c0_291, %c0_292, %c0_293] : memref<3x128x128xf32, #tpu.memory_space<vmem>>, vector<1x128x128xf32>
    %250 = vector.shape_cast %249 : vector<1x128x128xf32> to vector<128x128xf32>
    %cst_294 = arith.constant dense<0.000000e+00> : vector<16x128xf32>
    %251 = tpu.matmul %248, %250, %cst_294 {dimension_numbers = #tpu.dot_dimension_numbers<[1], [0], [0], [1], [0, 0, 1, 1], [], []>} : vector<16x128xf32>, vector<128x128xf32>, vector<16x128xf32> -> vector<16x128xf32>
    %252 = arith.addf %246, %251 : vector<16x128xf32>
    %c0_295 = arith.constant 0 : index
    %c1_296 = arith.constant 1 : index
    %c0_297 = arith.constant 0 : index
    %253 = vector.load %arg38[%c0_295, %c1_296, %c0_297] : memref<2x10x128xf32, #tpu.memory_space<vmem>>, vector<2x8x128xf32>
    %254 = vector.shape_cast %253 : vector<2x8x128xf32> to vector<16x128xf32>
    %c1_298 = arith.constant 1 : index
    %c0_299 = arith.constant 0 : index
    %c0_300 = arith.constant 0 : index
    %255 = vector.load %arg20[%c1_298, %c0_299, %c0_300] : memref<3x128x128xf32, #tpu.memory_space<vmem>>, vector<1x128x128xf32>
    %256 = vector.shape_cast %255 : vector<1x128x128xf32> to vector<128x128xf32>
    %cst_301 = arith.constant dense<0.000000e+00> : vector<16x128xf32>
    %257 = tpu.matmul %254, %256, %cst_301 {dimension_numbers = #tpu.dot_dimension_numbers<[1], [0], [0], [1], [0, 0, 1, 1], [], []>} : vector<16x128xf32>, vector<128x128xf32>, vector<16x128xf32> -> vector<16x128xf32>
    %258 = arith.addf %252, %257 : vector<16x128xf32>
    %c0_302 = arith.constant 0 : index
    %c2_303 = arith.constant 2 : index
    %c0_304 = arith.constant 0 : index
    %259 = vector.load %arg38[%c0_302, %c2_303, %c0_304] : memref<2x10x128xf32, #tpu.memory_space<vmem>>, vector<2x8x128xf32>
    %260 = vector.shape_cast %259 : vector<2x8x128xf32> to vector<16x128xf32>
    %c2_305 = arith.constant 2 : index
    %c0_306 = arith.constant 0 : index
    %c0_307 = arith.constant 0 : index
    %261 = vector.load %arg20[%c2_305, %c0_306, %c0_307] : memref<3x128x128xf32, #tpu.memory_space<vmem>>, vector<1x128x128xf32>
    %262 = vector.shape_cast %261 : vector<1x128x128xf32> to vector<128x128xf32>
    %cst_308 = arith.constant dense<0.000000e+00> : vector<16x128xf32>
    %263 = tpu.matmul %260, %262, %cst_308 {dimension_numbers = #tpu.dot_dimension_numbers<[1], [0], [0], [1], [0, 0, 1, 1], [], []>} : vector<16x128xf32>, vector<128x128xf32>, vector<16x128xf32> -> vector<16x128xf32>
    %264 = arith.addf %258, %263 : vector<16x128xf32>
    %c0_309 = arith.constant 0 : index
    %c0_310 = arith.constant 0 : index
    %265 = vector.load %arg21[%c0_309, %c0_310] : memref<1x128xf32, #tpu.memory_space<vmem>>, vector<1x128xf32>
    %266 = vector.broadcast %265 : vector<1x128xf32> to vector<16x128xf32>
    %267 = arith.addf %264, %266 : vector<16x128xf32>
    %cst_311 = arith.constant 0.000000e+00 : f32
    %268 = vector.broadcast %cst_311 : f32 to vector<16x128xf32>
    %269 = arith.maximumf %267, %268 : vector<16x128xf32>
    %270 = vector.shape_cast %269 : vector<16x128xf32> to vector<2x8x128xf32>
    %c0_312 = arith.constant 0 : index
    %c1_313 = arith.constant 1 : index
    %c0_314 = arith.constant 0 : index
    %271 = vector.load %arg42[%c0_312, %c1_313, %c0_314] : memref<2x10x128xf32, #tpu.memory_space<vmem>>, vector<2x8x128xf32>
    tpu.vector_store %arg42[%c0_312, %c1_313, %c0_314], %270 {strides = array<i32>} : memref<2x10x128xf32, #tpu.memory_space<vmem>>, vector<2x8x128xf32>,
    %cst_315 = arith.constant 0.000000e+00 : f32
    %272 = vector.broadcast %cst_315 : f32 to vector<16x128xf32>
    %c0_316 = arith.constant 0 : index
    %c0_317 = arith.constant 0 : index
    %c0_318 = arith.constant 0 : index
    %273 = vector.load %arg42[%c0_316, %c0_317, %c0_318] : memref<2x10x128xf32, #tpu.memory_space<vmem>>, vector<2x8x128xf32>
    %274 = vector.shape_cast %273 : vector<2x8x128xf32> to vector<16x128xf32>
    %c0_319 = arith.constant 0 : index
    %c0_320 = arith.constant 0 : index
    %c0_321 = arith.constant 0 : index
    %275 = vector.load %arg22[%c0_319, %c0_320, %c0_321] : memref<3x128x128xf32, #tpu.memory_space<vmem>>, vector<1x128x128xf32>
    %276 = vector.shape_cast %275 : vector<1x128x128xf32> to vector<128x128xf32>
    %cst_322 = arith.constant dense<0.000000e+00> : vector<16x128xf32>
    %277 = tpu.matmul %274, %276, %cst_322 {dimension_numbers = #tpu.dot_dimension_numbers<[1], [0], [0], [1], [0, 0, 1, 1], [], []>} : vector<16x128xf32>, vector<128x128xf32>, vector<16x128xf32> -> vector<16x128xf32>
    %278 = arith.addf %272, %277 : vector<16x128xf32>
    %c0_323 = arith.constant 0 : index
    %c1_324 = arith.constant 1 : index
    %c0_325 = arith.constant 0 : index
    %279 = vector.load %arg42[%c0_323, %c1_324, %c0_325] : memref<2x10x128xf32, #tpu.memory_space<vmem>>, vector<2x8x128xf32>
    %280 = vector.shape_cast %279 : vector<2x8x128xf32> to vector<16x128xf32>
    %c1_326 = arith.constant 1 : index
    %c0_327 = arith.constant 0 : index
    %c0_328 = arith.constant 0 : index
    %281 = vector.load %arg22[%c1_326, %c0_327, %c0_328] : memref<3x128x128xf32, #tpu.memory_space<vmem>>, vector<1x128x128xf32>
    %282 = vector.shape_cast %281 : vector<1x128x128xf32> to vector<128x128xf32>
    %cst_329 = arith.constant dense<0.000000e+00> : vector<16x128xf32>
    %283 = tpu.matmul %280, %282, %cst_329 {dimension_numbers = #tpu.dot_dimension_numbers<[1], [0], [0], [1], [0, 0, 1, 1], [], []>} : vector<16x128xf32>, vector<128x128xf32>, vector<16x128xf32> -> vector<16x128xf32>
    %284 = arith.addf %278, %283 : vector<16x128xf32>
    %c0_330 = arith.constant 0 : index
    %c2_331 = arith.constant 2 : index
    %c0_332 = arith.constant 0 : index
    %285 = vector.load %arg42[%c0_330, %c2_331, %c0_332] : memref<2x10x128xf32, #tpu.memory_space<vmem>>, vector<2x8x128xf32>
    %286 = vector.shape_cast %285 : vector<2x8x128xf32> to vector<16x128xf32>
    %c2_333 = arith.constant 2 : index
    %c0_334 = arith.constant 0 : index
    %c0_335 = arith.constant 0 : index
    %287 = vector.load %arg22[%c2_333, %c0_334, %c0_335] : memref<3x128x128xf32, #tpu.memory_space<vmem>>, vector<1x128x128xf32>
    %288 = vector.shape_cast %287 : vector<1x128x128xf32> to vector<128x128xf32>
    %cst_336 = arith.constant dense<0.000000e+00> : vector<16x128xf32>
    %289 = tpu.matmul %286, %288, %cst_336 {dimension_numbers = #tpu.dot_dimension_numbers<[1], [0], [0], [1], [0, 0, 1, 1], [], []>} : vector<16x128xf32>, vector<128x128xf32>, vector<16x128xf32> -> vector<16x128xf32>
    %290 = arith.addf %284, %289 : vector<16x128xf32>
    %c0_337 = arith.constant 0 : index
    %c0_338 = arith.constant 0 : index
    %291 = vector.load %arg23[%c0_337, %c0_338] : memref<1x128xf32, #tpu.memory_space<vmem>>, vector<1x128xf32>
    %292 = vector.broadcast %291 : vector<1x128xf32> to vector<16x128xf32>
    %293 = arith.addf %290, %292 : vector<16x128xf32>
    %cst_339 = arith.constant 0.000000e+00 : f32
    %294 = vector.broadcast %cst_339 : f32 to vector<16x128xf32>
    %295 = arith.maximumf %293, %294 : vector<16x128xf32>
    %c0_340 = arith.constant 0 : index
    %c0_341 = arith.constant 0 : index
    %c0_342 = arith.constant 0 : index
    %296 = vector.load %arg24[%c0_340, %c0_341, %c0_342] : memref<2x128x128xf32, #tpu.memory_space<vmem>>, vector<1x128x128xf32>
    %297 = vector.shape_cast %296 : vector<1x128x128xf32> to vector<128x128xf32>
    %cst_343 = arith.constant dense<0.000000e+00> : vector<16x128xf32>
    %298 = tpu.matmul %295, %297, %cst_343 {dimension_numbers = #tpu.dot_dimension_numbers<[1], [0], [0], [1], [0, 0, 1, 1], [], []>} : vector<16x128xf32>, vector<128x128xf32>, vector<16x128xf32> -> vector<16x128xf32>
    %c1_344 = arith.constant 1 : index
    %c0_345 = arith.constant 0 : index
    %c0_346 = arith.constant 0 : index
    %299 = vector.load %arg24[%c1_344, %c0_345, %c0_346] : memref<2x128x128xf32, #tpu.memory_space<vmem>>, vector<1x128x128xf32>
    %300 = vector.shape_cast %299 : vector<1x128x128xf32> to vector<128x128xf32>
    %cst_347 = arith.constant dense<0.000000e+00> : vector<16x128xf32>
    %301 = tpu.matmul %295, %300, %cst_347 {dimension_numbers = #tpu.dot_dimension_numbers<[1], [0], [0], [1], [0, 0, 1, 1], [], []>} : vector<16x128xf32>, vector<128x128xf32>, vector<16x128xf32> -> vector<16x128xf32>
    %302 = vector.shape_cast %298 : vector<16x128xf32> to vector<16x1x128xf32>
    %303 = vector.shape_cast %301 : vector<16x128xf32> to vector<16x1x128xf32>
    %304 = tpu.concatenate %302, %303 in 1 : vector<16x1x128xf32>, vector<16x1x128xf32> -> vector<16x2x128xf32>
    %305 = vector.shape_cast %304 : vector<16x2x128xf32> to vector<2x16x128xf32>
    %c0_348 = arith.constant 0 : index
    %c0_349 = arith.constant 0 : index
    %306 = vector.load %arg25[%c0_348, %c0_349] : memref<1x128xf32, #tpu.memory_space<vmem>>, vector<1x128xf32>
    %307 = vector.shape_cast %306 : vector<1x128xf32> to vector<1x1x128xf32>
    %308 = vector.broadcast %307 : vector<1x1x128xf32> to vector<2x16x128xf32>
    %309 = arith.addf %305, %308 : vector<2x16x128xf32>
    %c0_350 = arith.constant 0 : index
    %c1_351 = arith.constant 1 : index
    %c0_352 = arith.constant 0 : index
    %310 = vector.load %arg43[%c0_350, %c1_351, %c0_352] : memref<2x18x128xf32, #tpu.memory_space<vmem>>, vector<2x16x128xf32>
    tpu.vector_store %arg43[%c0_350, %c1_351, %c0_352], %309 {strides = array<i32>} : memref<2x18x128xf32, #tpu.memory_space<vmem>>, vector<2x16x128xf32>,
    %cst_353 = arith.constant 0.000000e+00 : f32
    %311 = vector.broadcast %cst_353 : f32 to vector<32x128xf32>
    %c0_354 = arith.constant 0 : index
    %c0_355 = arith.constant 0 : index
    %c0_356 = arith.constant 0 : index
    %312 = vector.load %arg43[%c0_354, %c0_355, %c0_356] : memref<2x18x128xf32, #tpu.memory_space<vmem>>, vector<2x16x128xf32>
    %313 = vector.shape_cast %312 : vector<2x16x128xf32> to vector<32x128xf32>
    %c0_357 = arith.constant 0 : index
    %c0_358 = arith.constant 0 : index
    %c0_359 = arith.constant 0 : index
    %314 = vector.load %arg26[%c0_357, %c0_358, %c0_359] : memref<3x128x128xf32, #tpu.memory_space<vmem>>, vector<1x128x128xf32>
    %315 = vector.shape_cast %314 : vector<1x128x128xf32> to vector<128x128xf32>
    %cst_360 = arith.constant dense<0.000000e+00> : vector<32x128xf32>
    %316 = tpu.matmul %313, %315, %cst_360 {dimension_numbers = #tpu.dot_dimension_numbers<[1], [0], [0], [1], [0, 0, 1, 1], [], []>} : vector<32x128xf32>, vector<128x128xf32>, vector<32x128xf32> -> vector<32x128xf32>
    %317 = arith.addf %311, %316 : vector<32x128xf32>
    %c0_361 = arith.constant 0 : index
    %c1_362 = arith.constant 1 : index
    %c0_363 = arith.constant 0 : index
    %318 = vector.load %arg43[%c0_361, %c1_362, %c0_363] : memref<2x18x128xf32, #tpu.memory_space<vmem>>, vector<2x16x128xf32>
    %319 = vector.shape_cast %318 : vector<2x16x128xf32> to vector<32x128xf32>
    %c1_364 = arith.constant 1 : index
    %c0_365 = arith.constant 0 : index
    %c0_366 = arith.constant 0 : index
    %320 = vector.load %arg26[%c1_364, %c0_365, %c0_366] : memref<3x128x128xf32, #tpu.memory_space<vmem>>, vector<1x128x128xf32>
    %321 = vector.shape_cast %320 : vector<1x128x128xf32> to vector<128x128xf32>
    %cst_367 = arith.constant dense<0.000000e+00> : vector<32x128xf32>
    %322 = tpu.matmul %319, %321, %cst_367 {dimension_numbers = #tpu.dot_dimension_numbers<[1], [0], [0], [1], [0, 0, 1, 1], [], []>} : vector<32x128xf32>, vector<128x128xf32>, vector<32x128xf32> -> vector<32x128xf32>
    %323 = arith.addf %317, %322 : vector<32x128xf32>
    %c0_368 = arith.constant 0 : index
    %c2_369 = arith.constant 2 : index
    %c0_370 = arith.constant 0 : index
    %324 = vector.load %arg43[%c0_368, %c2_369, %c0_370] : memref<2x18x128xf32, #tpu.memory_space<vmem>>, vector<2x16x128xf32>
    %325 = vector.shape_cast %324 : vector<2x16x128xf32> to vector<32x128xf32>
    %c2_371 = arith.constant 2 : index
    %c0_372 = arith.constant 0 : index
    %c0_373 = arith.constant 0 : index
    %326 = vector.load %arg26[%c2_371, %c0_372, %c0_373] : memref<3x128x128xf32, #tpu.memory_space<vmem>>, vector<1x128x128xf32>
    %327 = vector.shape_cast %326 : vector<1x128x128xf32> to vector<128x128xf32>
    %cst_374 = arith.constant dense<0.000000e+00> : vector<32x128xf32>
    %328 = tpu.matmul %325, %327, %cst_374 {dimension_numbers = #tpu.dot_dimension_numbers<[1], [0], [0], [1], [0, 0, 1, 1], [], []>} : vector<32x128xf32>, vector<128x128xf32>, vector<32x128xf32> -> vector<32x128xf32>
    %329 = arith.addf %323, %328 : vector<32x128xf32>
    %c0_375 = arith.constant 0 : index
    %c0_376 = arith.constant 0 : index
    %c0_377 = arith.constant 0 : index
    %330 = vector.load %arg35[%c0_375, %c0_376, %c0_377] : memref<2x18x128xf32, #tpu.memory_space<vmem>>, vector<2x16x128xf32>
    %331 = vector.shape_cast %330 : vector<2x16x128xf32> to vector<32x128xf32>
    %c0_378 = arith.constant 0 : index
    %c0_379 = arith.constant 0 : index
    %c0_380 = arith.constant 0 : index
    %332 = vector.load %arg27[%c0_378, %c0_379, %c0_380] : memref<3x128x128xf32, #tpu.memory_space<vmem>>, vector<1x128x128xf32>
    %333 = vector.shape_cast %332 : vector<1x128x128xf32> to vector<128x128xf32>
    %cst_381 = arith.constant dense<0.000000e+00> : vector<32x128xf32>
    %334 = tpu.matmul %331, %333, %cst_381 {dimension_numbers = #tpu.dot_dimension_numbers<[1], [0], [0], [1], [0, 0, 1, 1], [], []>} : vector<32x128xf32>, vector<128x128xf32>, vector<32x128xf32> -> vector<32x128xf32>
    %335 = arith.addf %329, %334 : vector<32x128xf32>
    %c0_382 = arith.constant 0 : index
    %c1_383 = arith.constant 1 : index
    %c0_384 = arith.constant 0 : index
    %336 = vector.load %arg35[%c0_382, %c1_383, %c0_384] : memref<2x18x128xf32, #tpu.memory_space<vmem>>, vector<2x16x128xf32>
    %337 = vector.shape_cast %336 : vector<2x16x128xf32> to vector<32x128xf32>
    %c1_385 = arith.constant 1 : index
    %c0_386 = arith.constant 0 : index
    %c0_387 = arith.constant 0 : index
    %338 = vector.load %arg27[%c1_385, %c0_386, %c0_387] : memref<3x128x128xf32, #tpu.memory_space<vmem>>, vector<1x128x128xf32>
    %339 = vector.shape_cast %338 : vector<1x128x128xf32> to vector<128x128xf32>
    %cst_388 = arith.constant dense<0.000000e+00> : vector<32x128xf32>
    %340 = tpu.matmul %337, %339, %cst_388 {dimension_numbers = #tpu.dot_dimension_numbers<[1], [0], [0], [1], [0, 0, 1, 1], [], []>} : vector<32x128xf32>, vector<128x128xf32>, vector<32x128xf32> -> vector<32x128xf32>
    %341 = arith.addf %335, %340 : vector<32x128xf32>
    %c0_389 = arith.constant 0 : index
    %c2_390 = arith.constant 2 : index
    %c0_391 = arith.constant 0 : index
    %342 = vector.load %arg35[%c0_389, %c2_390, %c0_391] : memref<2x18x128xf32, #tpu.memory_space<vmem>>, vector<2x16x128xf32>
    %343 = vector.shape_cast %342 : vector<2x16x128xf32> to vector<32x128xf32>
    %c2_392 = arith.constant 2 : index
    %c0_393 = arith.constant 0 : index
    %c0_394 = arith.constant 0 : index
    %344 = vector.load %arg27[%c2_392, %c0_393, %c0_394] : memref<3x128x128xf32, #tpu.memory_space<vmem>>, vector<1x128x128xf32>
    %345 = vector.shape_cast %344 : vector<1x128x128xf32> to vector<128x128xf32>
    %cst_395 = arith.constant dense<0.000000e+00> : vector<32x128xf32>
    %346 = tpu.matmul %343, %345, %cst_395 {dimension_numbers = #tpu.dot_dimension_numbers<[1], [0], [0], [1], [0, 0, 1, 1], [], []>} : vector<32x128xf32>, vector<128x128xf32>, vector<32x128xf32> -> vector<32x128xf32>
    %347 = arith.addf %341, %346 : vector<32x128xf32>
    %c0_396 = arith.constant 0 : index
    %c0_397 = arith.constant 0 : index
    %348 = vector.load %arg28[%c0_396, %c0_397] : memref<1x128xf32, #tpu.memory_space<vmem>>, vector<1x128xf32>
    %349 = vector.broadcast %348 : vector<1x128xf32> to vector<32x128xf32>
    %350 = arith.addf %347, %349 : vector<32x128xf32>
    %cst_398 = arith.constant 0.000000e+00 : f32
    %351 = vector.broadcast %cst_398 : f32 to vector<32x128xf32>
    %352 = arith.maximumf %350, %351 : vector<32x128xf32>
    %353 = vector.shape_cast %352 : vector<32x128xf32> to vector<2x16x128xf32>
    %c0_399 = arith.constant 0 : index
    %c1_400 = arith.constant 1 : index
    %c0_401 = arith.constant 0 : index
    %354 = vector.load %arg44[%c0_399, %c1_400, %c0_401] : memref<2x18x128xf32, #tpu.memory_space<vmem>>, vector<2x16x128xf32>
    tpu.vector_store %arg44[%c0_399, %c1_400, %c0_401], %353 {strides = array<i32>} : memref<2x18x128xf32, #tpu.memory_space<vmem>>, vector<2x16x128xf32>,
    %cst_402 = arith.constant 0.000000e+00 : f32
    %355 = vector.broadcast %cst_402 : f32 to vector<32x128xf32>
    %c0_403 = arith.constant 0 : index
    %c0_404 = arith.constant 0 : index
    %c0_405 = arith.constant 0 : index
    %356 = vector.load %arg44[%c0_403, %c0_404, %c0_405] : memref<2x18x128xf32, #tpu.memory_space<vmem>>, vector<2x16x128xf32>
    %357 = vector.shape_cast %356 : vector<2x16x128xf32> to vector<32x128xf32>
    %c0_406 = arith.constant 0 : index
    %c0_407 = arith.constant 0 : index
    %c0_408 = arith.constant 0 : index
    %358 = vector.load %arg29[%c0_406, %c0_407, %c0_408] : memref<3x128x128xf32, #tpu.memory_space<vmem>>, vector<1x128x128xf32>
    %359 = vector.shape_cast %358 : vector<1x128x128xf32> to vector<128x128xf32>
    %cst_409 = arith.constant dense<0.000000e+00> : vector<32x128xf32>
    %360 = tpu.matmul %357, %359, %cst_409 {dimension_numbers = #tpu.dot_dimension_numbers<[1], [0], [0], [1], [0, 0, 1, 1], [], []>} : vector<32x128xf32>, vector<128x128xf32>, vector<32x128xf32> -> vector<32x128xf32>
    %361 = arith.addf %355, %360 : vector<32x128xf32>
    %c0_410 = arith.constant 0 : index
    %c1_411 = arith.constant 1 : index
    %c0_412 = arith.constant 0 : index
    %362 = vector.load %arg44[%c0_410, %c1_411, %c0_412] : memref<2x18x128xf32, #tpu.memory_space<vmem>>, vector<2x16x128xf32>
    %363 = vector.shape_cast %362 : vector<2x16x128xf32> to vector<32x128xf32>
    %c1_413 = arith.constant 1 : index
    %c0_414 = arith.constant 0 : index
    %c0_415 = arith.constant 0 : index
    %364 = vector.load %arg29[%c1_413, %c0_414, %c0_415] : memref<3x128x128xf32, #tpu.memory_space<vmem>>, vector<1x128x128xf32>
    %365 = vector.shape_cast %364 : vector<1x128x128xf32> to vector<128x128xf32>
    %cst_416 = arith.constant dense<0.000000e+00> : vector<32x128xf32>
    %366 = tpu.matmul %363, %365, %cst_416 {dimension_numbers = #tpu.dot_dimension_numbers<[1], [0], [0], [1], [0, 0, 1, 1], [], []>} : vector<32x128xf32>, vector<128x128xf32>, vector<32x128xf32> -> vector<32x128xf32>
    %367 = arith.addf %361, %366 : vector<32x128xf32>
    %c0_417 = arith.constant 0 : index
    %c2_418 = arith.constant 2 : index
    %c0_419 = arith.constant 0 : index
    %368 = vector.load %arg44[%c0_417, %c2_418, %c0_419] : memref<2x18x128xf32, #tpu.memory_space<vmem>>, vector<2x16x128xf32>
    %369 = vector.shape_cast %368 : vector<2x16x128xf32> to vector<32x128xf32>
    %c2_420 = arith.constant 2 : index
    %c0_421 = arith.constant 0 : index
    %c0_422 = arith.constant 0 : index
    %370 = vector.load %arg29[%c2_420, %c0_421, %c0_422] : memref<3x128x128xf32, #tpu.memory_space<vmem>>, vector<1x128x128xf32>
    %371 = vector.shape_cast %370 : vector<1x128x128xf32> to vector<128x128xf32>
    %cst_423 = arith.constant dense<0.000000e+00> : vector<32x128xf32>
    %372 = tpu.matmul %369, %371, %cst_423 {dimension_numbers = #tpu.dot_dimension_numbers<[1], [0], [0], [1], [0, 0, 1, 1], [], []>} : vector<32x128xf32>, vector<128x128xf32>, vector<32x128xf32> -> vector<32x128xf32>
    %373 = arith.addf %367, %372 : vector<32x128xf32>
    %c0_424 = arith.constant 0 : index
    %c0_425 = arith.constant 0 : index
    %374 = vector.load %arg30[%c0_424, %c0_425] : memref<1x128xf32, #tpu.memory_space<vmem>>, vector<1x128xf32>
    %375 = vector.broadcast %374 : vector<1x128xf32> to vector<32x128xf32>
    %376 = arith.addf %373, %375 : vector<32x128xf32>
    %cst_426 = arith.constant 0.000000e+00 : f32
    %377 = vector.broadcast %cst_426 : f32 to vector<32x128xf32>
    %378 = arith.maximumf %376, %377 : vector<32x128xf32>
    %c0_427 = arith.constant 0 : index
    %c0_428 = arith.constant 0 : index
    %379 = vector.load %arg31[%c0_427, %c0_428] : memref<128x48xf32, #tpu.memory_space<vmem>>, vector<128x48xf32>
    %cst_429 = arith.constant dense<0.000000e+00> : vector<32x48xf32>
    %380 = tpu.matmul %378, %379, %cst_429 {dimension_numbers = #tpu.dot_dimension_numbers<[1], [0], [0], [1], [0, 0, 1, 1], [], []>} : vector<32x128xf32>, vector<128x48xf32>, vector<32x48xf32> -> vector<32x48xf32>
    %c0_430 = arith.constant 0 : index
    %c0_431 = arith.constant 0 : index
    %381 = vector.load %arg32[%c0_430, %c0_431] : memref<1x48xf32, #tpu.memory_space<vmem>>, vector<1x48xf32>
    %382 = vector.broadcast %381 : vector<1x48xf32> to vector<32x48xf32>
    %383 = arith.addf %380, %382 : vector<32x48xf32>
    %384 = vector.shape_cast %383 : vector<32x48xf32> to vector<2x16x48xf32>
    %c0_432 = arith.constant 0 : index
    %c0_433 = arith.constant 0 : index
    %c0_434 = arith.constant 0 : index
    %385 = vector.load %arg33[%c0_432, %c0_433, %c0_434] : memref<2x16x48xf32, #tpu.memory_space<vmem>>, vector<2x16x48xf32>
    tpu.vector_store %arg33[%c0_432, %c0_433, %c0_434], %384 {strides = array<i32>} : memref<2x16x48xf32, #tpu.memory_space<vmem>>, vector<2x16x48xf32>,
    return
  }
}

</mosaic_0001>

<bundles_post_ra>
// kernel: unet_forward.1
= control target key start
LH: loop header
LB: loop body
LE: loop exit
PB: predicated region body
PF: predicated region fallthrough
CT: control target
= control target key end

     0   :  { %s8869_s6 = smov 1   ;;  %s8870_s10 = smov 2   ;;  %s9876_s0 = inlined_call_operand.smem [shape: u32[34], index: -1, kind: input, shape index: {}] }
   0x1   :  { %s8933_s5 = sld [smem:[%s9876_s0]]   ;;  %s8871_s14 = smov 3  }
   0x2   :  { %s8938_s9 = sld [smem:[%s9876_s0 + %s8869_s6]]   ;;  %s8872_s18 = smov 4  }
   0x3   :  { %s8943_s13 = sld [smem:[%s9876_s0 + %s8870_s10]]   ;;  %s8873_s22 = smov 5  }
   0x4   :  { %s8948_s17 = sld [smem:[%s9876_s0 + %s8871_s14]]   ;;  %s8874_s26 = smov 6  }
   0x5   :  { %s8953_s21 = sld [smem:[%s9876_s0 + %s8872_s18]]   ;;  %s8875_s30 = smov 7  }
   0x6   :  { %s8958_s25 = sld [smem:[%s9876_s0 + %s8873_s22]]   ;;  %s8876_s4 = smov 8  }
   0x7   :  { %9886 = sst [smem:[#allocation48_spill]] %s8933_s5  ;;  %s8877_s10 = smov 9  }
   0x8   :  { %s8963_s29 = sld [smem:[%s9876_s0 + %s8874_s26]]   ;;  %s8878_s15 = smov 10  }
   0x9   :  { %9887 = sst [smem:[#allocation49_spill]] %s8943_s13  ;;  %s8879_s20 = smov 11  }
   0xa   :  { %9888 = sst [smem:[#allocation50_spill]] %s8948_s17  ;;  %s8880_s26 = smov 12  }
   0xb   :  { %9889 = sst [smem:[#allocation51_spill]] %s8953_s21  ;;  %s8881_s1 = smov 13  }
   0xc   :  { %9890 = sst [smem:[#allocation52_spill]] %s8958_s25  ;;  %s8882_s7 = smov 14  }
   0xd   :  { %s8968_s3 = sld [smem:[%s9876_s0 + %s8875_s30]]   ;;  %s8884_s22 = smov 16  }
   0xe   :  { %9891 = sst [smem:[#allocation53_spill]] %s8963_s29  ;;  %s8885_s28 = smov 17  }
   0xf   :  { %s8973_s8 = sld [smem:[%s9876_s0 + %s8876_s4]]  }
  0x10   :  { %s8978_s14 = sld [smem:[%s9876_s0 + %s8877_s10]]  }
  0x11   :  { %s8983_s19 = sld [smem:[%s9876_s0 + %s8878_s15]]   ;;  %s8883_s15 = smov 15  }
  0x12   :  { %s8988_s24 = sld [smem:[%s9876_s0 + %s8879_s20]]  }
  0x13   :  { %9892 = sst [smem:[#allocation54_spill]] %s8968_s3 }
  0x14   :  { %s8993_s30 = sld [smem:[%s9876_s0 + %s8880_s26]]  }
  0x15   :  { %9893 = sst [smem:[#allocation55_spill]] %s8973_s8 }
  0x16   :  { %9894 = sst [smem:[#allocation56_spill]] %s8978_s14 }
  0x17   :  { %9895 = sst [smem:[#allocation57_spill]] %s8983_s19 }
  0x18   :  { %9896 = sst [smem:[#allocation58_spill]] %s8988_s24 }
  0x19   :  { %s8998_s6 = sld [smem:[%s9876_s0 + %s8881_s1]]  }
  0x1a   :  { %9897 = sst [smem:[#allocation59_spill]] %s8993_s30 }
  0x1b   :  { %s9003_s12 = sld [smem:[%s9876_s0 + %s8882_s7]]   ;;  %s8886_s7 = smov 18  }
  0x1c   :  { %s9008_s20 = sld [smem:[%s9876_s0 + %s8883_s15]]   ;;  %s8887_s15 = smov 19  }
  0x1d   :  { %s9013_s27 = sld [smem:[%s9876_s0 + %s8884_s22]]   ;;  %s8888_s22 = smov 20  }
  0x1e   :  { %s9018_s4 = sld [smem:[%s9876_s0 + %s8885_s28]]   ;;  %s8889_s28 = smov 21  }
  0x1f   :  { %s9033_s19 = sld [smem:[%s9876_s0 + %s8888_s22]]   ;;  %s8892_s22 = smov 24  }
  0x20   :  { %s9038_s30 = sld [smem:[%s9876_s0 + %s8889_s28]]   ;;  %s8893_s28 = smov 25  }
  0x21   :  { %9898 = sst [smem:[#allocation60_spill]] %s9003_s12 }
  0x22   :  { %9899 = sst [smem:[#allocation61_spill]] %s9008_s20 }
  0x23   :  { %s9023_s12 = sld [smem:[%s9876_s0 + %s8886_s7]]   ;;  %s8890_s7 = smov 22  }
  0x24   :  { %s9028_s20 = sld [smem:[%s9876_s0 + %s8887_s15]]   ;;  %s8891_s15 = smov 23  }
  0x25   :  { %s9043_s24 = sld [smem:[%s9876_s0 + %s8890_s7]]   ;;  %s8894_s7 = smov 26  }
  0x26   :  { %s9048_s8 = sld [smem:[%s9876_s0 + %s8891_s15]]   ;;  %s8895_s15 = smov 27  }
  0x27   :  { %s9053_s14 = sld [smem:[%s9876_s0 + %s8892_s22]]   ;;  %s8896_s22 = smov 28  }
  0x28   :  { %s9058_s21 = sld [smem:[%s9876_s0 + %s8893_s28]]   ;;  %s8897_s28 = smov 29  }
  0x29   :  { %s9063_s3 = sld [smem:[%s9876_s0 + %s8894_s7]]   ;;  %s8898_s7 = smov 30  }
  0x2a   :  { %s9068_s29 = sld [smem:[%s9876_s0 + %s8895_s15]]   ;;  %s8899_s15 = smov 31  }
  0x2b   :  { %s9073_s25 = sld [smem:[%s9876_s0 + %s8896_s22]]   ;;  %s8900_s22 = smov 32  }
  0x2c   :  { %s9078_s13 = sld [smem:[%s9876_s0 + %s8897_s28]]   ;;  %s8901_s28 = smov 33  }
  0x2d   :  { %s9083_s17 = sld [smem:[%s9876_s0 + %s8898_s7]]  }
  0x2e   :  { %s9088_s5 = sld [smem:[%s9876_s0 + %s8899_s15]]  }
  0x2f   :  { %9900 = sst [smem:[#allocation62_spill]] %s9063_s3 }
  0x30   :  { %s9098_s3 = sld [smem:[%s9876_s0 + %s8901_s28]]  }
  0x31   :  { %9901 = sst [smem:[#allocation63_spill]] %s9073_s25 }
  0x32   :  { %s9093_s25 = sld [smem:[%s9876_s0 + %s8900_s22]]  }
  0x33   :  { %72 = vsyncpa [#allocation14], 0 }
  0x34   :  { %73 = vsyncpa [#allocation16], 0 }
  0x35   :  { %74 = vsyncpa [#allocation19], 0 }
  0x36   :  { %75 = vsyncpa [#allocation22], 0 }
  0x37   :  { %76 = vsyncpa [#allocation25], 0 }
  0x38   :  { %77 = vsyncpa [#allocation28], 0 }
  0x39   :  { %78 = vsyncpa [#allocation31], 0 }
  0x3a   :  { %79 = vsyncpa [#allocation34], 0 }
  0x3b   :  { %80 = vsyncpa [#allocation37], 0  ;;  %s8902_s7 = smov [#allocation15]   ;;  %s8903_s11 = smov [#allocation18]  }
  0x3c   :  { %s122_s10 = sshll.u32 %s8902_s7, 4  ;;  %s148_s15 = sshll.u32 %s8903_s11, 4  ;;  %s123_s10 = int_to_ptr.vmem [resolvable:$true] %s122_s10  ;;  %s149_s15 = int_to_ptr.vmem [resolvable:$true] %s148_s15 }
  0x3d   :  { %s8519_s16 = scalar_lea.vmem %s123_s10, 3072  ;;  %p8524_p1 = scmp.lt.s32.totalorder %s123_s10, %s123_s10 }
  0x3e   :  { %p8520_p0 = scmp.ne.s32.totalorder %s123_s10, %s8519_s16  ;;  %p8525_p2 = scmp.lt.s32.totalorder %s8519_s16, %s8519_s16 }
  0x40   :  { %p8526_p3 = por %p8525_p2, %p8524_p1 }
  0x42   :  { %p8527_p4 = pnand %p8526_p3, %p8520_p0 }
  0x44   :  { %8530 = shalt.err (!%p8527_p4)
}
  0x45   :  { %s8904_s0 = smov 128   ;;  %s8905_s18 = smov 8  }
  0x46   :  { %128 = dma.hbm_to_vmem [thread:$0]  %s8998_s6, 3072, %s123_s10, [#allocation16], %s8904_s0, %s8904_s0, %s8905_s18  }
  0x47   :  { %s8539_s22 = scalar_lea.vmem %s149_s15, 4096  ;;  %p8544_p6 = scmp.lt.s32.totalorder %s149_s15, %s149_s15 }
  0x48   :  { %p8540_p5 = scmp.ne.s32.totalorder %s149_s15, %s8539_s22  ;;  %p8545_p7 = scmp.lt.s32.totalorder %s8539_s22, %s8539_s22 }
  0x4a   :  { %p8546_p8 = por %p8545_p7, %p8544_p6 }
  0x4c   :  { %p8547_p9 = pnand %p8546_p8, %p8540_p5 }
  0x4e   :  { %8550 = shalt.err (!%p8547_p9)
}
  0x4f   :  { %154 = dma.hbm_to_vmem [thread:$0]  %s9018_s4, 4096, %s149_s15, [#allocation19], %s8904_s0, %s8904_s0, %s8905_s18  }
  0x50   :  { %s8906_s23 = smov [#allocation21]   ;;  %s8907_s28 = smov [#allocation24]  }
  0x51   :  { %s170_s26 = sshll.u32 %s8906_s23, 4  ;;  %s195_s1 = sshll.u32 %s8907_s28, 4  ;;  %s171_s26 = int_to_ptr.vmem [resolvable:$true] %s170_s26  ;;  %s196_s1 = int_to_ptr.vmem [resolvable:$true] %s195_s1 }
  0x52   :  { %s8559_s2 = scalar_lea.vmem %s171_s26, 6144  ;;  %p8564_p11 = scmp.lt.s32.totalorder %s171_s26, %s171_s26 }
  0x53   :  { %p8560_p10 = scmp.ne.s32.totalorder %s171_s26, %s8559_s2  ;;  %p8565_p12 = scmp.lt.s32.totalorder %s8559_s2, %s8559_s2 }
  0x55   :  { %p8566_p13 = por %p8565_p12, %p8564_p11 }
  0x57   :  { %p8567_p0 = pnand %p8566_p13, %p8560_p10 }
  0x59   :  { %8570 = shalt.err (!%p8567_p0)
}
  0x5a   :  { %176 = dma.hbm_to_vmem [thread:$0]  %s9028_s20, 6144, %s171_s26, [#allocation22], %s8904_s0, %s8904_s0, %s8905_s18  }
  0x5b   :  { %s8579_s6 = scalar_lea.vmem %s196_s1, 16  ;;  %s8583_s4 = scalar_lea.vmem %s196_s1, 32 }
  0x5c   :  { %p8580_p1 = scmp.ne.s32.totalorder %s196_s1, %s8579_s6  ;;  %p8584_p2 = scmp.lt.s32.totalorder %s196_s1, %s196_s1 }
  0x5d   :  { %p8585_p3 = scmp.lt.s32.totalorder %s8583_s4, %s8579_s6 }
  0x5f   :  { %p8586_p4 = por %p8585_p3, %p8584_p2 }
  0x61   :  { %p8587_p5 = pnand %p8586_p4, %p8580_p1 }
  0x63   :  { %8590 = shalt.err (!%p8587_p5)
}
  0x64   :  { %198 = dma.hbm_to_vmem [thread:$0]  %s9038_s30, 16, %s196_s1, [#allocation25]  }
  0x65   :  { %s8908_s7 = smov [#allocation27]   ;;  %s8909_s11 = smov [#allocation30]  }
  0x66   :  { %s217_s10 = sshll.u32 %s8908_s7, 4  ;;  %s239_s15 = sshll.u32 %s8909_s11, 4  ;;  %s218_s10 = int_to_ptr.vmem [resolvable:$true] %s217_s10  ;;  %s240_s15 = int_to_ptr.vmem [resolvable:$true] %s239_s15 }
  0x67   :  { %s8599_s16 = scalar_lea.vmem %s218_s10, 16  ;;  %s8603_s22 = scalar_lea.vmem %s218_s10, 32 }
  0x68   :  { %p8600_p6 = scmp.ne.s32.totalorder %s218_s10, %s8599_s16  ;;  %p8604_p7 = scmp.lt.s32.totalorder %s218_s10, %s218_s10 }
  0x69   :  { %p8605_p8 = scmp.lt.s32.totalorder %s8603_s22, %s8599_s16 }
  0x6b   :  { %p8606_p9 = por %p8605_p8, %p8604_p7 }
  0x6d   :  { %p8607_p10 = pnand %p8606_p9, %p8600_p6 }
  0x6f   :  { %8610 = shalt.err (!%p8607_p10)
}
  0x70   :  { %220 = dma.hbm_to_vmem [thread:$0]  %s9048_s8, 16, %s218_s10, [#allocation28]  }
  0x71   :  { %s8619_s20 = scalar_lea.vmem %s240_s15, 16  ;;  %s8623_s23 = scalar_lea.vmem %s240_s15, 32 }
  0x72   :  { %p8620_p11 = scmp.ne.s32.totalorder %s240_s15, %s8619_s20  ;;  %p8624_p12 = scmp.lt.s32.totalorder %s240_s15, %s240_s15 }
  0x73   :  { %p8625_p13 = scmp.lt.s32.totalorder %s8623_s23, %s8619_s20 }
  0x75   :  { %p8626_p0 = por %p8625_p13, %p8624_p12 }
  0x77   :  { %p8627_p1 = pnand %p8626_p0, %p8620_p11 }
  0x79   :  { %8630 = shalt.err (!%p8627_p1)
}
  0x7a   :  { %242 = dma.hbm_to_vmem [thread:$0]  %s9058_s21, 16, %s240_s15, [#allocation31]  }
  0x7b   :  { %s8910_s30 = smov [#allocation33]   ;;  %s8911_s28 = smov [#allocation36]  }
  0x7c   :  { %s260_s26 = sshll.u32 %s8910_s30, 4  ;;  %s282_s1 = sshll.u32 %s8911_s28, 4  ;;  %s261_s26 = int_to_ptr.vmem [resolvable:$true] %s260_s26  ;;  %s283_s1 = int_to_ptr.vmem [resolvable:$true] %s282_s1 }
  0x7d   :  { %s8639_s2 = scalar_lea.vmem %s261_s26, 6144  ;;  %p8644_p3 = scmp.lt.s32.totalorder %s261_s26, %s261_s26 }
  0x7e   :  { %p8640_p2 = scmp.ne.s32.totalorder %s261_s26, %s8639_s2  ;;  %p8645_p4 = scmp.lt.s32.totalorder %s8639_s2, %s8639_s2 }
  0x80   :  { %p8646_p5 = por %p8645_p4, %p8644_p3 }
  0x82   :  { %p8647_p6 = pnand %p8646_p5, %p8640_p2 }
  0x84   :  { %8650 = shalt.err (!%p8647_p6)
}
  0x85   :  { %266 = dma.hbm_to_vmem [thread:$0]  %s9068_s29, 6144, %s261_s26, [#allocation34], %s8904_s0, %s8904_s0, %s8905_s18  }
  0x86   :  { %s8659_s8 = scalar_lea.vmem %s283_s1, 6144  ;;  %p8664_p8 = scmp.lt.s32.totalorder %s283_s1, %s283_s1 }
  0x87   :  { %p8660_p7 = scmp.ne.s32.totalorder %s283_s1, %s8659_s8  ;;  %p8665_p9 = scmp.lt.s32.totalorder %s8659_s8, %s8659_s8 }
  0x89   :  { %p8666_p10 = por %p8665_p9, %p8664_p8 }
  0x8b   :  { %p8667_p11 = pnand %p8666_p10, %p8660_p7 }
  0x8d   :  { %8670 = shalt.err (!%p8667_p11)
}
  0x8e   :  { %288 = dma.hbm_to_vmem [thread:$0]  %s9078_s13, 6144, %s283_s1, [#allocation37], %s8904_s0, %s8904_s0, %s8905_s18  }
  0x8f   :  { %s8912_s21 = smov [#allocation13]   ;;  %s8913_s4 = smov [#allocation17]  }
  0x90   :  { %s88_s6 = sshll.u32 %s8912_s21, 4  ;;  %s139_s7 = sshll.u32 %s8913_s4, 4  ;;  %s89_s6 = int_to_ptr.vmem [resolvable:$true] %s88_s6  ;;  %s140_s7 = int_to_ptr.vmem [resolvable:$true] %s139_s7 }
  0x91   :  { %s8679_s10 = scalar_lea.vmem %s89_s6, 2304  ;;  %p8684_p13 = scmp.lt.s32.totalorder %s89_s6, %s89_s6 }
  0x92   :  { %p8680_p12 = scmp.ne.s32.totalorder %s89_s6, %s8679_s10  ;;  %p8685_p0 = scmp.lt.s32.totalorder %s8679_s10, %s8679_s10 }
  0x94   :  { %p8686_p1 = por %p8685_p0, %p8684_p13 }
  0x96   :  { %p8687_p2 = pnand %p8686_p1, %p8680_p12 }
  0x98   :  { %8690 = shalt.err (!%p8687_p2)
}
  0x99   :  { %94 = dma.hbm_to_vmem [thread:$0]  %s8938_s9, 2304, %s89_s6, [#allocation14], %s8904_s0, %s8904_s0, %s8905_s18  }
  0x9a   :  { %s8699_s29 = scalar_lea.vmem %s140_s7, 16  ;;  %s8703_s13 = scalar_lea.vmem %s140_s7, 32 }
  0x9b   :  { %p8700_p3 = scmp.ne.s32.totalorder %s140_s7, %s8699_s29  ;;  %p8704_p4 = scmp.lt.s32.totalorder %s140_s7, %s140_s7 }
  0x9c   :  { %p8705_p5 = scmp.lt.s32.totalorder %s8703_s13, %s8699_s29 }
  0x9e   :  { %p8706_p6 = por %p8705_p5, %p8704_p4 }
  0xa0   :  { %p8707_p7 = pnand %p8706_p6, %p8700_p3 }
  0xa2   :  { %8710 = shalt.err (!%p8707_p7)
}
  0xa3   :  { %142 = dma.hbm_to_vmem [thread:$0]  %s9013_s27, 16, %s140_s7, [#allocation16]  }
  0xa4   :  { %s8914_s11 = smov [#allocation20]   ;;  %s8915_s16 = smov [#allocation23]  }
  0xa5   :  { %s161_s15 = sshll.u32 %s8914_s11, 4  ;;  %s182_s22 = sshll.u32 %s8915_s16, 4  ;;  %s162_s15 = int_to_ptr.vmem [resolvable:$true] %s161_s15  ;;  %s183_s22 = int_to_ptr.vmem [resolvable:$true] %s182_s22 }
  0xa6   :  { %s8719_s20 = scalar_lea.vmem %s162_s15, 16  ;;  %s8723_s23 = scalar_lea.vmem %s162_s15, 32 }
  0xa7   :  { %p8720_p8 = scmp.ne.s32.totalorder %s162_s15, %s8719_s20  ;;  %p8724_p9 = scmp.lt.s32.totalorder %s162_s15, %s162_s15 }
  0xa8   :  { %p8725_p10 = scmp.lt.s32.totalorder %s8723_s23, %s8719_s20 }
  0xaa   :  { %p8726_p11 = por %p8725_p10, %p8724_p9 }
  0xac   :  { %p8727_p12 = pnand %p8726_p11, %p8720_p8 }
  0xae   :  { %8730 = shalt.err (!%p8727_p12)
}
  0xaf   :  { %164 = dma.hbm_to_vmem [thread:$0]  %s9023_s12, 16, %s162_s15, [#allocation19]  }
  0xb0   :  { %s8739_s9 = scalar_lea.vmem %s183_s22, 6144  ;;  %p8744_p0 = scmp.lt.s32.totalorder %s183_s22, %s183_s22 }
  0xb1   :  { %p8740_p13 = scmp.ne.s32.totalorder %s183_s22, %s8739_s9  ;;  %p8745_p1 = scmp.lt.s32.totalorder %s8739_s9, %s8739_s9 }
  0xb3   :  { %p8746_p2 = por %p8745_p1, %p8744_p0 }
  0xb5   :  { %p8747_p3 = pnand %p8746_p2, %p8740_p13 }
  0xb7   :  { %8750 = shalt.err (!%p8747_p3)
}
  0xb8   :  { %188 = dma.hbm_to_vmem [thread:$0]  %s9033_s19, 6144, %s183_s22, [#allocation22], %s8904_s0, %s8904_s0, %s8905_s18  }
  0xb9   :  { %s8916_s27 = smov [#allocation26]   ;;  %s8917_s26 = smov [#allocation29]  }
  0xba   :  { %s204_s30 = sshll.u32 %s8916_s27, 4  ;;  %s226_s28 = sshll.u32 %s8917_s26, 4  ;;  %s205_s30 = int_to_ptr.vmem [resolvable:$true] %s204_s30  ;;  %s227_s28 = int_to_ptr.vmem [resolvable:$true] %s226_s28 }
  0xbb   :  { %s8759_s1 = scalar_lea.vmem %s205_s30, 6144  ;;  %p8764_p5 = scmp.lt.s32.totalorder %s205_s30, %s205_s30 }
  0xbc   :  { %p8760_p4 = scmp.ne.s32.totalorder %s205_s30, %s8759_s1  ;;  %p8765_p6 = scmp.lt.s32.totalorder %s8759_s1, %s8759_s1 }
  0xbe   :  { %p8766_p7 = por %p8765_p6, %p8764_p5 }
  0xc0   :  { %p8767_p8 = pnand %p8766_p7, %p8760_p4 }
  0xc2   :  { %8770 = shalt.err (!%p8767_p8)
}
  0xc3   :  { %210 = dma.hbm_to_vmem [thread:$0]  %s9043_s24, 6144, %s205_s30, [#allocation25], %s8904_s0, %s8904_s0, %s8905_s18  }
  0xc4   :  { %s8779_s12 = scalar_lea.vmem %s227_s28, 4096  ;;  %p8784_p10 = scmp.lt.s32.totalorder %s227_s28, %s227_s28 }
  0xc5   :  { %p8780_p9 = scmp.ne.s32.totalorder %s227_s28, %s8779_s12  ;;  %p8785_p11 = scmp.lt.s32.totalorder %s8779_s12, %s8779_s12 }
  0xc7   :  { %p8786_p12 = por %p8785_p11, %p8784_p10 }
  0xc9   :  { %p8787_p13 = pnand %p8786_p12, %p8780_p9 }
  0xcb   :  { %8790 = shalt.err (!%p8787_p13)
}
  0xcc   :  { %232 = dma.hbm_to_vmem [thread:$0]  %s9053_s14, 4096, %s227_s28, [#allocation28], %s8904_s0, %s8904_s0, %s8905_s18  }
  0xcd   :  { %s8918_s19 = smov [#allocation32]   ;;  %s8919_s8 = smov [#allocation35]  }
  0xce   :  { %s248_s2 = sshll.u32 %s8918_s19, 4  ;;  %s273_s21 = sshll.u32 %s8919_s8, 4  ;;  %s249_s2 = int_to_ptr.vmem [resolvable:$true] %s248_s2  ;;  %s274_s21 = int_to_ptr.vmem [resolvable:$true] %s273_s21 }
  0xcf   :  { %s8799_s6 = scalar_lea.vmem %s249_s2, 6144  ;;  %p8804_p1 = scmp.lt.s32.totalorder %s249_s2, %s249_s2 }
  0xd0   :  { %p8800_p0 = scmp.ne.s32.totalorder %s249_s2, %s8799_s6  ;;  %p8805_p2 = scmp.lt.s32.totalorder %s8799_s6, %s8799_s6 }
  0xd2   :  { %p8806_p3 = por %p8805_p2, %p8804_p1 }
  0xd4   :  { %p8807_p4 = pnand %p8806_p3, %p8800_p0 }
  0xd6   :  { %8810 = shalt.err (!%p8807_p4)
}
  0xd7   :  { %s9902_s24 = sld [smem:[#allocation62_spill]]  ;;  %s8819_s4 = scalar_lea.vmem %s274_s21, 16 }
  0xd8   :  { %p8820_p5 = scmp.ne.s32.totalorder %s274_s21, %s8819_s4  ;;  %s8823_s14 = scalar_lea.vmem %s274_s21, 32 }
  0xd9   :  { %p8824_p6 = scmp.lt.s32.totalorder %s274_s21, %s274_s21  ;;  %p8825_p7 = scmp.lt.s32.totalorder %s8823_s14, %s8819_s4 }
  0xdb   :  { %p8826_p8 = por %p8825_p7, %p8824_p6 }
  0xdd   :  { %254 = dma.hbm_to_vmem [thread:$0]  %s9902_s24, 6144, %s249_s2, [#allocation31], %s8904_s0, %s8904_s0, %s8905_s18  }
  0xde   :  { %p8827_p9 = pnand %p8826_p8, %p8820_p5 }
  0xe0   :  { %8830 = shalt.err (!%p8827_p9)
}
  0xe1   :  { %s9903_s7 = sld [smem:[#allocation63_spill]]  ;;  %s8920_s10 = smov [#allocation38]  }
  0xe2   :  { %s295_s29 = sshll.u32 %s8920_s10, 4  ;;  %s296_s29 = int_to_ptr.vmem [resolvable:$true] %s295_s29 }
  0xe3   :  { %s8839_s13 = scalar_lea.vmem %s296_s29, 16  ;;  %s8843_s11 = scalar_lea.vmem %s296_s29, 32 }
  0xe4   :  { %p8840_p10 = scmp.ne.s32.totalorder %s296_s29, %s8839_s13  ;;  %p8844_p11 = scmp.lt.s32.totalorder %s296_s29, %s296_s29 }
  0xe5   :  { %p8845_p12 = scmp.lt.s32.totalorder %s8843_s11, %s8839_s13 }
  0xe7   :  { %276 = dma.hbm_to_vmem [thread:$0]  %s9903_s7, 16, %s274_s21, [#allocation34]  }
  0xe8   :  { %p8846_p13 = por %p8845_p12, %p8844_p11 }
  0xea   :  { %p8847_p0 = pnand %p8846_p13, %p8840_p10 }
  0xec   :  { %8850 = shalt.err (!%p8847_p0)
}
  0xed   :  { %298 = dma.hbm_to_vmem [thread:$0]  %s9083_s17, 16, %s296_s29, [#allocation37]  }
  0xee   :  { %8851 = dma.done.wait [#allocation14], 2304  }
  0xef   :  { %8852 = vsyncadd [#allocation14], 4294964992 }
  0xf0   :  { %8853 = dma.done.wait [#allocation16], 3088  }
  0xf1   :  { %8854 = vsyncadd [#allocation16], 4294964208 }
  0xf2   :  { %8855 = dma.done.wait [#allocation19], 4112  }
  0xf3   :  { %8856 = vsyncadd [#allocation19], 4294963184 }
  0xf4   :  { %8857 = dma.done.wait [#allocation22], 12288  }
  0xf5   :  { %8858 = vsyncadd [#allocation22], 4294955008 }
  0xf6   :  { %8859 = dma.done.wait [#allocation25], 6160  }
  0xf7   :  { %8860 = vsyncadd [#allocation25], 4294961136 }
  0xf8   :  { %8861 = dma.done.wait [#allocation28], 4112  }
  0xf9   :  { %8862 = vsyncadd [#allocation28], 4294963184 }
  0xfa   :  { %8863 = dma.done.wait [#allocation31], 6160  }
  0xfb   :  { %8864 = vsyncadd [#allocation31], 4294961136 }
  0xfc   :  { %8865 = dma.done.wait [#allocation34], 6160  }
  0xfd   :  { %8866 = vsyncadd [#allocation34], 4294961136 }
  0xfe   :  { %8867 = dma.done.wait [#allocation37], 6160  }
  0xff   :  { %8868 = vsyncadd [#allocation37], 4294961136  ;;  %v419_v0 = vld [vmem:[#allocation13 + $0x58] sm:$0xff]  ;;  %v408_v1 = vld [vmem:[#allocation13 + $0x28] sm:$0xff]  ;;  %s9904_s17 = sld [smem:[#allocation48_spill]]  ;;  %vm420_vm0 = vcmask 392192  }
 0x100   :  { %v418_v2 = vld [vmem:[#allocation13 + $0x50] sm:$0xff]  ;;  %6982 = vmatprep.subr.mxu0 %v419_v0  ;;  %7000 = vmatprep.subr.mxu1 %v408_v1  ;;  %v407_v3 = vld [vmem:[#allocation13 + $0x20] sm:$0xff]  ;;  %v417_v4 = vld [vmem:[#allocation13 + $0x48] sm:$0xff]  ;;  %s9905_s0 = sld [smem:[#allocation50_spill]]  ;;  %v8921_v58 = vmov 0.0   ;;  %vm1334_vm1 = vcmask 1041409  }
 0x101   :  { %6983 = vmatpush3.msra.mxu0 %v419_v0  ;;  %7001 = vmatpush3.msra.mxu1 %v408_v1  ;;  %v406_v5 = vld [vmem:[#allocation13 + $0x18] sm:$0xff]  ;;  %v416_v6 = vld [vmem:[#allocation13 + $0x40] sm:$0xff]  ;;  %v405_v7 = vld [vmem:[#allocation13 + $0x10] sm:$0xff]  ;;  %354 = vst [vmem:[#allocation2] sm:$0x1] %v8921_v58  ;;  %s9906_s18 = sld [smem:[#allocation49_spill]] }
 0x102   :  { %6984 = vmatprep.subr.mxu0 %v418_v2  ;;  %7002 = vmatprep.subr.mxu1 %v407_v3  ;;  %v415_v8 = vld [vmem:[#allocation13 + $0x38] sm:$0xff]  ;;  %v404_v9 = vld [vmem:[#allocation13 + $0x8] sm:$0xff]  ;;  %v414_v10 = vld [vmem:[#allocation13 + $0x30] sm:$0xff]  ;;  %355 = vst [vmem:[#allocation2 + $0x18] sm:$0x1] %v8921_v58  ;;  %s9907_s15 = sld [smem:[#allocation52_spill]] }
 0x103   :  { %6985 = vmatpush3.msra.mxu0 %v418_v2  ;;  %7003 = vmatpush3.msra.mxu1 %v407_v3  ;;  %v403_v11 = vld [vmem:[#allocation13] sm:$0xff]  ;;  %v625_v16 = vld [vmem:[#allocation13 + $0x88] sm:$0xff]  ;;  %v623_v22 = vld [vmem:[#allocation13 + $0x78] sm:$0xff]  ;;  %356 = vst [vmem:[#allocation2 + $0x11] sm:$0x1] %v8921_v58  ;;  %s9908_s16 = sld [smem:[#allocation53_spill]] }
 0x104   :  { %6986 = vmatprep.subr.mxu0 %v417_v4  ;;  %7004 = vmatprep.subr.mxu1 %v406_v5  ;;  %v624_v19 = vld [vmem:[#allocation13 + $0x80] sm:$0xff]  ;;  %v622_v25 = vld [vmem:[#allocation13 + $0x70] sm:$0xff]  ;;  %v621_v27 = vld [vmem:[#allocation13 + $0x68] sm:$0xff]  ;;  %357 = vst [vmem:[#allocation2 + $0x29] sm:$0x1] %v8921_v58  ;;  %s9909_s22 = sld [smem:[#allocation54_spill]] }
 0x105   :  { %6987 = vmatpush3.msra.mxu0 %v417_v4  ;;  %7005 = vmatpush3.msra.mxu1 %v406_v5  ;;  %v409_v12 = vld [vmem:[%s9904_s17 + $0x1] sm:$0xff]  ;;  %v410_v14 = vld [vmem:[%s9904_s17 + $0x9] sm:$0xff]  ;;  %v411_v17 = vld [vmem:[%s9904_s17 + $0x19] sm:$0xff]  ;;  %358 = vst [vmem:[#allocation3] sm:$0x1] %v8921_v58  ;;  %s9910_s20 = sld [smem:[#allocation51_spill]] }
 0x106   :  { %6988 = vmatprep.subr.mxu0 %v416_v6  ;;  %7006 = vmatprep.subr.mxu1 %v405_v7  ;;  %v399_v13 = vld [vmem:[%s9904_s17] sm:$0xff]  ;;  %v400_v15 = vld [vmem:[%s9904_s17 + $0x8] sm:$0xff]  ;;  %v401_v18 = vld [vmem:[%s9904_s17 + $0x18] sm:$0xff]  ;;  %359 = vst [vmem:[#allocation3 + $0x18] sm:$0x1] %v8921_v58  ;;  %vm1336_vm2 = vcmask 1042434  }
 0x107   :  { %6989 = vmatpush3.msra.mxu0 %v416_v6  ;;  %7007 = vmatpush3.msra.mxu1 %v405_v7  ;;  %v6086_v20 = vld [vmem:[%s9905_s0 + $0xf8] sm:$0xff]  ;;  %v402_v21 = vld [vmem:[%s9904_s17 + $0x20] sm:$0xff]  ;;  %v6085_v26 = vld [vmem:[%s9905_s0 + $0xf0] sm:$0xff]  ;;  %360 = vst [vmem:[#allocation3 + $0x11] sm:$0x1] %v8921_v58  ;;  %vm1338_vm3 = vcmask 1043459  }
 0x108   :  { %6990 = vmatprep.subr.mxu0 %v415_v8  ;;  %7008 = vmatprep.subr.mxu1 %v404_v9  ;;  %v412_v23 = vld [vmem:[%s9904_s17 + $0x21] sm:$0xff]  ;;  %v616_v29 = vld [vmem:[%s9904_s17 + $0xa] sm:$0xff]  ;;  %v765_v30 = vld [vmem:[%s9905_s0 + $0x78] sm:$0xff]  ;;  %361 = vst [vmem:[#allocation3 + $0x29] sm:$0x1] %v8921_v58  ;;  %vm1340_vm4 = vcmask 1044484  }
 0x109   :  { %6991 = vmatpush3.msra.mxu0 %v415_v8  ;;  %7009 = vmatpush3.msra.mxu1 %v404_v9  ;;  %v615_v24 = vld [vmem:[%s9904_s17 + $0x2] sm:$0xff]  ;;  %v617_v31 = vld [vmem:[%s9904_s17 + $0x1a] sm:$0xff]  ;;  %v6081_v36 = vld [vmem:[%s9905_s0 + $0xd0] sm:$0xff]  ;;  %367 = vst [vmem:[#allocation5] sm:$0x1] %v8921_v58  ;;  %vm1342_vm5 = vcmask 1045509  }
 0x10a   :  { %6992 = vmatprep.subr.mxu0 %v414_v10  ;;  %7010 = vmatprep.subr.mxu1 %v403_v11  ;;  %v620_v28 = vld [vmem:[#allocation13 + $0x60] sm:$0xff]  ;;  %v6084_v33 = vld [vmem:[%s9905_s0 + $0xe8] sm:$0xff]  ;;  %v6082_v35 = vld [vmem:[%s9905_s0 + $0xd8] sm:$0xff]  ;;  %368 = vst [vmem:[#allocation5 + $0x10] sm:$0x1] %v8921_v58  ;;  %vm1344_vm6 = vcmask 1046534  }
 0x10b   :  { %6993 = vmatpush3.msra.mxu0 %v414_v10  ;;  %6994 = vmatprep.mubr.msk.f32.mxu0 %vm420_vm0, %v409_v12  ;;  %v618_v32 = vld [vmem:[%s9904_s17 + $0x22] sm:$0xff]  ;;  %v764_v37 = vld [vmem:[%s9905_s0 + $0x70] sm:$0xff]  ;;  %v6078_v42 = vld [vmem:[%s9905_s0 + $0xb8] sm:$0xff]  ;;  %369 = vst [vmem:[#allocation5 + $0x9] sm:$0x1] %v8921_v58  ;;  %vm1346_vm7 = vcmask 1047559  }
 0x10c   :  { %7011 = vmatpush3.msra.mxu1 %v403_v11  ;;  %7012 = vmatprep.mubr.msk.f32.mxu1 %vm420_vm0, %v399_v13  ;;  %v6083_v34 = vld [vmem:[%s9905_s0 + $0xe0] sm:$0xff]  ;;  %v6080_v38 = vld [vmem:[%s9905_s0 + $0xc8] sm:$0xff]  ;;  %v761_v43 = vld [vmem:[%s9905_s0 + $0x58] sm:$0xff]  ;;  %370 = vst [vmem:[#allocation5 + $0x19] sm:$0x1] %v8921_v58  ;;  %vm362_vm8 = vcmask 516096  }
 0x10d   :  { %6995 = vmatmul.mubr.msk.f32.vlgmr.msra.gmra.mxu0 %vm420_vm0, %v410_v14  ;;  %7013 = vmatmul.mubr.msk.f32.vlgmr.msra.gmra.mxu1 %vm420_vm0, %v400_v15  ;;  %v763_v39 = vld [vmem:[%s9905_s0 + $0x68] sm:$0xff]  ;;  %v762_v40 = vld [vmem:[%s9905_s0 + $0x60] sm:$0xff]  ;;  %v6077_v44 = vld [vmem:[%s9905_s0 + $0xb0] sm:$0xff]  ;;  %371 = vst [vmem:[#allocation6] sm:$0x1] %v8921_v58  ;;  %vm1525_vm9 = vcmask 523264  }
 0x10e   :  { %7018 = vmatprep.subr.mxu0 %v625_v16  ;;  %6997 = vmatprep.mubr.msk.f32.mxu0 %vm420_vm0, %v411_v17  ;;  %v6079_v41 = vld [vmem:[%s9905_s0 + $0xc0] sm:$0xff]  ;;  %v760_v45 = vld [vmem:[%s9905_s0 + $0x50] sm:$0xff]  ;;  %v759_v46 = vld [vmem:[%s9905_s0 + $0x48] sm:$0xff]  ;;  %372 = vst [vmem:[#allocation6 + $0x10] sm:$0x1] %v8921_v58  ;;  %s9911_s23 = sld [smem:[#allocation56_spill]] }
 0x10f   :  { %7019 = vmatpush3.msra.mxu0 %v625_v16  ;;  %7015 = vmatprep.mubr.msk.f32.mxu1 %vm420_vm0, %v401_v18  ;;  %v6076_v47 = vld [vmem:[%s9905_s0 + $0xa8] sm:$0xff]  ;;  %v6075_v48 = vld [vmem:[%s9905_s0 + $0xa0] sm:$0xff]  ;;  %v6074_v50 = vld [vmem:[%s9905_s0 + $0x98] sm:$0xff]  ;;  %373 = vst [vmem:[#allocation6 + $0x9] sm:$0x1] %v8921_v58  ;;  %s9912_s9 = sld [smem:[#allocation55_spill]] }
 0x110   :  { %7020 = vmatprep.subr.mxu0 %v624_v19  ;;  %7036 = vmatprep.subr.mxu1 %v6086_v20  ;;  %v758_v49 = vld [vmem:[%s9905_s0 + $0x40] sm:$0xff]  ;;  %v757_v51 = vld [vmem:[%s9905_s0 + $0x38] sm:$0xff]  ;;  %v6073_v52 = vld [vmem:[%s9905_s0 + $0x90] sm:$0xff]  ;;  %374 = vst [vmem:[#allocation6 + $0x19] sm:$0x1] %v8921_v58  ;;  %s9913_s27 = sld [smem:[#allocation58_spill]] }
 0x111   :  { %7021 = vmatpush3.msra.mxu0 %v624_v19  ;;  %7016 = vmatmul.mubr.msk.f32.gmra.mxu1 %vm420_vm0, %v402_v21  ;;  %v756_v53 = vld [vmem:[%s9905_s0 + $0x30] sm:$0xff]  ;;  %v6072_v54 = vld [vmem:[%s9905_s0 + $0x88] sm:$0xff]  ;;  %v6071_v56 = vld [vmem:[%s9905_s0 + $0x80] sm:$0xff]  ;;  %379 = vst [vmem:[#allocation8] sm:$0x1] %v8921_v58  ;;  %s9914_s30 = sld [smem:[#allocation59_spill]] }
 0x112   :  { %7022 = vmatprep.subr.mxu0 %v623_v22  ;;  %6998 = vmatmul.mubr.msk.f32.gmra.mxu0 %vm420_vm0, %v412_v23  ;;  %v755_v55 = vld [vmem:[%s9905_s0 + $0x28] sm:$0xff]  ;;  %v754_v57 = vld [vmem:[%s9905_s0 + $0x20] sm:$0xff]  ;;  %380 = vst [vmem:[#allocation8 + $0x8] sm:$0x1] %v8921_v58  ;;  %381 = vst [vmem:[#allocation8 + $0x5] sm:$0x1] %v8921_v58 }
 0x113   :  { %7023 = vmatpush3.msra.mxu0 %v623_v22  ;;  %7030 = vmatprep.mubr.msk.f32.mxu0 %vm420_vm0, %v615_v24  ;;  %382 = vst [vmem:[#allocation8 + $0xd] sm:$0x1] %v8921_v58  ;;  %383 = vst [vmem:[#allocation9] sm:$0x1] %v8921_v58  ;;  %v6102_v59 = vld [vmem:[%s9905_s0 + $0x178] sm:$0xff]  ;;  %v752_v61 = vld [vmem:[%s9905_s0 + $0x10] sm:$0xff] }
 0x114   :  { %7024 = vmatprep.subr.mxu0 %v622_v25  ;;  %7037 = vmatpush3.msra.mxu1 %v6086_v20  ;;  %384 = vst [vmem:[#allocation9 + $0x10] sm:$0x1] %v8921_v58  ;;  %385 = vst [vmem:[#allocation9 + $0x9] sm:$0x1] %v8921_v58  ;;  %v753_v60 = vld [vmem:[%s9905_s0 + $0x18] sm:$0xff]  ;;  %v751_v62 = vld [vmem:[%s9905_s0 + $0x8] sm:$0xff] }
 0x115   :  { %7025 = vmatpush3.msra.mxu0 %v622_v25  ;;  %7038 = vmatprep.subr.mxu1 %v6085_v26  ;;  %386 = vst [vmem:[#allocation9 + $0x19] sm:$0x1] %v8921_v58  ;;  %387 = vst [vmem:[#allocation10] sm:$0x1] %v8921_v58  ;;  %v750_v63 = vld [vmem:[%s9905_s0] sm:$0xff]  ;;  %s9915_s26 = sld [smem:[#allocation57_spill]] }
 0x116   :  { %7026 = vmatprep.subr.mxu0 %v621_v27  ;;  %7039 = vmatpush3.msra.mxu1 %v6085_v26  ;;  %388 = vst [vmem:[#allocation10 + $0x10] sm:$0x1] %v8921_v58  ;;  %389 = vst [vmem:[#allocation10 + $0x9] sm:$0x1] %v8921_v58  ;;  %v6070_v9 = vld [vmem:[%s9906_s18] ss:$0 sm:$0xff] }
 0x117   :  { %7027 = vmatpush3.msra.mxu0 %v621_v27  ;;  %7040 = vmatprep.subr.mxu1 %v6084_v33  ;;  %390 = vst [vmem:[#allocation10 + $0x19] sm:$0x1] %v8921_v58  ;;  %391 = vst [vmem:[#allocation11] sm:$0x1] %v8921_v58  ;;  %vm8923_vm10 = vmmov 0   ;;  %vm2414_vm11 = vcmask 519168  }
 0x118   :  { %7028 = vmatprep.subr.mxu0 %v620_v28  ;;  %7041 = vmatpush3.msra.mxu1 %v6084_v33  ;;  %392 = vst [vmem:[#allocation11 + $0x18] sm:$0x1] %v8921_v58  ;;  %393 = vst [vmem:[#allocation11 + $0x11] sm:$0x1] %v8921_v58  ;;  %s9916_s28 = sld [smem:[#allocation61_spill]]  ;;  %vm3298_vm12 = vcmask 1040384  }
 0x119   :  { %7029 = vmatpush3.msra.mxu0 %v620_v28  ;;  %7042 = vmatprep.subr.mxu1 %v6083_v34  ;;  %394 = vst [vmem:[#allocation11 + $0x29] sm:$0x1] %v8921_v58  ;;  %395 = vst [vmem:[#allocation12] sm:$0x1] %v8921_v58  ;;  %v6101_v28 = vld [vmem:[%s9905_s0 + $0x170] sm:$0xff]  ;;  %s9917_s1 = sld [smem:[#allocation60_spill]] }
 0x11a   :  { %7031 = vmatmul.mubr.msk.f32.vlgmr.msra.gmra.mxu0 %vm420_vm0, %v616_v29  ;;  %7074 = vmatprep.subr.mxu0 %v765_v30  ;;  %396 = vst [vmem:[#allocation12 + $0x18] sm:$0x1] %v8921_v58  ;;  %397 = vst [vmem:[#allocation12 + $0x11] sm:$0x1] %v8921_v58 }
 0x11b   :  { %7033 = vmatprep.mubr.msk.f32.mxu0 %vm420_vm0, %v617_v31  ;;  %7075 = vmatpush3.msra.mxu0 %v765_v30  ;;  %398 = vst [vmem:[#allocation12 + $0x29] sm:$0x1] %v8921_v58  ;;  %v6100_v30 = vld [vmem:[%s9905_s0 + $0x168] sm:$0xff]  ;;  %v6099_v31 = vld [vmem:[%s9905_s0 + $0x160] sm:$0xff]  ;;  %365 = vst.msk [vmem:[#allocation4 + $0x9] sm:$0x1] %vm362_vm8, %v8921_v58 }
 0x11c   :  { %7043 = vmatpush3.msra.mxu1 %v6083_v34  ;;  %7076 = vmatprep.subr.mxu0 %v764_v37  ;;  %363 = vst.msk [vmem:[#allocation4] sm:$0x1] %vm362_vm8, %v8921_v58  ;;  %364 = vst.msk [vmem:[#allocation4 + $0x10] sm:$0x1] %vm362_vm8, %v8921_v58 }
 0x11d   :  { %7044 = vmatprep.subr.mxu1 %v6082_v35  ;;  %7077 = vmatpush3.msra.mxu0 %v764_v37  ;;  %366 = vst.msk [vmem:[#allocation4 + $0x19] sm:$0x1] %vm362_vm8, %v8921_v58  ;;  %375 = vst.msk [vmem:[#allocation7] sm:$0x1] %vm362_vm8, %v8921_v58 }
 0x11e   :  { %7034 = vmatmul.mubr.msk.f32.gmra.mxu0 %vm420_vm0, %v618_v32  ;;  %7045 = vmatpush3.msra.mxu1 %v6082_v35  ;;  %v6098_v32 = vld [vmem:[%s9905_s0 + $0x158] sm:$0xff]  ;;  %376 = vst.msk [vmem:[#allocation7 + $0x8] sm:$0x1] %vm362_vm8, %v8921_v58  ;;  %377 = vst.msk [vmem:[#allocation7 + $0x5] sm:$0x1] %vm362_vm8, %v8921_v58 }
 0x11f   :  { %7046 = vmatprep.subr.mxu1 %v6081_v36  ;;  %7078 = vmatprep.subr.mxu0 %v763_v39  ;;  %378 = vst.msk [vmem:[#allocation7 + $0xd] sm:$0x1] %vm362_vm8, %v8921_v58 }
 0x120   :  { %7047 = vmatpush3.msra.mxu1 %v6081_v36  ;;  %7079 = vmatpush3.msra.mxu0 %v763_v39  ;;  %v6097_v36 = vld [vmem:[%s9905_s0 + $0x150] sm:$0xff]  ;;  %v6096_v39 = vld [vmem:[%s9905_s0 + $0x148] sm:$0xff] }
 0x121   :  { %7048 = vmatprep.subr.mxu1 %v6080_v38  ;;  %7080 = vmatprep.subr.mxu0 %v762_v40 }
 0x122   :  { %7049 = vmatpush3.msra.mxu1 %v6080_v38  ;;  %7081 = vmatpush3.msra.mxu0 %v762_v40  ;;  %v6095_v40 = vld [vmem:[%s9905_s0 + $0x140] sm:$0xff] }
 0x123   :  { %7050 = vmatprep.subr.mxu1 %v6079_v41  ;;  %7082 = vmatprep.subr.mxu0 %v761_v43 }
 0x124   :  { %7051 = vmatpush3.msra.mxu1 %v6079_v41  ;;  %7083 = vmatpush3.msra.mxu0 %v761_v43  ;;  %v6094_v41 = vld [vmem:[%s9905_s0 + $0x138] sm:$0xff]  ;;  %v6092_v43 = vld [vmem:[%s9905_s0 + $0x128] sm:$0xff] }
 0x125   :  { %7052 = vmatprep.subr.mxu1 %v6078_v42  ;;  %7084 = vmatprep.subr.mxu0 %v760_v45 }
 0x126   :  { %7053 = vmatpush3.msra.mxu1 %v6078_v42  ;;  %7085 = vmatpush3.msra.mxu0 %v760_v45  ;;  %v6093_v42 = vld [vmem:[%s9905_s0 + $0x130] sm:$0xff]  ;;  %v6090_v45 = vld [vmem:[%s9905_s0 + $0x118] sm:$0xff] }
 0x127   :  { %7054 = vmatprep.subr.mxu1 %v6077_v44  ;;  %7086 = vmatprep.subr.mxu0 %v759_v46 }
 0x128   :  { %7055 = vmatpush3.msra.mxu1 %v6077_v44  ;;  %7087 = vmatpush3.msra.mxu0 %v759_v46  ;;  %v6091_v44 = vld [vmem:[%s9905_s0 + $0x120] sm:$0xff]  ;;  %v6089_v46 = vld [vmem:[%s9905_s0 + $0x110] sm:$0xff] }
 0x129   :  { %7056 = vmatprep.subr.mxu1 %v6076_v47  ;;  %7088 = vmatprep.subr.mxu0 %v758_v49 }
 0x12a   :  { %7057 = vmatpush3.msra.mxu1 %v6076_v47  ;;  %7089 = vmatpush3.msra.mxu0 %v758_v49  ;;  %v6088_v47 = vld [vmem:[%s9905_s0 + $0x108] sm:$0xff] }
 0x12b   :  { %7058 = vmatprep.subr.mxu1 %v6075_v48  ;;  %7090 = vmatprep.subr.mxu0 %v757_v51 }
 0x12c   :  { %7059 = vmatpush3.msra.mxu1 %v6075_v48  ;;  %7091 = vmatpush3.msra.mxu0 %v757_v51  ;;  %v6087_v48 = vld [vmem:[%s9905_s0 + $0x100] sm:$0xff] }
 0x12d   :  { %7060 = vmatprep.subr.mxu1 %v6074_v50  ;;  %7092 = vmatprep.subr.mxu0 %v756_v53 }
 0x12e   :  { %7061 = vmatpush3.msra.mxu1 %v6074_v50  ;;  %7093 = vmatpush3.msra.mxu0 %v756_v53  ;;  %v1447_v53 = vld [vmem:[%s9908_s16 + $0x78] sm:$0xff] }
 0x12f   :  { %7062 = vmatprep.subr.mxu1 %v6073_v52  ;;  %7094 = vmatprep.subr.mxu0 %v755_v55 }
 0x130   :  { %7063 = vmatpush3.msra.mxu1 %v6073_v52  ;;  %7095 = vmatpush3.msra.mxu0 %v755_v55  ;;  %v1253_v52 = vld [vmem:[%s9907_s15 + $0x78] sm:$0xff]  ;;  %v1446_v55 = vld [vmem:[%s9908_s16 + $0x70] sm:$0xff] }
 0x131   :  { %7064 = vmatprep.subr.mxu1 %v6072_v54  ;;  %7096 = vmatprep.subr.mxu0 %v754_v57 }
 0x132   :  { %7065 = vmatpush3.msra.mxu1 %v6072_v54  ;;  %7097 = vmatpush3.msra.mxu0 %v754_v57  ;;  %v1252_v54 = vld [vmem:[%s9907_s15 + $0x70] sm:$0xff]  ;;  %v1445_v57 = vld [vmem:[%s9908_s16 + $0x68] sm:$0xff] }
 0x133   :  { %7066 = vmatprep.subr.mxu1 %v6071_v56  ;;  %7098 = vmatprep.subr.mxu0 %v753_v60 }
 0x134   :  { %7067 = vmatpush3.msra.mxu1 %v6071_v56  ;;  %7099 = vmatpush3.msra.mxu0 %v753_v60  ;;  %v1251_v56 = vld [vmem:[%s9907_s15 + $0x68] sm:$0xff]  ;;  %v1444_v60 = vld [vmem:[%s9908_s16 + $0x60] sm:$0xff] }
 0x135   :  { %7112 = vmatprep.subr.mxu1 %v6102_v59  ;;  %7100 = vmatprep.subr.mxu0 %v752_v61 }
 0x136   :  { %7101 = vmatpush3.msra.mxu0 %v752_v61  ;;  %v1249_v61 = vld [vmem:[%s9907_s15 + $0x58] sm:$0xff] }
 0x137   :  { %7102 = vmatprep.subr.mxu0 %v751_v62 }
 0x138   :  { %7103 = vmatpush3.msra.mxu0 %v751_v62  ;;  %v1443_v62 = vld [vmem:[%s9908_s16 + $0x58] sm:$0xff] }
 0x139   :  { %7104 = vmatprep.subr.mxu0 %v750_v63 }
 0x13a   :  { %7105 = vmatpush3.msra.mxu0 %v750_v63  ;;  %v1248_v63 = vld [vmem:[%s9907_s15 + $0x50] sm:$0xff] }
 0x13b   :  { %7150 = vmatprep.subr.mxu0 %v1253_v52 }
 0x1cd   :  { %v6996_v0 = vpop.f32.mrf.mxu0  ;;  %v7014_v1 = vpop.f32.mrf.mxu1 }
 0x1ce   :  { %v602_v7 = vadd.f32 %v7014_v1, %v6996_v0  ;;  %v1442_v0 = vld [vmem:[%s9908_s16 + $0x50] sm:$0xff]  ;;  %v1247_v1 = vld [vmem:[%s9907_s15 + $0x48] sm:$0xff] }
 0x1cf   :  { %v499_v2 = vpop.f32.mrf.mxu0  ;;  %v596_v4 = vpop.f32.mrf.mxu1 }
 0x1d0   :  { %v597_v10 = vadd.f32 %v596_v4, %v499_v2  ;;  %v1441_v2 = vld [vmem:[%s9908_s16 + $0x48] sm:$0xff]  ;;  %v1440_v4 = vld [vmem:[%s9908_s16 + $0x40] sm:$0xff] }
 0x1d1   :  { %v7017_v5 = vpop.f32.mrf.mxu1 }
 0x1d2   :  { %v6999_v3 = vpop.f32.mrf.mxu0 }
 0x1d3   :  { %v606_v12 = vpop.f32.mrf.mxu1  ;;  %v612_v14 = vadd.f32 %v7017_v5, %v6999_v3  ;;  %v1246_v3 = vld [vmem:[%s9907_s15 + $0x40] sm:$0xff]  ;;  %v1245_v5 = vld [vmem:[%s9907_s15 + $0x38] sm:$0xff] }
 0x1d4   :  { %v509_v6 = vpop.f32.mrf.mxu0 }
 0x1d5   :  { %v607_v18 = vadd.f32 %v606_v12, %v509_v6  ;;  %v1439_v6 = vld [vmem:[%s9908_s16 + $0x38] sm:$0xff]  ;;  %v1436_v12 = vld [vmem:[%s9908_s16 + $0x20] sm:$0xff] }
 0x1da   :  { %v7032_v8 = vpop.f32.mrf.mxu0 }
 0x1db   :  { %v724_v11 = vadd.f32 %v7032_v8, %v602_v7  ;;  %v1244_v7 = vld [vmem:[%s9907_s15 + $0x30] sm:$0xff] }
 0x1dc   :  { %v704_v13 = vpop.f32.mrf.mxu0  ;;  %v1438_v8 = vld [vmem:[%s9908_s16 + $0x30] sm:$0xff] }
 0x1dd   :  { %v735_v15 = vadd.f32 %v6070_v9, %v724_v11  ;;  %v723_v16 = vadd.f32 %v704_v13, %v597_v10  ;;  %v1437_v10 = vld [vmem:[%s9908_s16 + $0x28] sm:$0xff]  ;;  %v1242_v11 = vld [vmem:[%s9907_s15 + $0x20] sm:$0xff]  ;;  %v1241_v13 = vld [vmem:[%s9907_s15 + $0x18] sm:$0xff] }
 0x1de   :  { %v7035_v17 = vpop.f32.mrf.mxu0 }
 0x1df   :  { %v739_v19 = vmax.f32 %v735_v15, 0.0  ;;  %v734_v20 = vadd.f32 %v6070_v9, %v723_v16  ;;  %v726_v21 = vadd.f32 %v7035_v17, %v612_v14  ;;  %v1435_v14 = vld [vmem:[%s9908_s16 + $0x18] sm:$0xff]  ;;  %v1240_v15 = vld [vmem:[%s9907_s15 + $0x10] sm:$0xff]  ;;  %v1239_v17 = vld [vmem:[%s9907_s15 + $0x8] sm:$0xff] }
 0x1e0   :  { %v714_v22 = vpop.f32.mrf.mxu0  ;;  %v1434_v16 = vld [vmem:[%s9908_s16 + $0x10] sm:$0xff] }
 0x1e1   :  { %743 = vst [vmem:[#allocation2 + $0x9] sm:$0xff] %v739_v19  ;;  %v738_v23 = vmax.f32 %v734_v20, 0.0  ;;  %v737_v24 = vadd.f32 %v6070_v9, %v726_v21  ;;  %v725_v25 = vadd.f32 %v714_v22, %v607_v18  ;;  %v1433_v18 = vld [vmem:[%s9908_s16 + $0x8] sm:$0xff]  ;;  %v1432_v20 = vld [vmem:[%s9908_s16] sm:$0xff]  ;;  %v9289_v21 = vld [vmem:[%s9909_s22 + $0x78] sm:$0xff] }
 0x1e2   :  { %v9293_v22 = vld [vmem:[%s9909_s22 + $0xb8] sm:$0xff] }
 0x1e3   :  { %742 = vst [vmem:[#allocation2 + $0x1] sm:$0xff] %v738_v23  ;;  %v741_v26 = vmax.f32 %v737_v24, 0.0  ;;  %v736_v27 = vadd.f32 %v6070_v9, %v725_v25  ;;  %7068 = vmatprep.mubr.f32.mxu1 %v738_v23  ;;  %v1243_v9 = vld [vmem:[%s9907_s15 + $0x28] sm:$0xff] }
 0x1e4   :  { %7069 = vmatmul.mubr.f32.vlgmr.msra.gmra.mxu1 %v739_v19  ;;  %v1238_v19 = vld [vmem:[%s9907_s15] sm:$0xff] }
 0x1e5   :  { %745 = vst [vmem:[#allocation2 + $0x21] sm:$0xff] %v741_v26  ;;  %v740_v29 = vmax.f32 %v736_v27, 0.0  ;;  %7113 = vmatpush3.msra.mxu1 %v6102_v59  ;;  %v1250_v59 = vld [vmem:[%s9907_s15 + $0x60] sm:$0xff] }
 0x1e6   :  { %7114 = vmatprep.subr.mxu1 %v6101_v28 }
 0x1e7   :  { %744 = vst [vmem:[#allocation2 + $0x19] sm:$0xff] %v740_v29  ;;  %7115 = vmatpush3.msra.mxu1 %v6101_v28  ;;  %7071 = vmatprep.mubr.f32.mxu1 %v740_v29  ;;  %v8922_v28 = vmov 1983009808  }
 0x1e8   :  { %7116 = vmatprep.subr.mxu1 %v6100_v30  ;;  %7072 = vmatmul.mubr.f32.gmra.mxu1 %v741_v26  ;;  %v958_v49 = vld [vmem:[#allocation2 + $0xa] sm:$0xff]  ;;  %v1092_v29 = vunpack.c.l.s4 %v8922_v28 }
 0x1e9   :  { %7117 = vmatpush3.msra.mxu1 %v6100_v30  ;;  %v1094_v30 = vlaneseq }
 0x1ea   :  { %v746_v33 = vld [vmem:[#allocation2] sm:$0xff]  ;;  %v747_v34 = vld [vmem:[#allocation2 + $0x8] sm:$0xff]  ;;  %7118 = vmatprep.subr.mxu1 %v6099_v31 }
 0x1eb   :  { %v957_v35 = vld [vmem:[#allocation2 + $0x2] sm:$0xff]  ;;  %7106 = vmatprep.mubr.f32.mxu0 %v746_v33  ;;  %7119 = vmatpush3.msra.mxu1 %v6099_v31 }
 0x1ec   :  { %7144 = vmatprep.mubr.f32.mxu1 %v957_v35  ;;  %7107 = vmatmul.mubr.f32.vlgmr.msra.gmra.mxu0 %v747_v34  ;;  %v960_v51 = vld [vmem:[#allocation2 + $0x22] sm:$0xff]  ;;  %v1093_v34 = vunpack.c.0.s8 %v1092_v29  ;;  %v9296_v35 = vshrl.u32 %v1094_v30, 7 }
 0x1ed   :  { %7120 = vmatprep.subr.mxu1 %v6098_v32  ;;  %7151 = vmatpush3.msra.mxu0 %v1253_v52 }
 0x1ee   :  { %v748_v37 = vld [vmem:[#allocation2 + $0x18] sm:$0xff]  ;;  %v749_v38 = vld [vmem:[#allocation2 + $0x20] sm:$0xff]  ;;  %7121 = vmatpush3.msra.mxu1 %v6098_v32  ;;  %7152 = vmatprep.subr.mxu0 %v1252_v54 }
 0x1ef   :  { %7109 = vmatprep.mubr.f32.mxu0 %v748_v37  ;;  %7122 = vmatprep.subr.mxu1 %v6097_v36  ;;  %v959_v50 = vld [vmem:[#allocation2 + $0x1a] sm:$0xff] }
 0x1f0   :  { %7110 = vmatmul.mubr.f32.gmra.mxu0 %v749_v38  ;;  %7123 = vmatpush3.msra.mxu1 %v6097_v36  ;;  %v6103_v37 = vld [vmem:[%s9910_s20] ss:$0 sm:$0xff] }
 0x1f1   :  { %7124 = vmatprep.subr.mxu1 %v6096_v39  ;;  %7153 = vmatpush3.msra.mxu0 %v1252_v54 }
 0x1f2   :  { %7125 = vmatpush3.msra.mxu1 %v6096_v39  ;;  %7154 = vmatprep.subr.mxu0 %v1251_v56 }
 0x1f3   :  { %7126 = vmatprep.subr.mxu1 %v6095_v40  ;;  %7155 = vmatpush3.msra.mxu0 %v1251_v56 }
 0x1f4   :  { %7127 = vmatpush3.msra.mxu1 %v6095_v40  ;;  %7156 = vmatprep.subr.mxu0 %v1250_v59 }
 0x1f5   :  { %7128 = vmatprep.subr.mxu1 %v6094_v41  ;;  %7157 = vmatpush3.msra.mxu0 %v1250_v59 }
 0x1f6   :  { %7129 = vmatpush3.msra.mxu1 %v6094_v41  ;;  %7158 = vmatprep.subr.mxu0 %v1249_v61 }
 0x1f7   :  { %7130 = vmatprep.subr.mxu1 %v6093_v42  ;;  %7159 = vmatpush3.msra.mxu0 %v1249_v61 }
 0x1f8   :  { %7131 = vmatpush3.msra.mxu1 %v6093_v42  ;;  %7160 = vmatprep.subr.mxu0 %v1248_v63 }
 0x1f9   :  { %7132 = vmatprep.subr.mxu1 %v6092_v43  ;;  %7161 = vmatpush3.msra.mxu0 %v1248_v63 }
 0x1fa   :  { %7133 = vmatpush3.msra.mxu1 %v6092_v43  ;;  %7162 = vmatprep.subr.mxu0 %v1247_v1 }
 0x1fb   :  { %7134 = vmatprep.subr.mxu1 %v6091_v44  ;;  %7163 = vmatpush3.msra.mxu0 %v1247_v1  ;;  %v9307_v1 = vsub.s32 0, %v9296_v35 }
 0x1fc   :  { %7135 = vmatpush3.msra.mxu1 %v6091_v44  ;;  %7164 = vmatprep.subr.mxu0 %v1246_v3  ;;  %v9300_v44 = vsub.s32 %v1093_v34, %v9296_v35 }
 0x1fd   :  { %7136 = vmatprep.subr.mxu1 %v6090_v45  ;;  %7165 = vmatpush3.msra.mxu0 %v1246_v3 }
 0x1fe   :  { %7137 = vmatpush3.msra.mxu1 %v6090_v45  ;;  %7166 = vmatprep.subr.mxu0 %v1245_v5 }
 0x1ff   :  { %7138 = vmatprep.subr.mxu1 %v6089_v46  ;;  %7167 = vmatpush3.msra.mxu0 %v1245_v5 }
 0x200   :  { %7139 = vmatpush3.msra.mxu1 %v6089_v46  ;;  %7168 = vmatprep.subr.mxu0 %v1244_v7 }
 0x201   :  { %7140 = vmatprep.subr.mxu1 %v6088_v47  ;;  %7169 = vmatpush3.msra.mxu0 %v1244_v7 }
 0x202   :  { %7141 = vmatpush3.msra.mxu1 %v6088_v47  ;;  %7170 = vmatprep.subr.mxu0 %v1243_v9 }
 0x203   :  { %7142 = vmatprep.subr.mxu1 %v6087_v48  ;;  %7171 = vmatpush3.msra.mxu0 %v1243_v9 }
 0x204   :  { %7143 = vmatpush3.msra.mxu1 %v6087_v48  ;;  %7172 = vmatprep.subr.mxu0 %v1242_v11 }
 0x205   :  { %7145 = vmatmul.mubr.f32.vlgmr.msra.gmra.mxu1 %v958_v49  ;;  %7185 = vmatprep.subr.mxu1 %v1447_v53 }
 0x206   :  { %7147 = vmatprep.mubr.f32.mxu1 %v959_v50  ;;  %7186 = vmatpush3.msra.mxu1 %v1447_v53 }
 0x207   :  { %7187 = vmatprep.subr.mxu1 %v1446_v55  ;;  %7173 = vmatpush3.msra.mxu0 %v1242_v11 }
 0x208   :  { %7188 = vmatpush3.msra.mxu1 %v1446_v55  ;;  %7174 = vmatprep.subr.mxu0 %v1241_v13 }
 0x209   :  { %7148 = vmatmul.mubr.f32.gmra.mxu1 %v960_v51  ;;  %7189 = vmatprep.subr.mxu1 %v1445_v57 }
 0x20a   :  { %7190 = vmatpush3.msra.mxu1 %v1445_v57  ;;  %7175 = vmatpush3.msra.mxu0 %v1241_v13 }
 0x20b   :  { %7191 = vmatprep.subr.mxu1 %v1444_v60  ;;  %7176 = vmatprep.subr.mxu0 %v1240_v15 }
 0x20c   :  { %7192 = vmatpush3.msra.mxu1 %v1444_v60  ;;  %7177 = vmatpush3.msra.mxu0 %v1240_v15 }
 0x20d   :  { %7193 = vmatprep.subr.mxu1 %v1443_v62  ;;  %7178 = vmatprep.subr.mxu0 %v1239_v17 }
 0x20e   :  { %7194 = vmatpush3.msra.mxu1 %v1443_v62  ;;  %7179 = vmatpush3.msra.mxu0 %v1239_v17 }
 0x20f   :  { %7195 = vmatprep.subr.mxu1 %v1442_v0  ;;  %7180 = vmatprep.subr.mxu0 %v1238_v19 }
 0x210   :  { %7196 = vmatpush3.msra.mxu1 %v1442_v0  ;;  %7181 = vmatpush3.msra.mxu0 %v1238_v19 }
 0x211   :  { %7197 = vmatprep.subr.mxu1 %v1441_v2  ;;  %7220 = vmatprep.subr.mxu0 %v9289_v21 }
 0x212   :  { %7198 = vmatpush3.msra.mxu1 %v1441_v2 }
 0x213   :  { %7199 = vmatprep.subr.mxu1 %v1440_v4 }
 0x214   :  { %7200 = vmatpush3.msra.mxu1 %v1440_v4 }
 0x215   :  { %7201 = vmatprep.subr.mxu1 %v1439_v6 }
 0x216   :  { %7202 = vmatpush3.msra.mxu1 %v1439_v6 }
 0x217   :  { %7203 = vmatprep.subr.mxu1 %v1438_v8 }
 0x218   :  { %7204 = vmatpush3.msra.mxu1 %v1438_v8 }
 0x219   :  { %7205 = vmatprep.subr.mxu1 %v1437_v10 }
 0x21a   :  { %7206 = vmatpush3.msra.mxu1 %v1437_v10 }
 0x21b   :  { %7207 = vmatprep.subr.mxu1 %v1436_v12 }
 0x21c   :  { %7208 = vmatpush3.msra.mxu1 %v1436_v12 }
 0x21d   :  { %7209 = vmatprep.subr.mxu1 %v1435_v14 }
 0x21e   :  { %7210 = vmatpush3.msra.mxu1 %v1435_v14 }
 0x21f   :  { %7211 = vmatprep.subr.mxu1 %v1434_v16 }
 0x220   :  { %7212 = vmatpush3.msra.mxu1 %v1434_v16 }
 0x221   :  { %7213 = vmatprep.subr.mxu1 %v1433_v18 }
 0x222   :  { %7214 = vmatpush3.msra.mxu1 %v1433_v18 }
 0x223   :  { %7215 = vmatprep.subr.mxu1 %v1432_v20 }
 0x224   :  { %7216 = vmatpush3.msra.mxu1 %v1432_v20 }
 0x225   :  { %7258 = vmatprep.subr.mxu1 %v9293_v22 }
 0x2a4   :  { %v7070_v23 = vpop.f32.mrf.mxu1 }
 0x2a6   :  { %v853_v24 = vpop.f32.mrf.mxu1 }
 0x2a8   :  { %v7073_v26 = vpop.f32.mrf.mxu1 }
 0x2aa   :  { %v863_v31 = vpop.f32.mrf.mxu1 }
 0x2ac   :  { %v7108_v25 = vpop.f32.mrf.mxu0 }
 0x2ad   :  { %v944_v32 = vadd.f32 %v7108_v25, %v7070_v23 }
 0x2ae   :  { %v938_v27 = vpop.f32.mrf.mxu0 }
 0x2af   :  { %v939_v38 = vadd.f32 %v938_v27, %v853_v24 }
 0x2b0   :  { %v7111_v33 = vpop.f32.mrf.mxu0 }
 0x2b1   :  { %v954_v41 = vadd.f32 %v7111_v33, %v7073_v26 }
 0x2b2   :  { %v948_v42 = vpop.f32.mrf.mxu0 }
 0x2b3   :  { %v949_v50 = vadd.f32 %v948_v42, %v863_v31 }
 0x2c5   :  { %v7146_v36 = vpop.f32.mrf.mxu1 }
 0x2c6   :  { %v1064_v39 = vadd.f32 %v7146_v36, %v944_v32 }
 0x2c7   :  { %v1044_v40 = vpop.f32.mrf.mxu1 }
 0x2c8   :  { %v1075_v43 = vadd.f32 %v6103_v37, %v1064_v39  ;;  %v1063_v45 = vadd.f32 %v1044_v40, %v939_v38 }
 0x2c9   :  { %v7149_v46 = vpop.f32.mrf.mxu1 }
 0x2ca   :  { %v1079_v47 = vmax.f32 %v1075_v43, 0.0  ;;  %v1074_v48 = vadd.f32 %v6103_v37, %v1063_v45  ;;  %v1066_v49 = vadd.f32 %v7149_v46, %v954_v41 }
 0x2cb   :  { %v1054_v51 = vpop.f32.mrf.mxu1 }
 0x2cc   :  { %1083 = vst [vmem:[#allocation3 + $0x9] sm:$0xff] %v1079_v47  ;;  %v1107_v52 = vcombine.high %v1079_v47, %v1079_v47  ;;  %v1114_v53 = vrot.slane %v1079_v47, %v9300_v44  ;;  %v1078_v54 = vmax.f32 %v1074_v48, 0.0  ;;  %v1077_v55 = vadd.f32 %v6103_v37, %v1066_v49 }
 0x2cd   :  { %v1065_v56 = vadd.f32 %v1054_v51, %v949_v50 }
 0x2ce   :  { %1082 = vst [vmem:[#allocation3 + $0x1] sm:$0xff] %v1078_v54  ;;  %v1090_v57 = vcombine.high %v1078_v54, %v1078_v54  ;;  %v1121_v59 = vrot.slane %v1107_v52, %v9300_v44  ;;  %v1097_v60 = vrot.slane %v1078_v54, %v9300_v44  ;;  %v1081_v61 = vmax.f32 %v1077_v55, 0.0 }
 0x2cf   :  { %v1076_v62 = vadd.f32 %v6103_v37, %v1065_v56  ;;  %v1122_v63 = vcombine.high %v1114_v53, %v1114_v53  ;;  %v6108_v6 = vrot.slane %v1114_v53, 9 }
 0x2d0   :  { %v1104_v0 = vrot.slane %v1090_v57, %v9300_v44  ;;  %v1105_v2 = vcombine.high %v1097_v60, %v1097_v60  ;;  %v6104_v3 = vrot.slane %v1097_v60, 9  ;;  %1085 = vst [vmem:[#allocation3 + $0x21] sm:$0xff] %v1081_v61  ;;  %v1141_v4 = vcombine.high %v1081_v61, %v1081_v61 }
 0x2d1   :  { %v1148_v5 = vrot.slane %v1081_v61, %v9300_v44  ;;  %v1080_v9 = vmax.f32 %v1076_v62, 0.0  ;;  %v1123_v12 = vcombine.high %v1121_v59, %v1121_v59  ;;  %v6109_v17 = vrot.slane %v1122_v63, 9 }
 0x2d2   :  { %v1106_v7 = vcombine.high %v1104_v0, %v1104_v0  ;;  %v6106_v8 = vrot.slane %v1104_v0, 9  ;;  %v6105_v10 = vrot.slane %v1105_v2, 9  ;;  %v1222_v11 = vmax.f32 %v1097_v60, %v6104_v3 }
 0x2d3   :  { %v1155_v14 = vrot.slane %v1141_v4, %v9300_v44  ;;  %v1156_v15 = vcombine.high %v1148_v5, %v1148_v5  ;;  %1084 = vst [vmem:[#allocation3 + $0x19] sm:$0xff] %v1080_v9  ;;  %v1124_v16 = vcombine.high %v1080_v9, %v1080_v9  ;;  %v1226_v19 = vmax.f32 %v1114_v53, %v6108_v6 }
 0x2d4   :  { %v6107_v13 = vrot.slane %v1106_v7, 9  ;;  %v1223_v18 = vmax.f32 %v1105_v2, %v6105_v10  ;;  %v1224_v20 = vmax.f32 %v1104_v0, %v6106_v8  ;;  %v6110_v24 = vrot.slane %v1121_v59, 9 }
 0x2d5   :  { %v1273_v25 = vrot.slane %v1222_v11, %v9307_v1  ;;  %v6116_v26 = vrot.slane %v1148_v5, 9  ;;  %v1131_v27 = vrot.slane %v1080_v9, %v9300_v44  ;;  %v1138_v28 = vrot.slane %v1124_v16, %v9300_v44 }
 0x2d6   :  { %v1225_v23 = vmax.f32 %v1106_v7, %v6107_v13  ;;  %v1277_v29 = vrot.slane %v1223_v18, %v9307_v1  ;;  %v1157_v30 = vcombine.high %v1155_v14, %v1155_v14  ;;  %v6117_v31 = vrot.slane %v1156_v15, 9 }
 0x2d7   :  { %v6111_v32 = vrot.slane %v1123_v12, 9  ;;  %v1139_v33 = vcombine.high %v1131_v27, %v1131_v27  ;;  %v1140_v34 = vcombine.high %v1138_v28, %v1138_v28  ;;  %v6112_v36 = vrot.slane %v1131_v27, 9 }
 0x2d8   :  { %v6114_v37 = vrot.slane %v1138_v28, 9  ;;  %v1281_v38 = vrot.slane %v1224_v20, %v9307_v1  ;;  %v6118_v39 = vrot.slane %v1155_v14, 9  ;;  %v1227_v40 = vmax.f32 %v1122_v63, %v6109_v17  ;;  %v6126_v20 = vld [vmem:[%s9909_s22 + $0x70] sm:$0xff] }
 0x2d9   :  { %v1285_v41 = vrot.slane %v1225_v23, %v9307_v1  ;;  %v6113_v42 = vrot.slane %v1139_v33, 9  ;;  %v6115_v43 = vrot.slane %v1140_v34, 9  ;;  %v1230_v45 = vmax.f32 %v1131_v27, %v6112_v36  ;;  %v6138_v23 = vld [vmem:[%s9909_s22 + $0xb0] sm:$0xff]  ;;  %v6136_v27 = vld [vmem:[%s9909_s22 + $0xa0] sm:$0xff] }
 0x2da   :  { %v1232_v46 = vmax.f32 %v1138_v28, %v6114_v37  ;;  %v1234_v47 = vmax.f32 %v1148_v5, %v6116_v26  ;;  %v1235_v48 = vmax.f32 %v1156_v15, %v6117_v31  ;;  %v1228_v49 = vmax.f32 %v1121_v59, %v6110_v24  ;;  %v6125_v24 = vld [vmem:[%s9909_s22 + $0x68] sm:$0xff]  ;;  %v6124_v26 = vld [vmem:[%s9909_s22 + $0x60] sm:$0xff]  ;;  %v6123_v28 = vld [vmem:[%s9909_s22 + $0x58] sm:$0xff] }
 0x2db   :  { %v1335_v50 = vsel %vm1334_vm1, %v1277_v29, %v1273_v25  ;;  %v1231_v51 = vmax.f32 %v1139_v33, %v6113_v42  ;;  %v1233_v52 = vmax.f32 %v1140_v34, %v6115_v43  ;;  %v1229_v53 = vmax.f32 %v1123_v12, %v6111_v32  ;;  %v6137_v25 = vld [vmem:[%s9909_s22 + $0xa8] sm:$0xff]  ;;  %v6134_v29 = vld [vmem:[%s9909_s22 + $0x90] sm:$0xff]  ;;  %v6120_v32 = vld [vmem:[%s9909_s22 + $0x40] sm:$0xff] }
 0x2dc   :  { %v1289_v54 = vrot.slane %v1226_v19, %v9307_v1  ;;  %v1313_v55 = vrot.slane %v1232_v46, %v9307_v1  ;;  %v1293_v56 = vrot.slane %v1227_v40, %v9307_v1  ;;  %v1337_v57 = vsel %vm1336_vm2, %v1281_v38, %v1335_v50  ;;  %v6133_v31 = vld [vmem:[%s9909_s22 + $0x88] sm:$0xff]  ;;  %v6132_v33 = vld [vmem:[%s9909_s22 + $0x80] sm:$0xff]  ;;  %v1537_v34 = vld [vmem:[%s9909_s22 + $0x38] sm:$0xff] }
 0x2dd   :  { %v6119_v60 = vrot.slane %v1157_v30, 9  ;;  %v1305_v61 = vrot.slane %v1230_v45, %v9307_v1  ;;  %v1309_v62 = vrot.slane %v1231_v51, %v9307_v1  ;;  %v1317_v59 = vrot.slane %v1233_v52, %v9307_v1  ;;  %v1534_v50 = vld [vmem:[%s9909_s22 + $0x20] sm:$0xff]  ;;  %v1533_v51 = vld [vmem:[%s9909_s22 + $0x18] sm:$0xff]  ;;  %v1532_v52 = vld [vmem:[%s9909_s22 + $0x10] sm:$0xff] }
 0x2de   :  { %v1339_v63 = vsel %vm1338_vm3, %v1285_v41, %v1337_v57  ;;  %v1236_v0 = vmax.f32 %v1155_v14, %v6118_v39  ;;  %v1297_v2 = vrot.slane %v1228_v49, %v9307_v1  ;;  %v1301_v4 = vrot.slane %v1229_v53, %v9307_v1  ;;  %v1535_v49 = vld [vmem:[%s9909_s22 + $0x28] sm:$0xff]  ;;  %v6157_v57 = vld [vmem:[%s9911_s23 + $0xf0] sm:$0xff] }
 0x2df   :  { %v1341_v3 = vsel %vm1340_vm4, %v1289_v54, %v1339_v63  ;;  %v1237_v6 = vmax.f32 %v1157_v30, %v6119_v60  ;;  %v1348_v7 = vsel %vm1334_vm1, %v1309_v62, %v1305_v61  ;;  %v1321_v8 = vrot.slane %v1234_v47, %v9307_v1  ;;  %v6121_v30 = vld [vmem:[%s9909_s22 + $0x48] sm:$0xff]  ;;  %v1536_v47 = vld [vmem:[%s9909_s22 + $0x30] sm:$0xff]  ;;  %v1530_v54 = vld [vmem:[%s9909_s22] sm:$0xff] }
 0x2e0   :  { %v1343_v5 = vsel %vm1342_vm5, %v1293_v56, %v1341_v3  ;;  %v1349_v10 = vsel %vm1336_vm2, %v1313_v55, %v1348_v7  ;;  %v1325_v12 = vrot.slane %v1235_v48, %v9307_v1  ;;  %v1329_v14 = vrot.slane %v1236_v0, %v9307_v1  ;;  %v1531_v53 = vld [vmem:[%s9909_s22 + $0x8] sm:$0xff]  ;;  %v6158_v56 = vld [vmem:[%s9911_s23 + $0xf8] sm:$0xff]  ;;  %v1834_v62 = vld [vmem:[%s9911_s23 + $0x70] sm:$0xff] }
 0x2e1   :  { %v1345_v9 = vsel %vm1344_vm6, %v1297_v2, %v1343_v5  ;;  %v1350_v13 = vsel %vm1338_vm3, %v1317_v59, %v1349_v10  ;;  %v1333_v16 = vrot.slane %v1237_v6, %v9307_v1  ;;  %v6156_v60 = vld [vmem:[%s9911_s23 + $0xe8] sm:$0xff]  ;;  %v1835_v61 = vld [vmem:[%s9911_s23 + $0x78] sm:$0xff]  ;;  %v6155_v59 = vld [vmem:[%s9911_s23 + $0xe0] sm:$0xff] }
 0x2e2   :  { %v1347_v11 = vsel %vm1346_vm7, %v1301_v4, %v1345_v9  ;;  %v1351_v15 = vsel %vm1340_vm4, %v1321_v8, %v1350_v13  ;;  %v6154_v63 = vld [vmem:[%s9911_s23 + $0xd8] sm:$0xff]  ;;  %v1833_v0 = vld [vmem:[%s9911_s23 + $0x68] sm:$0xff]  ;;  %v6153_v2 = vld [vmem:[%s9911_s23 + $0xd0] sm:$0xff] }
 0x2e3   :  { %7182 = vmatprep.mubr.f32.mxu0 %v1347_v11  ;;  %7217 = vmatprep.mubr.f32.mxu1 %v1347_v11  ;;  %v1352_v17 = vsel %vm1342_vm5, %v1325_v12, %v1351_v15  ;;  %v1832_v3 = vld [vmem:[%s9911_s23 + $0x60] sm:$0xff]  ;;  %v6152_v4 = vld [vmem:[%s9911_s23 + $0xc8] sm:$0xff]  ;;  %v1831_v5 = vld [vmem:[%s9911_s23 + $0x58] sm:$0xff] }
 0x2e4   :  { %v1353_v18 = vsel %vm1344_vm6, %v1329_v14, %v1352_v17  ;;  %v1830_v6 = vld [vmem:[%s9911_s23 + $0x50] sm:$0xff]  ;;  %v6151_v7 = vld [vmem:[%s9911_s23 + $0xc0] sm:$0xff]  ;;  %v6150_v8 = vld [vmem:[%s9911_s23 + $0xb8] sm:$0xff] }
 0x2e5   :  { %v1354_v19 = vsel %vm1346_vm7, %v1333_v16, %v1353_v18  ;;  %v6149_v9 = vld [vmem:[%s9911_s23 + $0xb0] sm:$0xff]  ;;  %v6148_v10 = vld [vmem:[%s9911_s23 + $0xa8] sm:$0xff]  ;;  %v6147_v12 = vld [vmem:[%s9911_s23 + $0xa0] sm:$0xff] }
 0x2e6   :  { %7183 = vmatmul.mubr.f32.vlgmr.msra.gmra.mxu0 %v1354_v19  ;;  %7218 = vmatmul.mubr.f32.vlgmr.msra.gmra.mxu1 %v1354_v19  ;;  %v1829_v11 = vld [vmem:[%s9911_s23 + $0x48] sm:$0xff]  ;;  %v1828_v13 = vld [vmem:[%s9911_s23 + $0x40] sm:$0xff]  ;;  %v6146_v14 = vld [vmem:[%s9911_s23 + $0x98] sm:$0xff] }
 0x2e7   :  { %7221 = vmatpush3.msra.mxu0 %v9289_v21  ;;  %7259 = vmatpush3.msra.mxu1 %v9293_v22  ;;  %v6135_v21 = vld [vmem:[%s9909_s22 + $0x98] sm:$0xff]  ;;  %v6122_v22 = vld [vmem:[%s9909_s22 + $0x50] sm:$0xff]  ;;  %v6144_v18 = vld [vmem:[%s9911_s23 + $0x88] sm:$0xff] }
 0x2e8   :  { %7222 = vmatprep.subr.mxu0 %v6126_v20  ;;  %7260 = vmatprep.subr.mxu1 %v6138_v23  ;;  %v1827_v15 = vld [vmem:[%s9911_s23 + $0x38] sm:$0xff]  ;;  %v6145_v16 = vld [vmem:[%s9911_s23 + $0x90] sm:$0xff]  ;;  %v1825_v19 = vld [vmem:[%s9911_s23 + $0x28] sm:$0xff] }
 0x2e9   :  { %7223 = vmatpush3.msra.mxu0 %v6126_v20  ;;  %7261 = vmatpush3.msra.mxu1 %v6138_v23  ;;  %v1826_v17 = vld [vmem:[%s9911_s23 + $0x30] sm:$0xff]  ;;  %v6143_v20 = vld [vmem:[%s9911_s23 + $0x80] sm:$0xff] }
 0x2ea   :  { %7224 = vmatprep.subr.mxu0 %v6125_v24  ;;  %7262 = vmatprep.subr.mxu1 %v6137_v25  ;;  %v1824_v23 = vld [vmem:[%s9911_s23 + $0x20] sm:$0xff] }
 0x2eb   :  { %7225 = vmatpush3.msra.mxu0 %v6125_v24  ;;  %7263 = vmatpush3.msra.mxu1 %v6137_v25  ;;  %v1823_v24 = vld [vmem:[%s9911_s23 + $0x18] sm:$0xff] }
 0x2ec   :  { %7226 = vmatprep.subr.mxu0 %v6124_v26  ;;  %7264 = vmatprep.subr.mxu1 %v6136_v27  ;;  %v6174_v25 = vld [vmem:[%s9911_s23 + $0x178] sm:$0xff] }
 0x2ed   :  { %7227 = vmatpush3.msra.mxu0 %v6124_v26  ;;  %7265 = vmatpush3.msra.mxu1 %v6136_v27  ;;  %v1822_v26 = vld [vmem:[%s9911_s23 + $0x10] sm:$0xff]  ;;  %v1821_v27 = vld [vmem:[%s9911_s23 + $0x8] sm:$0xff] }
 0x2ee   :  { %7228 = vmatprep.subr.mxu0 %v6123_v28  ;;  %7266 = vmatprep.subr.mxu1 %v6135_v21 }
 0x2ef   :  { %7229 = vmatpush3.msra.mxu0 %v6123_v28  ;;  %7267 = vmatpush3.msra.mxu1 %v6135_v21  ;;  %v1820_v28 = vld [vmem:[%s9911_s23] sm:$0xff] }
 0x2f0   :  { %7230 = vmatprep.subr.mxu0 %v6122_v22  ;;  %7268 = vmatprep.subr.mxu1 %v6134_v29 }
 0x2f1   :  { %7231 = vmatpush3.msra.mxu0 %v6122_v22  ;;  %7269 = vmatpush3.msra.mxu1 %v6134_v29 }
 0x2f2   :  { %7232 = vmatprep.subr.mxu0 %v6121_v30  ;;  %7270 = vmatprep.subr.mxu1 %v6133_v31 }
 0x2f3   :  { %7233 = vmatpush3.msra.mxu0 %v6121_v30  ;;  %7271 = vmatpush3.msra.mxu1 %v6133_v31 }
 0x2f4   :  { %7234 = vmatprep.subr.mxu0 %v6120_v32  ;;  %7272 = vmatprep.subr.mxu1 %v6132_v33 }
 0x2f5   :  { %7235 = vmatpush3.msra.mxu0 %v6120_v32  ;;  %7273 = vmatpush3.msra.mxu1 %v6132_v33  ;;  %v6142_v32 = vld [vmem:[%s9912_s9] ss:$0 sm:$0xff] }
 0x2f6   :  { %7239 = vmatprep.subr.mxu0 %v1537_v34  ;;  %7312 = vmatprep.subr.mxu1 %v1835_v61 }
 0x3a6   :  { %v7184_v36 = vpop.f32.mrf.mxu0  ;;  %v7219_v37 = vpop.f32.mrf.mxu1 }
 0x3a7   :  { %v1524_v38 = vmax.f32 %v7184_v36, %v7219_v37 }
 0x3a8   :  { %v1423_v39 = vpop.f32.mrf.mxu0  ;;  %v1514_v40 = vpop.f32.mrf.mxu1 }
 0x3a9   :  { %1527 = vst.msk [vmem:[#allocation4 + $0x11] sm:$0xff] %vm1525_vm9, %v1524_v38  ;;  %v1523_v41 = vmax.f32 %v1423_v39, %v1514_v40 }
 0x3ab   :  { %1526 = vst.msk [vmem:[#allocation4 + $0x1] sm:$0xff] %vm1525_vm9, %v1523_v41 }
 0x3b0   :  { %v1539_v45 = vld [vmem:[#allocation4 + $0x11] sm:$0xff] }
 0x3b1   :  { %v1712_v46 = vld [vmem:[#allocation4 + $0x12] sm:$0xff] }
 0x3b2   :  { %v1538_v42 = vld [vmem:[#allocation4 + $0x1] sm:$0xff]  ;;  %v1529_v55 = vld [vmem:[#allocation4 + $0x10] sm:$0xff] }
 0x3b3   :  { %v1711_v43 = vld [vmem:[#allocation4 + $0x2] sm:$0xff]  ;;  %7236 = vmatprep.mubr.msk.f32.mxu0 %vm1525_vm9, %v1538_v42 }
 0x3b4   :  { %7274 = vmatprep.mubr.msk.f32.mxu1 %vm1525_vm9, %v1711_v43  ;;  %7237 = vmatmul.mubr.msk.f32.vlgmr.msra.gmra.mxu0 %vm1525_vm9, %v1539_v45  ;;  %v1528_v48 = vld [vmem:[#allocation4] sm:$0xff]  ;;  %v6173_v43 = vld [vmem:[%s9911_s23 + $0x170] sm:$0xff]  ;;  %v6172_v45 = vld [vmem:[%s9911_s23 + $0x168] sm:$0xff] }
 0x3b5   :  { %7275 = vmatmul.mubr.msk.f32.vlgmr.msra.gmra.mxu1 %vm1525_vm9, %v1712_v46  ;;  %7240 = vmatpush3.msra.mxu0 %v1537_v34  ;;  %v6171_v46 = vld [vmem:[%s9911_s23 + $0x160] sm:$0xff] }
 0x3b6   :  { %7255 = vmatprep.mubr.msk.f32.mxu0 %vm1525_vm9, %v1528_v48  ;;  %7241 = vmatprep.subr.mxu0 %v1536_v47 }
 0x3b7   :  { %7242 = vmatpush3.msra.mxu0 %v1536_v47  ;;  %7313 = vmatpush3.msra.mxu1 %v1835_v61  ;;  %v6161_v61 = vld [vmem:[%s9911_s23 + $0x110] sm:$0xff] }
 0x3b8   :  { %7243 = vmatprep.subr.mxu0 %v1535_v49  ;;  %7314 = vmatprep.subr.mxu1 %v1834_v62 }
 0x3b9   :  { %7244 = vmatpush3.msra.mxu0 %v1535_v49  ;;  %7315 = vmatpush3.msra.mxu1 %v1834_v62  ;;  %v6170_v49 = vld [vmem:[%s9911_s23 + $0x158] sm:$0xff]  ;;  %v6160_v62 = vld [vmem:[%s9911_s23 + $0x108] sm:$0xff] }
 0x3ba   :  { %7245 = vmatprep.subr.mxu0 %v1534_v50  ;;  %7316 = vmatprep.subr.mxu1 %v1833_v0 }
 0x3bb   :  { %7246 = vmatpush3.msra.mxu0 %v1534_v50  ;;  %7317 = vmatpush3.msra.mxu1 %v1833_v0  ;;  %v2205_v0 = vld [vmem:[%s9913_s27 + $0x78] sm:$0xff] }
 0x3bc   :  { %7247 = vmatprep.subr.mxu0 %v1533_v51  ;;  %7318 = vmatprep.subr.mxu1 %v1832_v3 }
 0x3bd   :  { %7248 = vmatpush3.msra.mxu0 %v1533_v51  ;;  %7319 = vmatpush3.msra.mxu1 %v1832_v3  ;;  %v6169_v51 = vld [vmem:[%s9911_s23 + $0x150] sm:$0xff] }
 0x3be   :  { %7249 = vmatprep.subr.mxu0 %v1532_v52  ;;  %7320 = vmatprep.subr.mxu1 %v1831_v5  ;;  %v2204_v3 = vld [vmem:[%s9913_s27 + $0x70] sm:$0xff] }
 0x3bf   :  { %7250 = vmatpush3.msra.mxu0 %v1532_v52  ;;  %7321 = vmatpush3.msra.mxu1 %v1831_v5  ;;  %v6168_v52 = vld [vmem:[%s9911_s23 + $0x148] sm:$0xff] }
 0x3c0   :  { %7251 = vmatprep.subr.mxu0 %v1531_v53  ;;  %7322 = vmatprep.subr.mxu1 %v1830_v6  ;;  %v2203_v5 = vld [vmem:[%s9913_s27 + $0x68] sm:$0xff] }
 0x3c1   :  { %7252 = vmatpush3.msra.mxu0 %v1531_v53  ;;  %7323 = vmatpush3.msra.mxu1 %v1830_v6  ;;  %v6167_v53 = vld [vmem:[%s9911_s23 + $0x140] sm:$0xff]  ;;  %v2337_v6 = vld [vmem:[%s9914_s30 + $0x68] sm:$0xff] }
 0x3c2   :  { %7253 = vmatprep.subr.mxu0 %v1530_v54  ;;  %7324 = vmatprep.subr.mxu1 %v1829_v11 }
 0x3c3   :  { %7254 = vmatpush3.msra.mxu0 %v1530_v54  ;;  %7325 = vmatpush3.msra.mxu1 %v1829_v11  ;;  %v6166_v54 = vld [vmem:[%s9911_s23 + $0x138] sm:$0xff]  ;;  %v2200_v11 = vld [vmem:[%s9913_s27 + $0x50] sm:$0xff] }
 0x3c4   :  { %7256 = vmatmul.mubr.msk.f32.vlgmr.msra.gmra.mxu0 %vm1525_vm9, %v1529_v55  ;;  %7277 = vmatprep.subr.mxu0 %v6158_v56  ;;  %v6165_v55 = vld [vmem:[%s9911_s23 + $0x130] sm:$0xff] }
 0x3c5   :  { %7278 = vmatpush3.msra.mxu0 %v6158_v56  ;;  %7326 = vmatprep.subr.mxu1 %v1828_v13  ;;  %v6164_v56 = vld [vmem:[%s9911_s23 + $0x128] sm:$0xff] }
 0x3c6   :  { %7279 = vmatprep.subr.mxu0 %v6157_v57  ;;  %7327 = vmatpush3.msra.mxu1 %v1828_v13  ;;  %v2199_v13 = vld [vmem:[%s9913_s27 + $0x48] sm:$0xff] }
 0x3c7   :  { %7280 = vmatpush3.msra.mxu0 %v6157_v57  ;;  %7328 = vmatprep.subr.mxu1 %v1827_v15  ;;  %v6163_v57 = vld [vmem:[%s9911_s23 + $0x120] sm:$0xff] }
 0x3c8   :  { %7281 = vmatprep.subr.mxu0 %v6156_v60  ;;  %7329 = vmatpush3.msra.mxu1 %v1827_v15  ;;  %v2198_v15 = vld [vmem:[%s9913_s27 + $0x40] sm:$0xff] }
 0x3c9   :  { %7282 = vmatpush3.msra.mxu0 %v6156_v60  ;;  %7330 = vmatprep.subr.mxu1 %v1826_v17  ;;  %v6162_v60 = vld [vmem:[%s9911_s23 + $0x118] sm:$0xff] }
 0x3ca   :  { %7283 = vmatprep.subr.mxu0 %v6155_v59  ;;  %7331 = vmatpush3.msra.mxu1 %v1826_v17  ;;  %v2197_v17 = vld [vmem:[%s9913_s27 + $0x38] sm:$0xff] }
 0x3cb   :  { %7284 = vmatpush3.msra.mxu0 %v6155_v59  ;;  %7332 = vmatprep.subr.mxu1 %v1825_v19  ;;  %v6159_v59 = vld [vmem:[%s9911_s23 + $0x100] sm:$0xff] }
 0x3cc   :  { %7285 = vmatprep.subr.mxu0 %v6154_v63  ;;  %7333 = vmatpush3.msra.mxu1 %v1825_v19  ;;  %v2196_v19 = vld [vmem:[%s9913_s27 + $0x30] sm:$0xff] }
 0x3cd   :  { %7286 = vmatpush3.msra.mxu0 %v6154_v63  ;;  %7334 = vmatprep.subr.mxu1 %v1824_v23 }
 0x3ce   :  { %7287 = vmatprep.subr.mxu0 %v6153_v2  ;;  %7335 = vmatpush3.msra.mxu1 %v1824_v23  ;;  %v2195_v23 = vld [vmem:[%s9913_s27 + $0x28] sm:$0xff] }
 0x3cf   :  { %7288 = vmatpush3.msra.mxu0 %v6153_v2  ;;  %7336 = vmatprep.subr.mxu1 %v1823_v24  ;;  %v2339_v2 = vld [vmem:[%s9914_s30 + $0x78] sm:$0xff] }
 0x3d0   :  { %7289 = vmatprep.subr.mxu0 %v6152_v4  ;;  %7337 = vmatpush3.msra.mxu1 %v1823_v24  ;;  %v2329_v24 = vld [vmem:[%s9914_s30 + $0x28] sm:$0xff] }
 0x3d1   :  { %7290 = vmatpush3.msra.mxu0 %v6152_v4  ;;  %7338 = vmatprep.subr.mxu1 %v1822_v26  ;;  %v2338_v4 = vld [vmem:[%s9914_s30 + $0x70] sm:$0xff] }
 0x3d2   :  { %7291 = vmatprep.subr.mxu0 %v6151_v7  ;;  %7339 = vmatpush3.msra.mxu1 %v1822_v26  ;;  %v2328_v26 = vld [vmem:[%s9914_s30 + $0x20] sm:$0xff] }
 0x3d3   :  { %7292 = vmatpush3.msra.mxu0 %v6151_v7  ;;  %7340 = vmatprep.subr.mxu1 %v1821_v27  ;;  %v2202_v7 = vld [vmem:[%s9913_s27 + $0x60] sm:$0xff] }
 0x3d4   :  { %7293 = vmatprep.subr.mxu0 %v6150_v8  ;;  %7341 = vmatpush3.msra.mxu1 %v1821_v27  ;;  %v2193_v27 = vld [vmem:[%s9913_s27 + $0x18] sm:$0xff] }
 0x3d5   :  { %7294 = vmatpush3.msra.mxu0 %v6150_v8  ;;  %7342 = vmatprep.subr.mxu1 %v1820_v28  ;;  %v2336_v8 = vld [vmem:[%s9914_s30 + $0x60] sm:$0xff] }
 0x3d6   :  { %7295 = vmatprep.subr.mxu0 %v6149_v9  ;;  %7343 = vmatpush3.msra.mxu1 %v1820_v28  ;;  %v2327_v28 = vld [vmem:[%s9914_s30 + $0x18] sm:$0xff] }
 0x3d7   :  { %7296 = vmatpush3.msra.mxu0 %v6149_v9  ;;  %7382 = vmatprep.subr.mxu1 %v8921_v58  ;;  %v2201_v9 = vld [vmem:[%s9913_s27 + $0x58] sm:$0xff] }
 0x3d8   :  { %7297 = vmatprep.subr.mxu0 %v6148_v10 }
 0x3d9   :  { %7298 = vmatpush3.msra.mxu0 %v6148_v10  ;;  %v2335_v10 = vld [vmem:[%s9914_s30 + $0x58] sm:$0xff] }
 0x3da   :  { %7299 = vmatprep.subr.mxu0 %v6147_v12 }
 0x3db   :  { %7300 = vmatpush3.msra.mxu0 %v6147_v12  ;;  %v2334_v12 = vld [vmem:[%s9914_s30 + $0x50] sm:$0xff] }
 0x3dc   :  { %7301 = vmatprep.subr.mxu0 %v6146_v14 }
 0x3dd   :  { %7302 = vmatpush3.msra.mxu0 %v6146_v14  ;;  %v2333_v14 = vld [vmem:[%s9914_s30 + $0x48] sm:$0xff] }
 0x3de   :  { %7303 = vmatprep.subr.mxu0 %v6145_v16 }
 0x3df   :  { %7304 = vmatpush3.msra.mxu0 %v6145_v16  ;;  %v2332_v16 = vld [vmem:[%s9914_s30 + $0x40] sm:$0xff] }
 0x3e0   :  { %7305 = vmatprep.subr.mxu0 %v6144_v18 }
 0x3e1   :  { %7306 = vmatpush3.msra.mxu0 %v6144_v18  ;;  %v2331_v18 = vld [vmem:[%s9914_s30 + $0x38] sm:$0xff] }
 0x3e2   :  { %7307 = vmatprep.subr.mxu0 %v6143_v20 }
 0x3e3   :  { %7308 = vmatpush3.msra.mxu0 %v6143_v20  ;;  %v2330_v20 = vld [vmem:[%s9914_s30 + $0x30] sm:$0xff] }
 0x3e4   :  { %7347 = vmatprep.subr.mxu0 %v6174_v25 }
 0x474   :  { %v7238_v21 = vpop.f32.mrf.mxu0 }
 0x475   :  { %v7276_v29 = vpop.f32.mrf.mxu1 }
 0x476   :  { %v1621_v22 = vpop.f32.mrf.mxu0 }
 0x477   :  { %v1794_v37 = vpop.f32.mrf.mxu1 }
 0x484   :  { %v7257_v30 = vpop.f32.mrf.mxu0 }
 0x485   :  { %v1708_v31 = vadd.f32 %v7257_v30, %v7238_v21  ;;  %v2192_v21 = vld [vmem:[%s9913_s27 + $0x10] sm:$0xff]  ;;  %v2325_v30 = vld [vmem:[%s9914_s30 + $0x8] sm:$0xff] }
 0x486   :  { %v1702_v33 = vpop.f32.mrf.mxu0 }
 0x487   :  { %v1804_v34 = vadd.f32 %v7276_v29, %v1708_v31  ;;  %v1703_v36 = vadd.f32 %v1702_v33, %v1621_v22  ;;  %v2326_v22 = vld [vmem:[%s9914_s30 + $0x10] sm:$0xff]  ;;  %v2191_v29 = vld [vmem:[%s9913_s27 + $0x8] sm:$0xff]  ;;  %v2190_v31 = vld [vmem:[%s9913_s27] sm:$0xff] }
 0x489   :  { %v1813_v38 = vadd.f32 %v6142_v32, %v1804_v34  ;;  %v1803_v39 = vadd.f32 %v1794_v37, %v1703_v36 }
 0x48b   :  { %v1815_v40 = vmax.f32 %v1813_v38, 0.0  ;;  %v1812_v41 = vadd.f32 %v6142_v32, %v1803_v39  ;;  %v2324_v32 = vld [vmem:[%s9914_s30] sm:$0xff] }
 0x48d   :  { %1817 = vst [vmem:[#allocation5 + $0x11] sm:$0xff] %v1815_v40  ;;  %v1814_v42 = vmax.f32 %v1812_v41, 0.0 }
 0x48f   :  { %1816 = vst [vmem:[#allocation5 + $0x1] sm:$0xff] %v1814_v42  ;;  %7309 = vmatprep.mubr.f32.mxu0 %v1814_v42 }
 0x490   :  { %7310 = vmatmul.mubr.f32.vlgmr.msra.gmra.mxu0 %v1815_v40  ;;  %v6175_v40 = vld [vmem:[%s9915_s26] ss:$0 sm:$0xff] }
 0x491   :  { %7348 = vmatpush3.msra.mxu0 %v6174_v25  ;;  %v2194_v25 = vld [vmem:[%s9913_s27 + $0x20] sm:$0xff] }
 0x492   :  { %7349 = vmatprep.subr.mxu0 %v6173_v43 }
 0x493   :  { %7350 = vmatpush3.msra.mxu0 %v6173_v43 }
 0x494   :  { %7351 = vmatprep.subr.mxu0 %v6172_v45  ;;  %v1819_v50 = vld [vmem:[#allocation5 + $0x10] sm:$0xff] }
 0x495   :  { %7352 = vmatpush3.msra.mxu0 %v6172_v45  ;;  %v2006_v63 = vld [vmem:[#allocation5 + $0x12] sm:$0xff] }
 0x496   :  { %v1818_v47 = vld [vmem:[#allocation5] sm:$0xff]  ;;  %7353 = vmatprep.subr.mxu0 %v6171_v46 }
 0x497   :  { %v2005_v48 = vld [vmem:[#allocation5 + $0x2] sm:$0xff]  ;;  %7344 = vmatprep.mubr.f32.mxu1 %v1818_v47  ;;  %7354 = vmatpush3.msra.mxu0 %v6171_v46 }
 0x498   :  { %7379 = vmatprep.mubr.f32.mxu0 %v2005_v48  ;;  %7345 = vmatmul.mubr.f32.vlgmr.msra.gmra.mxu1 %v1819_v50 }
 0x499   :  { %7355 = vmatprep.subr.mxu0 %v6170_v49  ;;  %7383 = vmatpush3.msra.mxu1 %v2205_v0 }
 0x49a   :  { %7356 = vmatpush3.msra.mxu0 %v6170_v49  ;;  %7384 = vmatprep.subr.mxu1 %v8921_v58 }
 0x49b   :  { %7357 = vmatprep.subr.mxu0 %v6169_v51  ;;  %7385 = vmatpush3.msra.mxu1 %v2204_v3 }
 0x49c   :  { %7358 = vmatpush3.msra.mxu0 %v6169_v51  ;;  %7386 = vmatprep.subr.mxu1 %v8921_v58 }
 0x49d   :  { %7359 = vmatprep.subr.mxu0 %v6168_v52  ;;  %7387 = vmatpush3.msra.mxu1 %v2203_v5 }
 0x49e   :  { %7360 = vmatpush3.msra.mxu0 %v6168_v52  ;;  %7388 = vmatprep.subr.mxu1 %v8921_v58 }
 0x49f   :  { %7361 = vmatprep.subr.mxu0 %v6167_v53  ;;  %7389 = vmatpush3.msra.mxu1 %v2202_v7 }
 0x4a0   :  { %7362 = vmatpush3.msra.mxu0 %v6167_v53  ;;  %7390 = vmatprep.subr.mxu1 %v8921_v58 }
 0x4a1   :  { %7363 = vmatprep.subr.mxu0 %v6166_v54  ;;  %7391 = vmatpush3.msra.mxu1 %v2201_v9 }
 0x4a2   :  { %7364 = vmatpush3.msra.mxu0 %v6166_v54  ;;  %7392 = vmatprep.subr.mxu1 %v8921_v58 }
 0x4a3   :  { %7365 = vmatprep.subr.mxu0 %v6165_v55  ;;  %7393 = vmatpush3.msra.mxu1 %v2200_v11 }
 0x4a4   :  { %7366 = vmatpush3.msra.mxu0 %v6165_v55  ;;  %7394 = vmatprep.subr.mxu1 %v8921_v58 }
 0x4a5   :  { %7367 = vmatprep.subr.mxu0 %v6164_v56  ;;  %7395 = vmatpush3.msra.mxu1 %v2199_v13 }
 0x4a6   :  { %7368 = vmatpush3.msra.mxu0 %v6164_v56  ;;  %7396 = vmatprep.subr.mxu1 %v8921_v58 }
 0x4a7   :  { %7369 = vmatprep.subr.mxu0 %v6163_v57  ;;  %7397 = vmatpush3.msra.mxu1 %v2198_v15 }
 0x4a8   :  { %7370 = vmatpush3.msra.mxu0 %v6163_v57  ;;  %7398 = vmatprep.subr.mxu1 %v8921_v58 }
 0x4a9   :  { %7371 = vmatprep.subr.mxu0 %v6162_v60  ;;  %7399 = vmatpush3.msra.mxu1 %v2197_v17 }
 0x4aa   :  { %7372 = vmatpush3.msra.mxu0 %v6162_v60  ;;  %7400 = vmatprep.subr.mxu1 %v8921_v58 }
 0x4ab   :  { %7373 = vmatprep.subr.mxu0 %v6161_v61  ;;  %7401 = vmatpush3.msra.mxu1 %v2196_v19 }
 0x4ac   :  { %7374 = vmatpush3.msra.mxu0 %v6161_v61  ;;  %7402 = vmatprep.subr.mxu1 %v8921_v58 }
 0x4ad   :  { %7375 = vmatprep.subr.mxu0 %v6160_v62  ;;  %7403 = vmatpush3.msra.mxu1 %v2195_v23 }
 0x4ae   :  { %7376 = vmatpush3.msra.mxu0 %v6160_v62  ;;  %7404 = vmatprep.subr.mxu1 %v8921_v58 }
 0x4af   :  { %7377 = vmatprep.subr.mxu0 %v6159_v59  ;;  %7405 = vmatpush3.msra.mxu1 %v2194_v25 }
 0x4b0   :  { %7378 = vmatpush3.msra.mxu0 %v6159_v59  ;;  %7406 = vmatprep.subr.mxu1 %v8921_v58 }
 0x4b1   :  { %7380 = vmatmul.mubr.f32.vlgmr.msra.gmra.mxu0 %v2006_v63  ;;  %7417 = vmatprep.subr.mxu0 %v8921_v58 }
 0x4b2   :  { %7418 = vmatpush3.msra.mxu0 %v2339_v2  ;;  %7407 = vmatpush3.msra.mxu1 %v2193_v27 }
 0x4b3   :  { %7419 = vmatprep.subr.mxu0 %v8921_v58  ;;  %7408 = vmatprep.subr.mxu1 %v8921_v58 }
 0x4b4   :  { %7420 = vmatpush3.msra.mxu0 %v2338_v4  ;;  %7409 = vmatpush3.msra.mxu1 %v2192_v21 }
 0x4b5   :  { %7421 = vmatprep.subr.mxu0 %v8921_v58  ;;  %7410 = vmatprep.subr.mxu1 %v8921_v58 }
 0x4b6   :  { %7422 = vmatpush3.msra.mxu0 %v2337_v6  ;;  %7411 = vmatpush3.msra.mxu1 %v2191_v29 }
 0x4b7   :  { %7423 = vmatprep.subr.mxu0 %v8921_v58  ;;  %7412 = vmatprep.subr.mxu1 %v8921_v58 }
 0x4b8   :  { %7424 = vmatpush3.msra.mxu0 %v2336_v8  ;;  %7413 = vmatpush3.msra.mxu1 %v2190_v31  ;;  %v2436_v31 = vld [vmem:[#allocation15 + $0x70] sm:$0xff] }
 0x4b9   :  { %7425 = vmatprep.subr.mxu0 %v8921_v58  ;;  %7414 = vmatprep.mubr.msk.f32.mxu1 %vm8923_vm10, %v8921_v58 }
 0x4ba   :  { %7426 = vmatpush3.msra.mxu0 %v2335_v10  ;;  %7449 = vmatprep.mubr.msk.f32.mxu0 %vm8923_vm10, %v8921_v58 }
 0x4bb   :  { %7427 = vmatprep.subr.mxu0 %v8921_v58  ;;  %7452 = vmatprep.subr.mxu1 %v8921_v58 }
 0x4bc   :  { %7428 = vmatpush3.msra.mxu0 %v2334_v12 }
 0x4bd   :  { %7429 = vmatprep.subr.mxu0 %v8921_v58 }
 0x4be   :  { %7430 = vmatpush3.msra.mxu0 %v2333_v14 }
 0x4bf   :  { %7431 = vmatprep.subr.mxu0 %v8921_v58 }
 0x4c0   :  { %7432 = vmatpush3.msra.mxu0 %v2332_v16 }
 0x4c1   :  { %7433 = vmatprep.subr.mxu0 %v8921_v58 }
 0x4c2   :  { %7434 = vmatpush3.msra.mxu0 %v2331_v18 }
 0x4c3   :  { %7435 = vmatprep.subr.mxu0 %v8921_v58 }
 0x4c4   :  { %7436 = vmatpush3.msra.mxu0 %v2330_v20 }
 0x4c5   :  { %7437 = vmatprep.subr.mxu0 %v8921_v58 }
 0x4c6   :  { %7438 = vmatpush3.msra.mxu0 %v2329_v24 }
 0x4c7   :  { %7439 = vmatprep.subr.mxu0 %v8921_v58 }
 0x4c8   :  { %7440 = vmatpush3.msra.mxu0 %v2328_v26 }
 0x4c9   :  { %7441 = vmatprep.subr.mxu0 %v8921_v58 }
 0x4ca   :  { %7442 = vmatpush3.msra.mxu0 %v2327_v28 }
 0x4cb   :  { %7443 = vmatprep.subr.mxu0 %v8921_v58 }
 0x4cc   :  { %7444 = vmatpush3.msra.mxu0 %v2326_v22  ;;  %v2437_v22 = vld [vmem:[#allocation15 + $0x78] sm:$0xff] }
 0x4cd   :  { %7445 = vmatprep.subr.mxu0 %v8921_v58 }
 0x4ce   :  { %7446 = vmatpush3.msra.mxu0 %v2325_v30  ;;  %v2598_v30 = vld [vmem:[#allocation15 + $0xb8] sm:$0xff] }
 0x4cf   :  { %7447 = vmatprep.subr.mxu0 %v8921_v58 }
 0x4d0   :  { %7448 = vmatpush3.msra.mxu0 %v2324_v32  ;;  %v2597_v32 = vld [vmem:[#allocation15 + $0xb0] sm:$0xff] }
 0x4d1   :  { %7490 = vmatprep.subr.mxu0 %v8921_v58 }
 0x550   :  { %v7311_v33 = vpop.f32.mrf.mxu0 }
 0x552   :  { %v1921_v36 = vpop.f32.mrf.mxu0 }
 0x558   :  { %v7346_v34 = vpop.f32.mrf.mxu1 }
 0x559   :  { %v2002_v38 = vadd.f32 %v7346_v34, %v7311_v33  ;;  %v2435_v33 = vld [vmem:[#allocation15 + $0x68] sm:$0xff] }
 0x55a   :  { %v1996_v37 = vpop.f32.mrf.mxu1  ;;  %v2596_v34 = vld [vmem:[#allocation15 + $0xa8] sm:$0xff] }
 0x55b   :  { %v1997_v41 = vadd.f32 %v1996_v37, %v1921_v36  ;;  %v2434_v36 = vld [vmem:[#allocation15 + $0x60] sm:$0xff] }
 0x55c   :  { %v2595_v37 = vld [vmem:[#allocation15 + $0xa0] sm:$0xff] }
 0x571   :  { %v7381_v39 = vpop.f32.mrf.mxu0 }
 0x572   :  { %v2100_v42 = vadd.f32 %v7381_v39, %v2002_v38  ;;  %v2433_v38 = vld [vmem:[#allocation15 + $0x58] sm:$0xff] }
 0x573   :  { %v2090_v43 = vpop.f32.mrf.mxu0  ;;  %v2594_v39 = vld [vmem:[#allocation15 + $0x98] sm:$0xff] }
 0x574   :  { %v2109_v45 = vadd.f32 %v6175_v40, %v2100_v42  ;;  %v2099_v46 = vadd.f32 %v2090_v43, %v1997_v41  ;;  %v2593_v41 = vld [vmem:[#allocation15 + $0x90] sm:$0xff]  ;;  %v2431_v42 = vld [vmem:[#allocation15 + $0x48] sm:$0xff] }
 0x575   :  { %v2592_v43 = vld [vmem:[#allocation15 + $0x88] sm:$0xff] }
 0x576   :  { %v2111_v47 = vmax.f32 %v2109_v45, 0.0  ;;  %v2108_v48 = vadd.f32 %v6175_v40, %v2099_v46  ;;  %v2432_v40 = vld [vmem:[#allocation15 + $0x50] sm:$0xff]  ;;  %v2430_v45 = vld [vmem:[#allocation15 + $0x40] sm:$0xff] }
 0x577   :  { %v2591_v46 = vld [vmem:[#allocation15 + $0x80] sm:$0xff] }
 0x578   :  { %2113 = vst [vmem:[#allocation6 + $0x11] sm:$0xff] %v2111_v47  ;;  %v2133_v49 = vcombine.high %v2111_v47, %v2111_v47  ;;  %v2140_v50 = vrot.slane %v2111_v47, %v9300_v44  ;;  %v2110_v51 = vmax.f32 %v2108_v48, 0.0 }
 0x57a   :  { %v2147_v52 = vrot.slane %v2133_v49, %v9300_v44  ;;  %2112 = vst [vmem:[#allocation6 + $0x1] sm:$0xff] %v2110_v51  ;;  %v2116_v53 = vcombine.high %v2110_v51, %v2110_v51  ;;  %v2148_v54 = vcombine.high %v2140_v50, %v2140_v50  ;;  %v2123_v55 = vrot.slane %v2110_v51, %v9300_v44 }
 0x57b   :  { %v6180_v62 = vrot.slane %v2140_v50, 9 }
 0x57c   :  { %v2130_v56 = vrot.slane %v2116_v53, %v9300_v44  ;;  %v2131_v57 = vcombine.high %v2123_v55, %v2123_v55  ;;  %v6176_v60 = vrot.slane %v2123_v55, 9  ;;  %v2149_v61 = vcombine.high %v2147_v52, %v2147_v52  ;;  %v2426_v53 = vld [vmem:[#allocation15 + $0x38] sm:$0xff] }
 0x57d   :  { %v6181_v0 = vrot.slane %v2148_v54, 9  ;;  %v6182_v4 = vrot.slane %v2147_v52, 9  ;;  %v2186_v9 = vmax.f32 %v2140_v50, %v6180_v62  ;;  %v2421_v62 = vld [vmem:[#allocation15 + $0x10] sm:$0xff] }
 0x57e   :  { %v2132_v59 = vcombine.high %v2130_v56, %v2130_v56  ;;  %v6178_v63 = vrot.slane %v2130_v56, 9  ;;  %v6177_v2 = vrot.slane %v2131_v57, 9  ;;  %v2182_v3 = vmax.f32 %v2123_v55, %v6176_v60  ;;  %v2423_v60 = vld [vmem:[#allocation15 + $0x20] sm:$0xff] }
 0x57f   :  { %v6183_v8 = vrot.slane %v2149_v61, 9  ;;  %v2187_v12 = vmax.f32 %v2148_v54, %v6181_v0  ;;  %v2188_v15 = vmax.f32 %v2147_v52, %v6182_v4  ;;  %v2233_v19 = vrot.slane %v2186_v9, %v9307_v1  ;;  %v6202_v4 = vld [vmem:[%s9916_s28 + $0xf0] sm:$0xff]  ;;  %v2703_v9 = vld [vmem:[%s9916_s28 + $0x60] sm:$0xff] }
 0x580   :  { %v6179_v5 = vrot.slane %v2132_v59, 9  ;;  %v2184_v6 = vmax.f32 %v2130_v56, %v6178_v63  ;;  %v2183_v7 = vmax.f32 %v2131_v57, %v6177_v2  ;;  %v2217_v13 = vrot.slane %v2182_v3, %v9307_v1  ;;  %v2425_v56 = vld [vmem:[#allocation15 + $0x30] sm:$0xff]  ;;  %v2424_v57 = vld [vmem:[#allocation15 + $0x28] sm:$0xff]  ;;  %v2419_v63 = vld [vmem:[#allocation15] sm:$0xff] }
 0x581   :  { %v2189_v17 = vmax.f32 %v2149_v61, %v6183_v8  ;;  %v2237_v23 = vrot.slane %v2187_v12, %v9307_v1  ;;  %v2241_v25 = vrot.slane %v2188_v15, %v9307_v1  ;;  %v2422_v61 = vld [vmem:[#allocation15 + $0x18] sm:$0xff]  ;;  %v6203_v2 = vld [vmem:[%s9916_s28 + $0xf8] sm:$0xff]  ;;  %v6200_v8 = vld [vmem:[%s9916_s28 + $0xe0] sm:$0xff] }
 0x582   :  { %v2185_v10 = vmax.f32 %v2132_v59, %v6179_v5  ;;  %v2225_v11 = vrot.slane %v2184_v6, %v9307_v1  ;;  %v2221_v14 = vrot.slane %v2183_v7, %v9307_v1  ;;  %v2420_v59 = vld [vmem:[#allocation15 + $0x8] sm:$0xff]  ;;  %v2705_v5 = vld [vmem:[%s9916_s28 + $0x70] sm:$0xff]  ;;  %v6201_v6 = vld [vmem:[%s9916_s28 + $0xe8] sm:$0xff] }
 0x583   :  { %v2245_v27 = vrot.slane %v2189_v17, %v9307_v1  ;;  %v2706_v3 = vld [vmem:[%s9916_s28 + $0x78] sm:$0xff]  ;;  %v2704_v7 = vld [vmem:[%s9916_s28 + $0x68] sm:$0xff]  ;;  %v6198_v12 = vld [vmem:[%s9916_s28 + $0xd0] sm:$0xff] }
 0x584   :  { %v2229_v16 = vrot.slane %v2185_v10, %v9307_v1  ;;  %v2246_v18 = vsel %vm1334_vm1, %v2221_v14, %v2217_v13  ;;  %v6199_v10 = vld [vmem:[%s9916_s28 + $0xd8] sm:$0xff]  ;;  %v2701_v13 = vld [vmem:[%s9916_s28 + $0x50] sm:$0xff]  ;;  %v6197_v14 = vld [vmem:[%s9916_s28 + $0xc8] sm:$0xff] }
 0x585   :  { %v2247_v20 = vsel %vm1336_vm2, %v2225_v11, %v2246_v18  ;;  %v2702_v11 = vld [vmem:[%s9916_s28 + $0x58] sm:$0xff]  ;;  %v2700_v15 = vld [vmem:[%s9916_s28 + $0x48] sm:$0xff]  ;;  %v2699_v17 = vld [vmem:[%s9916_s28 + $0x40] sm:$0xff] }
 0x586   :  { %v2248_v24 = vsel %vm1338_vm3, %v2229_v16, %v2247_v20  ;;  %v6196_v16 = vld [vmem:[%s9916_s28 + $0xc0] sm:$0xff]  ;;  %v6195_v18 = vld [vmem:[%s9916_s28 + $0xb8] sm:$0xff]  ;;  %v6194_v20 = vld [vmem:[%s9916_s28 + $0xb0] sm:$0xff] }
 0x587   :  { %v2249_v26 = vsel %vm1340_vm4, %v2233_v19, %v2248_v24  ;;  %v2698_v19 = vld [vmem:[%s9916_s28 + $0x38] sm:$0xff]  ;;  %v6193_v24 = vld [vmem:[%s9916_s28 + $0xa8] sm:$0xff] }
 0x588   :  { %v2250_v28 = vsel %vm1342_vm5, %v2237_v23, %v2249_v26  ;;  %v2697_v23 = vld [vmem:[%s9916_s28 + $0x30] sm:$0xff]  ;;  %v6192_v26 = vld [vmem:[%s9916_s28 + $0xa0] sm:$0xff] }
 0x589   :  { %v2251_v21 = vsel %vm1344_vm6, %v2241_v25, %v2250_v28  ;;  %v2696_v25 = vld [vmem:[%s9916_s28 + $0x28] sm:$0xff]  ;;  %v6191_v28 = vld [vmem:[%s9916_s28 + $0x98] sm:$0xff] }
 0x58a   :  { %v2252_v29 = vsel %vm1346_vm7, %v2245_v27, %v2251_v21  ;;  %v2695_v27 = vld [vmem:[%s9916_s28 + $0x20] sm:$0xff]  ;;  %v2694_v21 = vld [vmem:[%s9916_s28 + $0x18] sm:$0xff] }
 0x58b   :  { %7415 = vmatmul.mubr.f32.vlgmr.msra.gmra.mxu1 %v2252_v29  ;;  %7450 = vmatmul.mubr.f32.vlgmr.msra.gmra.mxu0 %v2252_v29  ;;  %v2693_v29 = vld [vmem:[%s9916_s28 + $0x10] sm:$0xff] }
 0x58c   :  { %7453 = vmatpush3.msra.mxu1 %v2437_v22  ;;  %7468 = vmatprep.mubr.msk.f32.mxu1 %vm8923_vm10, %v8921_v58  ;;  %v6190_v22 = vld [vmem:[%s9916_s28 + $0x90] sm:$0xff] }
 0x58d   :  { %7454 = vmatprep.subr.mxu1 %v8921_v58  ;;  %7506 = vmatprep.mubr.msk.f32.mxu0 %vm8923_vm10, %v8921_v58 }
 0x58e   :  { %7491 = vmatpush3.msra.mxu0 %v2598_v30  ;;  %7455 = vmatpush3.msra.mxu1 %v2436_v31  ;;  %v6189_v30 = vld [vmem:[%s9916_s28 + $0x88] sm:$0xff] }
 0x58f   :  { %7492 = vmatprep.subr.mxu0 %v8921_v58  ;;  %7456 = vmatprep.subr.mxu1 %v8921_v58  ;;  %v2692_v31 = vld [vmem:[%s9916_s28 + $0x8] sm:$0xff] }
 0x590   :  { %7493 = vmatpush3.msra.mxu0 %v2597_v32  ;;  %7457 = vmatpush3.msra.mxu1 %v2435_v33  ;;  %v6188_v32 = vld [vmem:[%s9916_s28 + $0x80] sm:$0xff] }
 0x591   :  { %7494 = vmatprep.subr.mxu0 %v8921_v58  ;;  %7458 = vmatprep.subr.mxu1 %v8921_v58  ;;  %v2691_v33 = vld [vmem:[%s9916_s28] sm:$0xff] }
 0x592   :  { %7495 = vmatpush3.msra.mxu0 %v2596_v34  ;;  %7459 = vmatpush3.msra.mxu1 %v2434_v36 }
 0x593   :  { %7496 = vmatprep.subr.mxu0 %v8921_v58  ;;  %7460 = vmatprep.subr.mxu1 %v8921_v58 }
 0x594   :  { %7497 = vmatpush3.msra.mxu0 %v2595_v37  ;;  %7461 = vmatpush3.msra.mxu1 %v2433_v38 }
 0x595   :  { %7498 = vmatprep.subr.mxu0 %v8921_v58  ;;  %7462 = vmatprep.subr.mxu1 %v8921_v58 }
 0x596   :  { %7499 = vmatpush3.msra.mxu0 %v2594_v39  ;;  %7463 = vmatpush3.msra.mxu1 %v2432_v40 }
 0x597   :  { %7500 = vmatprep.subr.mxu0 %v8921_v58  ;;  %7464 = vmatprep.subr.mxu1 %v8921_v58 }
 0x598   :  { %7501 = vmatpush3.msra.mxu0 %v2593_v41  ;;  %7465 = vmatpush3.msra.mxu1 %v2431_v42  ;;  %v6187_v41 = vld [vmem:[%s9917_s1] ss:$0 sm:$0xff] }
 0x599   :  { %7502 = vmatprep.subr.mxu0 %v8921_v58  ;;  %7466 = vmatprep.subr.mxu1 %v8921_v58 }
 0x59a   :  { %7503 = vmatpush3.msra.mxu0 %v2592_v43  ;;  %7467 = vmatpush3.msra.mxu1 %v2430_v45 }
 0x59b   :  { %7504 = vmatprep.subr.mxu0 %v8921_v58  ;;  %7471 = vmatprep.subr.mxu1 %v8921_v58 }
 0x59c   :  { %7505 = vmatpush3.msra.mxu0 %v2591_v46 }
 0x59d   :  { %7544 = vmatprep.subr.mxu0 %v8921_v58 }
 0x64b   :  { %v2320_v47 = vpop.f32.mrf.mxu1  ;;  %v2406_v48 = vpop.f32.mrf.mxu0 }
 0x64c   :  { %v2410_v49 = vmax.f32 %v2320_v47, %v2406_v48  ;;  %v6219_v48 = vld [vmem:[%s9916_s28 + $0x178] sm:$0xff] }
 0x64d   :  { %v7416_v50 = vpop.f32.mrf.mxu1  ;;  %v7451_v51 = vpop.f32.mrf.mxu0 }
 0x64e   :  { %v2412_v52 = vcombine.high %v2410_v49, %v2410_v49  ;;  %2415 = vst.msk [vmem:[#allocation7 + $0x1] sm:$0xf] %vm2414_vm11, %v2410_v49  ;;  %v6218_v51 = vld [vmem:[%s9916_s28 + $0x170] sm:$0xff] }
 0x650   :  { %2416 = vst.msk [vmem:[#allocation7 + $0x9] sm:$0xf] %vm2414_vm11, %v2412_v52  ;;  %v6217_v52 = vld [vmem:[%s9916_s28 + $0x168] sm:$0xff] }
 0x657   :  { %v8505_v54 = vld [vmem:[#allocation7 + $0x1] ss:$8 sps:$4 sm:$0xff]  }
 0x658   :  { %v8506_v55 = vld [vmem:[#allocation7 + $0x2] ss:$8 sps:$4 sm:$0xff]   ;;  %7469 = vmatmul.mubr.msk.f32.vlgmr.msra.gmra.mxu1 %vm1525_vm9, %v8505_v54  ;;  %v6215_v54 = vld [vmem:[%s9916_s28 + $0x158] sm:$0xff] }
 0x659   :  { %7472 = vmatpush3.msra.mxu1 %v2426_v53  ;;  %7507 = vmatmul.mubr.msk.f32.vlgmr.msra.gmra.mxu0 %vm1525_vm9, %v8506_v55  ;;  %v8507_v0 = vld [vmem:[#allocation7] ss:$8 sps:$4 sm:$0xff]   ;;  %v6214_v55 = vld [vmem:[%s9916_s28 + $0x150] sm:$0xff] }
 0x65a   :  { %7473 = vmatprep.subr.mxu1 %v8921_v58  ;;  %7487 = vmatprep.mubr.msk.f32.mxu1 %vm8923_vm10, %v8921_v58  ;;  %v6216_v53 = vld [vmem:[%s9916_s28 + $0x160] sm:$0xff] }
 0x65b   :  { %7474 = vmatpush3.msra.mxu1 %v2425_v56  ;;  %7576 = vmatprep.mubr.msk.f32.mxu0 %vm8923_vm10, %v8921_v58  ;;  %v6213_v56 = vld [vmem:[%s9916_s28 + $0x148] sm:$0xff] }
 0x65c   :  { %7475 = vmatprep.subr.mxu1 %v8921_v58  ;;  %7545 = vmatpush3.msra.mxu0 %v2706_v3  ;;  %v6204_v3 = vld [vmem:[%s9916_s28 + $0x100] sm:$0xff] }
 0x65d   :  { %7476 = vmatpush3.msra.mxu1 %v2424_v57  ;;  %7546 = vmatprep.subr.mxu0 %v8921_v58  ;;  %v6212_v57 = vld [vmem:[%s9916_s28 + $0x140] sm:$0xff] }
 0x65e   :  { %7477 = vmatprep.subr.mxu1 %v8921_v58  ;;  %7547 = vmatpush3.msra.mxu0 %v2705_v5  ;;  %v2992_v5 = vld [vmem:[#allocation18 + $0x78] sm:$0xff] }
 0x65f   :  { %7478 = vmatpush3.msra.mxu1 %v2423_v60  ;;  %7548 = vmatprep.subr.mxu0 %v8921_v58  ;;  %v6211_v60 = vld [vmem:[%s9916_s28 + $0x138] sm:$0xff] }
 0x660   :  { %7479 = vmatprep.subr.mxu1 %v8921_v58  ;;  %7549 = vmatpush3.msra.mxu0 %v2704_v7  ;;  %v2991_v7 = vld [vmem:[#allocation18 + $0x70] sm:$0xff] }
 0x661   :  { %7480 = vmatpush3.msra.mxu1 %v2422_v61  ;;  %7550 = vmatprep.subr.mxu0 %v8921_v58  ;;  %v6210_v61 = vld [vmem:[%s9916_s28 + $0x130] sm:$0xff] }
 0x662   :  { %7481 = vmatprep.subr.mxu1 %v8921_v58  ;;  %7551 = vmatpush3.msra.mxu0 %v2703_v9  ;;  %v2990_v9 = vld [vmem:[#allocation18 + $0x68] sm:$0xff] }
 0x663   :  { %7482 = vmatpush3.msra.mxu1 %v2421_v62  ;;  %7552 = vmatprep.subr.mxu0 %v8921_v58  ;;  %v6209_v62 = vld [vmem:[%s9916_s28 + $0x128] sm:$0xff] }
 0x664   :  { %7483 = vmatprep.subr.mxu1 %v8921_v58  ;;  %7553 = vmatpush3.msra.mxu0 %v2702_v11  ;;  %v2989_v11 = vld [vmem:[#allocation18 + $0x60] sm:$0xff] }
 0x665   :  { %7484 = vmatpush3.msra.mxu1 %v2420_v59  ;;  %7554 = vmatprep.subr.mxu0 %v8921_v58  ;;  %v6208_v59 = vld [vmem:[%s9916_s28 + $0x120] sm:$0xff] }
 0x666   :  { %7485 = vmatprep.subr.mxu1 %v8921_v58  ;;  %7555 = vmatpush3.msra.mxu0 %v2701_v13  ;;  %v2988_v13 = vld [vmem:[#allocation18 + $0x58] sm:$0xff] }
 0x667   :  { %7486 = vmatpush3.msra.mxu1 %v2419_v63  ;;  %7556 = vmatprep.subr.mxu0 %v8921_v58  ;;  %v6207_v63 = vld [vmem:[%s9916_s28 + $0x118] sm:$0xff] }
 0x668   :  { %7488 = vmatmul.mubr.msk.f32.vlgmr.msra.gmra.mxu1 %vm1525_vm9, %v8507_v0  ;;  %7509 = vmatprep.subr.mxu1 %v8921_v58  ;;  %v6206_v0 = vld [vmem:[%s9916_s28 + $0x110] sm:$0xff] }
 0x669   :  { %7541 = vmatprep.mubr.msk.f32.mxu1 %vm8923_vm10, %v8921_v58  ;;  %7510 = vmatpush3.msra.mxu1 %v6203_v2  ;;  %v6205_v2 = vld [vmem:[%s9916_s28 + $0x108] sm:$0xff] }
 0x66a   :  { %7511 = vmatprep.subr.mxu1 %v8921_v58  ;;  %7557 = vmatpush3.msra.mxu0 %v2700_v15  ;;  %v2987_v15 = vld [vmem:[#allocation18 + $0x50] sm:$0xff] }
 0x66b   :  { %7512 = vmatpush3.msra.mxu1 %v6202_v4  ;;  %7558 = vmatprep.subr.mxu0 %v8921_v58 }
 0x66c   :  { %7513 = vmatprep.subr.mxu1 %v8921_v58  ;;  %7559 = vmatpush3.msra.mxu0 %v2699_v17  ;;  %v2986_v17 = vld [vmem:[#allocation18 + $0x48] sm:$0xff] }
 0x66d   :  { %7514 = vmatpush3.msra.mxu1 %v6201_v6  ;;  %7560 = vmatprep.subr.mxu0 %v8921_v58  ;;  %v3079_v6 = vld [vmem:[#allocation18 + $0xf8] sm:$0xff] }
 0x66e   :  { %7515 = vmatprep.subr.mxu1 %v8921_v58  ;;  %7561 = vmatpush3.msra.mxu0 %v2698_v19  ;;  %v2985_v19 = vld [vmem:[#allocation18 + $0x40] sm:$0xff] }
 0x66f   :  { %7516 = vmatpush3.msra.mxu1 %v6200_v8  ;;  %7562 = vmatprep.subr.mxu0 %v8921_v58  ;;  %v3078_v8 = vld [vmem:[#allocation18 + $0xf0] sm:$0xff] }
 0x670   :  { %7517 = vmatprep.subr.mxu1 %v8921_v58  ;;  %7563 = vmatpush3.msra.mxu0 %v2697_v23  ;;  %v2984_v23 = vld [vmem:[#allocation18 + $0x38] sm:$0xff] }
 0x671   :  { %7518 = vmatpush3.msra.mxu1 %v6199_v10  ;;  %7564 = vmatprep.subr.mxu0 %v8921_v58  ;;  %v3077_v10 = vld [vmem:[#allocation18 + $0xe8] sm:$0xff] }
 0x672   :  { %7519 = vmatprep.subr.mxu1 %v8921_v58  ;;  %7565 = vmatpush3.msra.mxu0 %v2696_v25  ;;  %v2983_v25 = vld [vmem:[#allocation18 + $0x30] sm:$0xff] }
 0x673   :  { %7520 = vmatpush3.msra.mxu1 %v6198_v12  ;;  %7566 = vmatprep.subr.mxu0 %v8921_v58  ;;  %v3076_v12 = vld [vmem:[#allocation18 + $0xe0] sm:$0xff] }
 0x674   :  { %7521 = vmatprep.subr.mxu1 %v8921_v58  ;;  %7567 = vmatpush3.msra.mxu0 %v2695_v27  ;;  %v2982_v27 = vld [vmem:[#allocation18 + $0x28] sm:$0xff] }
 0x675   :  { %7522 = vmatpush3.msra.mxu1 %v6197_v14  ;;  %7568 = vmatprep.subr.mxu0 %v8921_v58  ;;  %v3075_v14 = vld [vmem:[#allocation18 + $0xd8] sm:$0xff] }
 0x676   :  { %7523 = vmatprep.subr.mxu1 %v8921_v58  ;;  %7569 = vmatpush3.msra.mxu0 %v2694_v21  ;;  %v2981_v21 = vld [vmem:[#allocation18 + $0x20] sm:$0xff] }
 0x677   :  { %7524 = vmatpush3.msra.mxu1 %v6196_v16  ;;  %7570 = vmatprep.subr.mxu0 %v8921_v58  ;;  %v3074_v16 = vld [vmem:[#allocation18 + $0xd0] sm:$0xff] }
 0x678   :  { %7525 = vmatprep.subr.mxu1 %v8921_v58  ;;  %7571 = vmatpush3.msra.mxu0 %v2693_v29  ;;  %v2980_v29 = vld [vmem:[#allocation18 + $0x18] sm:$0xff] }
 0x679   :  { %7526 = vmatpush3.msra.mxu1 %v6195_v18  ;;  %7572 = vmatprep.subr.mxu0 %v8921_v58  ;;  %v3073_v18 = vld [vmem:[#allocation18 + $0xc8] sm:$0xff] }
 0x67a   :  { %7527 = vmatprep.subr.mxu1 %v8921_v58  ;;  %7573 = vmatpush3.msra.mxu0 %v2692_v31  ;;  %v2979_v31 = vld [vmem:[#allocation18 + $0x10] sm:$0xff] }
 0x67b   :  { %7528 = vmatpush3.msra.mxu1 %v6194_v20  ;;  %7574 = vmatprep.subr.mxu0 %v8921_v58  ;;  %v3072_v20 = vld [vmem:[#allocation18 + $0xc0] sm:$0xff] }
 0x67c   :  { %7529 = vmatprep.subr.mxu1 %v8921_v58  ;;  %7575 = vmatpush3.msra.mxu0 %v2691_v33  ;;  %v2978_v33 = vld [vmem:[#allocation18 + $0x8] sm:$0xff] }
 0x67d   :  { %7530 = vmatpush3.msra.mxu1 %v6193_v24  ;;  %7614 = vmatprep.subr.mxu0 %v8921_v58  ;;  %v3071_v24 = vld [vmem:[#allocation18 + $0xb8] sm:$0xff] }
 0x67e   :  { %7531 = vmatprep.subr.mxu1 %v8921_v58 }
 0x67f   :  { %7532 = vmatpush3.msra.mxu1 %v6192_v26  ;;  %v3070_v26 = vld [vmem:[#allocation18 + $0xb0] sm:$0xff] }
 0x680   :  { %7533 = vmatprep.subr.mxu1 %v8921_v58 }
 0x681   :  { %7534 = vmatpush3.msra.mxu1 %v6191_v28  ;;  %v3069_v28 = vld [vmem:[#allocation18 + $0xa8] sm:$0xff] }
 0x682   :  { %7535 = vmatprep.subr.mxu1 %v8921_v58 }
 0x683   :  { %7536 = vmatpush3.msra.mxu1 %v6190_v22  ;;  %v3068_v22 = vld [vmem:[#allocation18 + $0xa0] sm:$0xff] }
 0x684   :  { %7537 = vmatprep.subr.mxu1 %v8921_v58 }
 0x685   :  { %7538 = vmatpush3.msra.mxu1 %v6189_v30  ;;  %v3067_v30 = vld [vmem:[#allocation18 + $0x98] sm:$0xff] }
 0x686   :  { %7539 = vmatprep.subr.mxu1 %v8921_v58 }
 0x687   :  { %7540 = vmatpush3.msra.mxu1 %v6188_v32  ;;  %v3066_v32 = vld [vmem:[#allocation18 + $0x90] sm:$0xff] }
 0x688   :  { %7579 = vmatprep.subr.mxu1 %v8921_v58 }
 0x718   :  { %v2509_v34 = vpop.f32.mrf.mxu1 }
 0x719   :  { %v2670_v36 = vpop.f32.mrf.mxu0 }
 0x71a   :  { %v7470_v37 = vpop.f32.mrf.mxu1 }
 0x71b   :  { %v7508_v38 = vpop.f32.mrf.mxu0  ;;  %v3064_v37 = vld [vmem:[#allocation18 + $0x80] sm:$0xff] }
 0x71c   :  { %v3424_v38 = vld [vmem:[#allocation21 + $0xf8] sm:$0xff] }
 0x728   :  { %v2584_v39 = vpop.f32.mrf.mxu1 }
 0x729   :  { %v2585_v40 = vadd.f32 %v2584_v39, %v2509_v34  ;;  %v3065_v34 = vld [vmem:[#allocation18 + $0x88] sm:$0xff]  ;;  %v3405_v39 = vld [vmem:[#allocation21 + $0x78] sm:$0xff] }
 0x72a   :  { %v7489_v42 = vpop.f32.mrf.mxu1 }
 0x72b   :  { %v2674_v43 = vadd.f32 %v2670_v36, %v2585_v40  ;;  %v2977_v36 = vld [vmem:[#allocation18] sm:$0xff] }
 0x72d   :  { %v2682_v45 = vadd.f32 %v6187_v41, %v2674_v43 }
 0x72f   :  { %v2683_v46 = vmax.f32 %v2682_v45, 0.0 }
 0x731   :  { %v2685_v47 = vcombine.high %v2683_v46, %v2683_v46  ;;  %2687 = vst [vmem:[#allocation8 + $0x1] sm:$0xf] %v2683_v46 }
 0x733   :  { %2688 = vst [vmem:[#allocation8 + $0x9] sm:$0xf] %v2685_v47  ;;  %v6220_v47 = vld [vmem:[#allocation17] ss:$0 sm:$0xff] }
 0x73a   :  { %v8508_v49 = vld [vmem:[#allocation8 + $0x1] ss:$8 sps:$4 sm:$0xff]  }
 0x73b   :  { %v8509_v50 = vld [vmem:[#allocation8] ss:$8 sps:$4 sm:$0xff]   ;;  %7542 = vmatmul.mubr.f32.vlgmr.msra.gmra.mxu1 %v8508_v49 }
 0x73c   :  { %7577 = vmatmul.mubr.f32.vlgmr.msra.gmra.mxu0 %v8509_v50  ;;  %7580 = vmatpush3.msra.mxu1 %v6219_v48  ;;  %v8510_v4 = vld [vmem:[#allocation8 + $0x2] ss:$8 sps:$4 sm:$0xff]  }
 0x73d   :  { %7581 = vmatprep.subr.mxu1 %v8921_v58  ;;  %7611 = vmatprep.mubr.msk.f32.mxu1 %vm8923_vm10, %v8921_v58 }
 0x73e   :  { %7582 = vmatpush3.msra.mxu1 %v6218_v51  ;;  %7646 = vmatprep.mubr.msk.f32.mxu0 %vm8923_vm10, %v8921_v58 }
 0x73f   :  { %7583 = vmatprep.subr.mxu1 %v8921_v58  ;;  %7615 = vmatpush3.msra.mxu0 %v2992_v5  ;;  %v3398_v5 = vld [vmem:[#allocation21 + $0x40] sm:$0xff] }
 0x740   :  { %7584 = vmatpush3.msra.mxu1 %v6217_v52  ;;  %7616 = vmatprep.subr.mxu0 %v8921_v58  ;;  %v3404_v52 = vld [vmem:[#allocation21 + $0x70] sm:$0xff] }
 0x741   :  { %7585 = vmatprep.subr.mxu1 %v8921_v58  ;;  %7617 = vmatpush3.msra.mxu0 %v2991_v7  ;;  %v3397_v7 = vld [vmem:[#allocation21 + $0x38] sm:$0xff] }
 0x742   :  { %7586 = vmatpush3.msra.mxu1 %v6216_v53  ;;  %7618 = vmatprep.subr.mxu0 %v8921_v58  ;;  %v3422_v53 = vld [vmem:[#allocation21 + $0xe8] sm:$0xff] }
 0x743   :  { %7587 = vmatprep.subr.mxu1 %v8921_v58  ;;  %7619 = vmatpush3.msra.mxu0 %v2990_v9  ;;  %v3396_v9 = vld [vmem:[#allocation21 + $0x30] sm:$0xff] }
 0x744   :  { %7588 = vmatpush3.msra.mxu1 %v6215_v54  ;;  %7620 = vmatprep.subr.mxu0 %v8921_v58  ;;  %v3421_v54 = vld [vmem:[#allocation21 + $0xe0] sm:$0xff] }
 0x745   :  { %7589 = vmatprep.subr.mxu1 %v8921_v58  ;;  %7621 = vmatpush3.msra.mxu0 %v2989_v11  ;;  %v3395_v11 = vld [vmem:[#allocation21 + $0x28] sm:$0xff] }
 0x746   :  { %7590 = vmatpush3.msra.mxu1 %v6214_v55  ;;  %7622 = vmatprep.subr.mxu0 %v8921_v58  ;;  %v3420_v55 = vld [vmem:[#allocation21 + $0xd8] sm:$0xff] }
 0x747   :  { %7591 = vmatprep.subr.mxu1 %v8921_v58  ;;  %7623 = vmatpush3.msra.mxu0 %v2988_v13  ;;  %v3394_v13 = vld [vmem:[#allocation21 + $0x20] sm:$0xff] }
 0x748   :  { %7592 = vmatpush3.msra.mxu1 %v6213_v56  ;;  %7624 = vmatprep.subr.mxu0 %v8921_v58  ;;  %v3419_v56 = vld [vmem:[#allocation21 + $0xd0] sm:$0xff] }
 0x749   :  { %7593 = vmatprep.subr.mxu1 %v8921_v58  ;;  %7625 = vmatpush3.msra.mxu0 %v2987_v15  ;;  %v3393_v15 = vld [vmem:[#allocation21 + $0x18] sm:$0xff] }
 0x74a   :  { %7594 = vmatpush3.msra.mxu1 %v6212_v57  ;;  %7626 = vmatprep.subr.mxu0 %v8921_v58  ;;  %v3403_v57 = vld [vmem:[#allocation21 + $0x68] sm:$0xff] }
 0x74b   :  { %7595 = vmatprep.subr.mxu1 %v8921_v58  ;;  %7627 = vmatpush3.msra.mxu0 %v2986_v17  ;;  %v9692_v17 = vld [vmem:[#allocation21 + $0x178] sm:$0xff] }
 0x74c   :  { %7596 = vmatpush3.msra.mxu1 %v6211_v60  ;;  %7628 = vmatprep.subr.mxu0 %v8921_v58  ;;  %v3418_v60 = vld [vmem:[#allocation21 + $0xc8] sm:$0xff] }
 0x74d   :  { %7597 = vmatprep.subr.mxu1 %v8921_v58  ;;  %7629 = vmatpush3.msra.mxu0 %v2985_v19  ;;  %v3390_v19 = vld [vmem:[#allocation21] sm:$0xff] }
 0x74e   :  { %7598 = vmatpush3.msra.mxu1 %v6210_v61  ;;  %7630 = vmatprep.subr.mxu0 %v8921_v58  ;;  %v3402_v61 = vld [vmem:[#allocation21 + $0x60] sm:$0xff] }
 0x74f   :  { %7599 = vmatprep.subr.mxu1 %v8921_v58  ;;  %7631 = vmatpush3.msra.mxu0 %v2984_v23  ;;  %v8924_v23 = vmov 1966171168  }
 0x750   :  { %7600 = vmatpush3.msra.mxu1 %v6209_v62  ;;  %7632 = vmatprep.subr.mxu0 %v8921_v58  ;;  %v3417_v62 = vld [vmem:[#allocation21 + $0xc0] sm:$0xff] }
 0x751   :  { %7601 = vmatprep.subr.mxu1 %v8921_v58  ;;  %7633 = vmatpush3.msra.mxu0 %v2983_v25 }
 0x752   :  { %7602 = vmatpush3.msra.mxu1 %v6208_v59  ;;  %7634 = vmatprep.subr.mxu0 %v8921_v58  ;;  %v3401_v59 = vld [vmem:[#allocation21 + $0x58] sm:$0xff] }
 0x753   :  { %7603 = vmatprep.subr.mxu1 %v8921_v58  ;;  %7635 = vmatpush3.msra.mxu0 %v2982_v27 }
 0x754   :  { %7604 = vmatpush3.msra.mxu1 %v6207_v63  ;;  %7636 = vmatprep.subr.mxu0 %v8921_v58  ;;  %v3416_v63 = vld [vmem:[#allocation21 + $0xb8] sm:$0xff] }
 0x755   :  { %7605 = vmatprep.subr.mxu1 %v8921_v58  ;;  %7637 = vmatpush3.msra.mxu0 %v2981_v21 }
 0x756   :  { %7606 = vmatpush3.msra.mxu1 %v6206_v0  ;;  %7638 = vmatprep.subr.mxu0 %v8921_v58  ;;  %v3400_v0 = vld [vmem:[#allocation21 + $0x50] sm:$0xff] }
 0x757   :  { %7607 = vmatprep.subr.mxu1 %v8921_v58  ;;  %7639 = vmatpush3.msra.mxu0 %v2980_v29 }
 0x758   :  { %7608 = vmatpush3.msra.mxu1 %v6205_v2  ;;  %7640 = vmatprep.subr.mxu0 %v8921_v58  ;;  %v3415_v2 = vld [vmem:[#allocation21 + $0xb0] sm:$0xff] }
 0x759   :  { %7609 = vmatprep.subr.mxu1 %v8921_v58  ;;  %7641 = vmatpush3.msra.mxu0 %v2979_v31 }
 0x75a   :  { %7610 = vmatpush3.msra.mxu1 %v6204_v3  ;;  %7642 = vmatprep.subr.mxu0 %v8921_v58  ;;  %v3399_v3 = vld [vmem:[#allocation21 + $0x48] sm:$0xff] }
 0x75b   :  { %7612 = vmatmul.mubr.f32.vlgmr.msra.gmra.mxu1 %v8510_v4  ;;  %7649 = vmatprep.subr.mxu1 %v8921_v58  ;;  %v3414_v4 = vld [vmem:[#allocation21 + $0xa8] sm:$0xff] }
 0x75c   :  { %7681 = vmatprep.mubr.msk.f32.mxu1 %vm8923_vm10, %v8921_v58  ;;  %7650 = vmatpush3.msra.mxu1 %v3079_v6  ;;  %v3413_v6 = vld [vmem:[#allocation21 + $0xa0] sm:$0xff] }
 0x75d   :  { %7651 = vmatprep.subr.mxu1 %v8921_v58  ;;  %7643 = vmatpush3.msra.mxu0 %v2978_v33 }
 0x75e   :  { %7652 = vmatpush3.msra.mxu1 %v3078_v8  ;;  %7644 = vmatprep.subr.mxu0 %v8921_v58  ;;  %v3412_v8 = vld [vmem:[#allocation21 + $0x98] sm:$0xff] }
 0x75f   :  { %7653 = vmatprep.subr.mxu1 %v8921_v58  ;;  %7645 = vmatpush3.msra.mxu0 %v2977_v36 }
 0x760   :  { %7654 = vmatpush3.msra.mxu1 %v3077_v10  ;;  %7684 = vmatprep.subr.mxu0 %v3424_v38  ;;  %v3411_v10 = vld [vmem:[#allocation21 + $0x90] sm:$0xff] }
 0x761   :  { %7655 = vmatprep.subr.mxu1 %v8921_v58 }
 0x762   :  { %7656 = vmatpush3.msra.mxu1 %v3076_v12  ;;  %v3410_v12 = vld [vmem:[#allocation21 + $0x88] sm:$0xff] }
 0x763   :  { %7657 = vmatprep.subr.mxu1 %v8921_v58 }
 0x764   :  { %7658 = vmatpush3.msra.mxu1 %v3075_v14  ;;  %v3409_v14 = vld [vmem:[#allocation21 + $0x80] sm:$0xff] }
 0x765   :  { %7659 = vmatprep.subr.mxu1 %v8921_v58 }
 0x766   :  { %7660 = vmatpush3.msra.mxu1 %v3074_v16  ;;  %v3392_v16 = vld [vmem:[#allocation21 + $0x10] sm:$0xff] }
 0x767   :  { %7661 = vmatprep.subr.mxu1 %v8921_v58 }
 0x768   :  { %7662 = vmatpush3.msra.mxu1 %v3073_v18  ;;  %v3391_v18 = vld [vmem:[#allocation21 + $0x8] sm:$0xff] }
 0x769   :  { %7663 = vmatprep.subr.mxu1 %v8921_v58 }
 0x76a   :  { %7664 = vmatpush3.msra.mxu1 %v3072_v20  ;;  %v9695_v20 = vld [vmem:[#allocation23 + $0x78] sm:$0xff] }
 0x76b   :  { %7665 = vmatprep.subr.mxu1 %v8921_v58 }
 0x76c   :  { %7666 = vmatpush3.msra.mxu1 %v3071_v24  ;;  %v3153_v24 = vunpack.c.l.s4 %v8924_v23 }
 0x76d   :  { %7667 = vmatprep.subr.mxu1 %v8921_v58 }
 0x76e   :  { %7668 = vmatpush3.msra.mxu1 %v3070_v26  ;;  %v3154_v25 = vunpack.c.0.s8 %v3153_v24  ;;  %v6221_v26 = vld [vmem:[#allocation20] ss:$0 sm:$0xff] }
 0x76f   :  { %7669 = vmatprep.subr.mxu1 %v8921_v58  ;;  %v3313_v27 = vcombine.high %v6221_v26, %v6221_v26  ;;  %v3320_v29 = vrot.slane %v6221_v26, %v9300_v44 }
 0x770   :  { %7670 = vmatpush3.msra.mxu1 %v3069_v28  ;;  %v9699_v28 = vsub.s32 %v3154_v25, %v9296_v35 }
 0x771   :  { %7671 = vmatprep.subr.mxu1 %v8921_v58 }
 0x772   :  { %7672 = vmatpush3.msra.mxu1 %v3068_v22 }
 0x773   :  { %7673 = vmatprep.subr.mxu1 %v8921_v58 }
 0x774   :  { %7674 = vmatpush3.msra.mxu1 %v3067_v30  ;;  %v3327_v30 = vrot.slane %v3313_v27, %v9300_v44 }
 0x775   :  { %7675 = vmatprep.subr.mxu1 %v8921_v58 }
 0x776   :  { %7676 = vmatpush3.msra.mxu1 %v3066_v32 }
 0x777   :  { %7677 = vmatprep.subr.mxu1 %v8921_v58 }
 0x778   :  { %7678 = vmatpush3.msra.mxu1 %v3065_v34 }
 0x779   :  { %7679 = vmatprep.subr.mxu1 %v8921_v58  ;;  %v3423_v58 = vld [vmem:[#allocation21 + $0xf0] sm:$0xff] }
 0x77a   :  { %7680 = vmatpush3.msra.mxu1 %v3064_v37 }
 0x77b   :  { %7719 = vmatprep.subr.mxu1 %v3405_v39 }
 0x7fb   :  { %v2796_v40 = vpop.f32.mrf.mxu1 }
 0x7fc   :  { %v2870_v41 = vpop.f32.mrf.mxu0 }
 0x7fd   :  { %v7543_v42 = vpop.f32.mrf.mxu1  ;;  %v2871_v45 = vadd.f32 %v2870_v41, %v2796_v40 }
 0x7fe   :  { %v7578_v43 = vpop.f32.mrf.mxu0 }
 0x7ff   :  { %v3328_v43 = vcombine.high %v3320_v29, %v3320_v29 }
 0x81b   :  { %v2963_v46 = vpop.f32.mrf.mxu1 }
 0x81c   :  { %v2967_v48 = vadd.f32 %v2963_v46, %v2871_v45 }
 0x81d   :  { %v7613_v49 = vpop.f32.mrf.mxu1 }
 0x81e   :  { %v2975_v50 = vadd.f32 %v6220_v47, %v2967_v48  ;;  %v3329_v48 = vcombine.high %v3327_v30, %v3327_v30 }
 0x820   :  { %v2976_v51 = vmax.f32 %v2975_v50, 0.0 }
 0x822   :  { %7647 = vmatmul.mubr.f32.vlgmr.msra.gmra.mxu0 %v2976_v51  ;;  %7682 = vmatmul.mubr.f32.vlgmr.msra.gmra.mxu1 %v2976_v51 }
 0x823   :  { %7685 = vmatpush3.msra.mxu0 %v3424_v38  ;;  %7720 = vmatpush3.msra.mxu1 %v3405_v39 }
 0x824   :  { %7686 = vmatprep.subr.mxu0 %v3423_v58  ;;  %7721 = vmatprep.subr.mxu1 %v3404_v52 }
 0x825   :  { %7687 = vmatpush3.msra.mxu0 %v3423_v58  ;;  %7722 = vmatpush3.msra.mxu1 %v3404_v52 }
 0x826   :  { %7688 = vmatprep.subr.mxu0 %v3422_v53  ;;  %7723 = vmatprep.subr.mxu1 %v3403_v57 }
 0x827   :  { %7689 = vmatpush3.msra.mxu0 %v3422_v53  ;;  %7724 = vmatpush3.msra.mxu1 %v3403_v57 }
 0x828   :  { %7690 = vmatprep.subr.mxu0 %v3421_v54  ;;  %7725 = vmatprep.subr.mxu1 %v3402_v61 }
 0x829   :  { %7691 = vmatpush3.msra.mxu0 %v3421_v54  ;;  %7726 = vmatpush3.msra.mxu1 %v3402_v61 }
 0x82a   :  { %7692 = vmatprep.subr.mxu0 %v3420_v55  ;;  %7727 = vmatprep.subr.mxu1 %v3401_v59 }
 0x82b   :  { %7693 = vmatpush3.msra.mxu0 %v3420_v55  ;;  %7728 = vmatpush3.msra.mxu1 %v3401_v59 }
 0x82c   :  { %7694 = vmatprep.subr.mxu0 %v3419_v56  ;;  %7729 = vmatprep.subr.mxu1 %v3400_v0 }
 0x82d   :  { %7695 = vmatpush3.msra.mxu0 %v3419_v56  ;;  %7730 = vmatpush3.msra.mxu1 %v3400_v0 }
 0x82e   :  { %7696 = vmatprep.subr.mxu0 %v3418_v60  ;;  %7731 = vmatprep.subr.mxu1 %v3399_v3 }
 0x82f   :  { %7697 = vmatpush3.msra.mxu0 %v3418_v60  ;;  %7732 = vmatpush3.msra.mxu1 %v3399_v3 }
 0x830   :  { %7698 = vmatprep.subr.mxu0 %v3417_v62  ;;  %7733 = vmatprep.subr.mxu1 %v3398_v5 }
 0x831   :  { %7699 = vmatpush3.msra.mxu0 %v3417_v62  ;;  %7734 = vmatpush3.msra.mxu1 %v3398_v5 }
 0x832   :  { %7700 = vmatprep.subr.mxu0 %v3416_v63  ;;  %7735 = vmatprep.subr.mxu1 %v3397_v7 }
 0x833   :  { %7701 = vmatpush3.msra.mxu0 %v3416_v63  ;;  %7736 = vmatpush3.msra.mxu1 %v3397_v7 }
 0x834   :  { %7702 = vmatprep.subr.mxu0 %v3415_v2  ;;  %7737 = vmatprep.subr.mxu1 %v3396_v9 }
 0x835   :  { %7703 = vmatpush3.msra.mxu0 %v3415_v2  ;;  %7738 = vmatpush3.msra.mxu1 %v3396_v9 }
 0x836   :  { %7704 = vmatprep.subr.mxu0 %v3414_v4  ;;  %7739 = vmatprep.subr.mxu1 %v3395_v11 }
 0x837   :  { %7705 = vmatpush3.msra.mxu0 %v3414_v4  ;;  %7740 = vmatpush3.msra.mxu1 %v3395_v11 }
 0x838   :  { %7706 = vmatprep.subr.mxu0 %v3413_v6  ;;  %7741 = vmatprep.subr.mxu1 %v3394_v13 }
 0x839   :  { %7707 = vmatpush3.msra.mxu0 %v3413_v6  ;;  %7742 = vmatpush3.msra.mxu1 %v3394_v13 }
 0x83a   :  { %7708 = vmatprep.subr.mxu0 %v3412_v8  ;;  %7743 = vmatprep.subr.mxu1 %v3393_v15 }
 0x83b   :  { %7709 = vmatpush3.msra.mxu0 %v3412_v8  ;;  %7744 = vmatpush3.msra.mxu1 %v3393_v15 }
 0x83c   :  { %7710 = vmatprep.subr.mxu0 %v3411_v10  ;;  %7745 = vmatprep.subr.mxu1 %v3392_v16 }
 0x83d   :  { %7711 = vmatpush3.msra.mxu0 %v3411_v10  ;;  %7746 = vmatpush3.msra.mxu1 %v3392_v16 }
 0x83e   :  { %7712 = vmatprep.subr.mxu0 %v3410_v12  ;;  %7747 = vmatprep.subr.mxu1 %v3391_v18 }
 0x83f   :  { %7713 = vmatpush3.msra.mxu0 %v3410_v12  ;;  %7748 = vmatpush3.msra.mxu1 %v3391_v18 }
 0x840   :  { %7714 = vmatprep.subr.mxu0 %v3409_v14  ;;  %7749 = vmatprep.subr.mxu1 %v3390_v19 }
 0x841   :  { %7715 = vmatpush3.msra.mxu0 %v3409_v14  ;;  %7750 = vmatpush3.msra.mxu1 %v3390_v19 }
 0x842   :  { %7754 = vmatprep.subr.mxu0 %v9692_v17  ;;  %7789 = vmatprep.subr.mxu1 %v9695_v20 }
 0x8e2   :  { %v3059_v21 = vpop.f32.mrf.mxu0  ;;  %v3146_v22 = vpop.f32.mrf.mxu1 }
 0x8e3   :  { %v3151_v31 = vcombine.high %v3059_v21, %v3059_v21  ;;  %v3158_v32 = vrot.slane %v3059_v21, %v9699_v28  ;;  %v3209_v33 = vcombine.high %v3146_v22, %v3146_v22  ;;  %v3216_v34 = vrot.slane %v3146_v22, %v9699_v28 }
 0x8e4   :  { %v7648_v36 = vpop.f32.mrf.mxu0  ;;  %v7683_v37 = vpop.f32.mrf.mxu1 }
 0x8e5   :  { %v3165_v38 = vrot.slane %v3151_v31, %v9699_v28  ;;  %v3166_v39 = vcombine.high %v3158_v32, %v3158_v32  ;;  %v3174_v35 = vrot.slane %v3158_v32, %v9699_v28  ;;  %v3223_v40 = vrot.slane %v3209_v33, %v9699_v28 }
 0x8e6   :  { %v3224_v41 = vcombine.high %v3216_v34, %v3216_v34  ;;  %v3232_v42 = vrot.slane %v3216_v34, %v9699_v28 }
 0x8e7   :  { %v3167_v45 = vcombine.high %v3165_v38, %v3165_v38  ;;  %v3181_v46 = vrot.slane %v3165_v38, %v9699_v28  ;;  %v3188_v47 = vrot.slane %v3166_v39, %v9699_v28  ;;  %v3225_v49 = vcombine.high %v3223_v40, %v3223_v40  ;;  %v3590_v39 = vld [vmem:[#allocation21 + $0x160] sm:$0xff] }
 0x8e8   :  { %v3239_v50 = vrot.slane %v3223_v40, %v9699_v28  ;;  %v3246_v51 = vrot.slane %v3224_v41, %v9699_v28  ;;  %v3254_v58 = vcombine.high %v3232_v42, %v3232_v42  ;;  %v3196_v53 = vcombine.high %v3174_v35, %v3174_v35 }
 0x8e9   :  { %v3195_v52 = vrot.slane %v3167_v45, %v9699_v28  ;;  %v3197_v54 = vcombine.high %v3181_v46, %v3181_v46  ;;  %v3261_v55 = vrot.slane %v3232_v42, %v9307_v1  ;;  %v3253_v56 = vrot.slane %v3225_v49, %v9699_v28  ;;  %v3687_v42 = vld [vmem:[#allocation23 + $0x70] sm:$0xff]  ;;  %v3684_v49 = vld [vmem:[#allocation23 + $0x58] sm:$0xff] }
 0x8ea   :  { %v3255_v57 = vcombine.high %v3239_v50, %v3239_v50  ;;  %v3256_v60 = vcombine.high %v3246_v51, %v3246_v51  ;;  %v3265_v61 = vrot.slane %v3246_v51, %v9307_v1  ;;  %v3198_v62 = vcombine.high %v3188_v47, %v3188_v47  ;;  %v3671_v45 = vld [vmem:[#allocation6] sm:$0xff] }
 0x8eb   :  { %v3269_v59 = vrot.slane %v3254_v58, %v9307_v1  ;;  %v3277_v63 = vrot.slane %v3239_v50, %v9307_v1  ;;  %v3299_v0 = vsel %vm3298_vm12, %v3174_v35, %v3261_v55  ;;  %v3257_v2 = vcombine.high %v3253_v56, %v3253_v56  ;;  %v3586_v50 = vld [vmem:[#allocation21 + $0x140] sm:$0xff]  ;;  %v3683_v51 = vld [vmem:[#allocation23 + $0x50] sm:$0xff]  ;;  %v3682_v58 = vld [vmem:[#allocation23 + $0x48] sm:$0xff] }
 0x8ec   :  { %v3273_v3 = vrot.slane %v3256_v60, %v9307_v1  ;;  %v3281_v4 = vrot.slane %v3253_v56, %v9307_v1  ;;  %v3285_v5 = vrot.slane %v3255_v57, %v9307_v1  ;;  %v3199_v6 = vcombine.high %v3195_v52, %v3195_v52  ;;  %v3680_v55 = vld [vmem:[#allocation23 + $0x38] sm:$0xff]  ;;  %v3582_v56 = vld [vmem:[#allocation21 + $0x120] sm:$0xff]  ;;  %v3679_v57 = vld [vmem:[#allocation23 + $0x30] sm:$0xff] }
 0x8ed   :  { %v3300_v7 = vsel %vm3298_vm12, %v3188_v47, %v3265_v61  ;;  %v3301_v8 = vsel %vm3298_vm12, %v3196_v53, %v3269_v59  ;;  %v3303_v9 = vsel %vm3298_vm12, %v3181_v46, %v3277_v63  ;;  %v3289_v10 = vrot.slane %v3257_v2, %v9307_v1  ;;  %v3588_v46 = vld [vmem:[#allocation21 + $0x150] sm:$0xff]  ;;  %v3685_v47 = vld [vmem:[#allocation23 + $0x60] sm:$0xff]  ;;  %v3581_v60 = vld [vmem:[#allocation21 + $0x118] sm:$0xff] }
 0x8ee   :  { %v3302_v11 = vsel %vm3298_vm12, %v3198_v62, %v3273_v3  ;;  %v3304_v12 = vsel %vm3298_vm12, %v3195_v52, %v3281_v4  ;;  %v3305_v13 = vsel %vm3298_vm12, %v3197_v54, %v3285_v5  ;;  %v3334_v14 = vadd.f32 %v3320_v29, %v3299_v0  ;;  %v3584_v52 = vld [vmem:[#allocation21 + $0x130] sm:$0xff]  ;;  %v3681_v53 = vld [vmem:[#allocation23 + $0x40] sm:$0xff]  ;;  %v3583_v54 = vld [vmem:[#allocation21 + $0x128] sm:$0xff] }
 0x8ef   :  { %v3335_v15 = vadd.f32 %v3328_v43, %v3300_v7  ;;  %v3336_v16 = vadd.f32 %v3327_v30, %v3301_v8  ;;  %v3337_v18 = vadd.f32 %v3329_v48, %v3302_v11  ;;  %v3306_v19 = vsel %vm3298_vm12, %v3199_v6, %v3289_v10  ;;  %v3678_v61 = vld [vmem:[#allocation23 + $0x28] sm:$0xff]  ;;  %v3580_v62 = vld [vmem:[#allocation21 + $0x110] sm:$0xff]  ;;  %v3677_v59 = vld [vmem:[#allocation23 + $0x20] sm:$0xff] }
 0x8f0   :  { %v3338_v23 = vadd.f32 %v3320_v29, %v3303_v9  ;;  %v3339_v24 = vadd.f32 %v3328_v43, %v3304_v12  ;;  %v3340_v25 = vadd.f32 %v3327_v30, %v3305_v13  ;;  %v3341_v26 = vadd.f32 %v3329_v48, %v3306_v19  ;;  %v3592_v29 = vld [vmem:[#allocation21 + $0x170] sm:$0xff]  ;;  %v3591_v30 = vld [vmem:[#allocation21 + $0x168] sm:$0xff]  ;;  %v3589_v43 = vld [vmem:[#allocation21 + $0x158] sm:$0xff] }
 0x8f1   :  { %v3350_v27 = vcombine.low %v3334_v14, %v3335_v15  ;;  %v3351_v21 = vcombine.low %v3336_v16, %v3337_v18  ;;  %v3587_v48 = vld [vmem:[#allocation21 + $0x148] sm:$0xff]  ;;  %v3676_v0 = vld [vmem:[#allocation23 + $0x18] sm:$0xff]  ;;  %v3578_v2 = vld [vmem:[#allocation21 + $0x100] sm:$0xff] }
 0x8f2   :  { %v3367_v22 = vcombine.low %v3338_v23, %v3339_v24  ;;  %v3368_v33 = vcombine.low %v3340_v25, %v3341_v26  ;;  %v3579_v63 = vld [vmem:[#allocation21 + $0x108] sm:$0xff]  ;;  %v3675_v3 = vld [vmem:[#allocation23 + $0x10] sm:$0xff]  ;;  %v3784_v4 = vld [vmem:[#allocation23 + $0xf8] sm:$0xff] }
 0x8f3   :  { %v3358_v31 = vrot.slane %v3350_v27, %v9300_v44  ;;  %v3365_v32 = vrot.slane %v3351_v21, %v9300_v44  ;;  %v3674_v5 = vld [vmem:[#allocation23 + $0x8] sm:$0xff]  ;;  %v3673_v7 = vld [vmem:[#allocation23] sm:$0xff]  ;;  %v3783_v8 = vld [vmem:[#allocation23 + $0xf0] sm:$0xff] }
 0x8f4   :  { %v3375_v36 = vrot.slane %v3367_v22, %v9300_v44  ;;  %v3382_v37 = vrot.slane %v3368_v33, %v9300_v44  ;;  %v3766_v9 = vld [vmem:[#allocation6 + $0x1] sm:$0xff]  ;;  %v3880_v10 = vld [vmem:[#allocation23 + $0x178] sm:$0xff]  ;;  %v3781_v16 = vld [vmem:[#allocation23 + $0xe0] sm:$0xff] }
 0x8f5   :  { %v3366_v34 = vcombine.low %v3358_v31, %v3365_v32  ;;  %v3672_v11 = vld [vmem:[#allocation6 + $0x10] sm:$0xff]  ;;  %v3879_v12 = vld [vmem:[#allocation23 + $0x170] sm:$0xff]  ;;  %v3782_v13 = vld [vmem:[#allocation23 + $0xe8] sm:$0xff] }
 0x8f6   :  { %v3383_v38 = vcombine.low %v3375_v36, %v3382_v37  ;;  %v3862_v14 = vld [vmem:[#allocation6 + $0x2] sm:$0xff]  ;;  %v3877_v18 = vld [vmem:[#allocation23 + $0x160] sm:$0xff]  ;;  %v3780_v19 = vld [vmem:[#allocation23 + $0xd8] sm:$0xff] }
 0x8f7   :  { %3386 = vst [vmem:[#allocation9 + $0x1] sm:$0xff] %v3366_v34  ;;  %7716 = vmatprep.mubr.f32.mxu0 %v3366_v34  ;;  %v3878_v15 = vld [vmem:[#allocation23 + $0x168] sm:$0xff]  ;;  %v3876_v23 = vld [vmem:[#allocation23 + $0x158] sm:$0xff]  ;;  %v3779_v24 = vld [vmem:[#allocation23 + $0xd0] sm:$0xff] }
 0x8f8   :  { %3387 = vst [vmem:[#allocation9 + $0x11] sm:$0xff] %v3383_v38  ;;  %7717 = vmatmul.mubr.f32.vlgmr.msra.gmra.mxu0 %v3383_v38  ;;  %v3875_v25 = vld [vmem:[#allocation23 + $0x150] sm:$0xff]  ;;  %v3778_v26 = vld [vmem:[#allocation23 + $0xc8] sm:$0xff]  ;;  %v3777_v21 = vld [vmem:[#allocation23 + $0xc0] sm:$0xff] }
 0x8f9   :  { %7755 = vmatpush3.msra.mxu0 %v9692_v17  ;;  %v3686_v17 = vld [vmem:[#allocation23 + $0x68] sm:$0xff]  ;;  %v3873_v22 = vld [vmem:[#allocation23 + $0x140] sm:$0xff]  ;;  %v3776_v31 = vld [vmem:[#allocation23 + $0xb8] sm:$0xff] }
 0x8fa   :  { %7756 = vmatprep.subr.mxu0 %v3592_v29  ;;  %v3874_v27 = vld [vmem:[#allocation23 + $0x148] sm:$0xff]  ;;  %v3872_v32 = vld [vmem:[#allocation23 + $0x138] sm:$0xff]  ;;  %v3775_v33 = vld [vmem:[#allocation23 + $0xb0] sm:$0xff] }
 0x8fb   :  { %7757 = vmatpush3.msra.mxu0 %v3592_v29  ;;  %v3871_v34 = vld [vmem:[#allocation23 + $0x130] sm:$0xff]  ;;  %v3774_v36 = vld [vmem:[#allocation23 + $0xa8] sm:$0xff]  ;;  %v3773_v38 = vld [vmem:[#allocation23 + $0xa0] sm:$0xff] }
 0x8fc   :  { %7758 = vmatprep.subr.mxu0 %v3591_v30  ;;  %v3870_v37 = vld [vmem:[#allocation23 + $0x128] sm:$0xff]  ;;  %v3869_v29 = vld [vmem:[#allocation23 + $0x120] sm:$0xff] }
 0x8fd   :  { %7759 = vmatpush3.msra.mxu0 %v3591_v30  ;;  %v3772_v30 = vld [vmem:[#allocation23 + $0x98] sm:$0xff] }
 0x8fe   :  { %v3388_v35 = vld [vmem:[#allocation9] sm:$0xff]  ;;  %7760 = vmatprep.subr.mxu0 %v3590_v39 }
 0x8ff   :  { %v3575_v40 = vld [vmem:[#allocation9 + $0x2] sm:$0xff]  ;;  %7751 = vmatprep.mubr.f32.mxu1 %v3388_v35  ;;  %v3389_v41 = vld [vmem:[#allocation9 + $0x10] sm:$0xff]  ;;  %7761 = vmatpush3.msra.mxu0 %v3590_v39 }
 0x900   :  { %7786 = vmatprep.mubr.f32.mxu0 %v3575_v40  ;;  %7752 = vmatmul.mubr.f32.vlgmr.msra.gmra.mxu1 %v3389_v41  ;;  %v3576_v6 = vld [vmem:[#allocation9 + $0x12] sm:$0xff]  ;;  %v3771_v35 = vld [vmem:[#allocation23 + $0x90] sm:$0xff]  ;;  %v3770_v41 = vld [vmem:[#allocation23 + $0x88] sm:$0xff] }
 0x901   :  { %7790 = vmatpush3.msra.mxu1 %v9695_v20  ;;  %7821 = vmatprep.mubr.f32.mxu1 %v3671_v45  ;;  %v3585_v20 = vld [vmem:[#allocation21 + $0x138] sm:$0xff]  ;;  %v3867_v40 = vld [vmem:[#allocation23 + $0x110] sm:$0xff]  ;;  %v3865_v45 = vld [vmem:[#allocation23 + $0x100] sm:$0xff] }
 0x902   :  { %7791 = vmatprep.subr.mxu1 %v3687_v42  ;;  %7762 = vmatprep.subr.mxu0 %v3589_v43  ;;  %v3868_v39 = vld [vmem:[#allocation23 + $0x118] sm:$0xff] }
 0x903   :  { %7792 = vmatpush3.msra.mxu1 %v3687_v42  ;;  %7763 = vmatpush3.msra.mxu0 %v3589_v43  ;;  %v3866_v42 = vld [vmem:[#allocation23 + $0x108] sm:$0xff]  ;;  %v3769_v43 = vld [vmem:[#allocation23 + $0x80] sm:$0xff] }
 0x904   :  { %7793 = vmatprep.subr.mxu1 %v3686_v17  ;;  %7764 = vmatprep.subr.mxu0 %v3588_v46 }
 0x905   :  { %7794 = vmatpush3.msra.mxu1 %v3686_v17  ;;  %7765 = vmatpush3.msra.mxu0 %v3588_v46  ;;  %v3767_v17 = vld [vmem:[#allocation6 + $0x11] sm:$0xff] }
 0x906   :  { %7795 = vmatprep.subr.mxu1 %v3685_v47  ;;  %7766 = vmatprep.subr.mxu0 %v3587_v48  ;;  %v3863_v46 = vld [vmem:[#allocation6 + $0x12] sm:$0xff] }
 0x907   :  { %7796 = vmatpush3.msra.mxu1 %v3685_v47  ;;  %7767 = vmatpush3.msra.mxu0 %v3587_v48  ;;  %v4007_v47 = vld [vmem:[#allocation26 + $0xf8] sm:$0xff] }
 0x908   :  { %7797 = vmatprep.subr.mxu1 %v3684_v49  ;;  %7768 = vmatprep.subr.mxu0 %v3586_v50  ;;  %v3988_v48 = vld [vmem:[#allocation26 + $0x78] sm:$0xff] }
 0x909   :  { %7798 = vmatpush3.msra.mxu1 %v3684_v49  ;;  %7769 = vmatpush3.msra.mxu0 %v3586_v50  ;;  %v4006_v49 = vld [vmem:[#allocation26 + $0xf0] sm:$0xff] }
 0x90a   :  { %7799 = vmatprep.subr.mxu1 %v3683_v51  ;;  %7770 = vmatprep.subr.mxu0 %v3585_v20  ;;  %v3987_v50 = vld [vmem:[#allocation26 + $0x70] sm:$0xff] }
 0x90b   :  { %7800 = vmatpush3.msra.mxu1 %v3683_v51  ;;  %7771 = vmatpush3.msra.mxu0 %v3585_v20  ;;  %v4005_v51 = vld [vmem:[#allocation26 + $0xe8] sm:$0xff] }
 0x90c   :  { %7801 = vmatprep.subr.mxu1 %v3682_v58  ;;  %7772 = vmatprep.subr.mxu0 %v3584_v52  ;;  %v3986_v20 = vld [vmem:[#allocation26 + $0x68] sm:$0xff] }
 0x90d   :  { %7802 = vmatpush3.msra.mxu1 %v3682_v58  ;;  %7773 = vmatpush3.msra.mxu0 %v3584_v52  ;;  %v4004_v58 = vld [vmem:[#allocation26 + $0xe0] sm:$0xff] }
 0x90e   :  { %7803 = vmatprep.subr.mxu1 %v3681_v53  ;;  %7774 = vmatprep.subr.mxu0 %v3583_v54  ;;  %v3985_v52 = vld [vmem:[#allocation26 + $0x60] sm:$0xff] }
 0x90f   :  { %7804 = vmatpush3.msra.mxu1 %v3681_v53  ;;  %7775 = vmatpush3.msra.mxu0 %v3583_v54  ;;  %v4003_v53 = vld [vmem:[#allocation26 + $0xd8] sm:$0xff] }
 0x910   :  { %7805 = vmatprep.subr.mxu1 %v3680_v55  ;;  %7776 = vmatprep.subr.mxu0 %v3582_v56  ;;  %v3984_v54 = vld [vmem:[#allocation26 + $0x58] sm:$0xff] }
 0x911   :  { %7806 = vmatpush3.msra.mxu1 %v3680_v55  ;;  %7777 = vmatpush3.msra.mxu0 %v3582_v56  ;;  %v4002_v55 = vld [vmem:[#allocation26 + $0xd0] sm:$0xff] }
 0x912   :  { %7807 = vmatprep.subr.mxu1 %v3679_v57  ;;  %7778 = vmatprep.subr.mxu0 %v3581_v60  ;;  %v3983_v56 = vld [vmem:[#allocation26 + $0x50] sm:$0xff] }
 0x913   :  { %7808 = vmatpush3.msra.mxu1 %v3679_v57  ;;  %7779 = vmatpush3.msra.mxu0 %v3581_v60  ;;  %v4001_v57 = vld [vmem:[#allocation26 + $0xc8] sm:$0xff]  ;;  %v4000_v60 = vld [vmem:[#allocation26 + $0xc0] sm:$0xff] }
 0x914   :  { %7809 = vmatprep.subr.mxu1 %v3678_v61  ;;  %7780 = vmatprep.subr.mxu0 %v3580_v62 }
 0x915   :  { %7810 = vmatpush3.msra.mxu1 %v3678_v61  ;;  %7781 = vmatpush3.msra.mxu0 %v3580_v62  ;;  %v3999_v61 = vld [vmem:[#allocation26 + $0xb8] sm:$0xff]  ;;  %v3998_v62 = vld [vmem:[#allocation26 + $0xb0] sm:$0xff] }
 0x916   :  { %7811 = vmatprep.subr.mxu1 %v3677_v59  ;;  %7782 = vmatprep.subr.mxu0 %v3579_v63 }
 0x917   :  { %7812 = vmatpush3.msra.mxu1 %v3677_v59  ;;  %7783 = vmatpush3.msra.mxu0 %v3579_v63  ;;  %v3997_v59 = vld [vmem:[#allocation26 + $0xa8] sm:$0xff] }
 0x918   :  { %7813 = vmatprep.subr.mxu1 %v3676_v0  ;;  %7784 = vmatprep.subr.mxu0 %v3578_v2  ;;  %v3982_v63 = vld [vmem:[#allocation26 + $0x48] sm:$0xff] }
 0x919   :  { %7814 = vmatpush3.msra.mxu1 %v3676_v0  ;;  %7785 = vmatpush3.msra.mxu0 %v3578_v2  ;;  %v3996_v0 = vld [vmem:[#allocation26 + $0xa0] sm:$0xff] }
 0x91a   :  { %7815 = vmatprep.subr.mxu1 %v3675_v3  ;;  %7787 = vmatmul.mubr.f32.vlgmr.msra.gmra.mxu0 %v3576_v6  ;;  %v3981_v2 = vld [vmem:[#allocation26 + $0x40] sm:$0xff]  ;;  %v3979_v6 = vld [vmem:[#allocation26 + $0x30] sm:$0xff] }
 0x91b   :  { %7816 = vmatpush3.msra.mxu1 %v3675_v3  ;;  %7824 = vmatprep.subr.mxu0 %v3784_v4  ;;  %v3995_v3 = vld [vmem:[#allocation26 + $0x98] sm:$0xff] }
 0x91c   :  { %7817 = vmatprep.subr.mxu1 %v3674_v5  ;;  %7825 = vmatpush3.msra.mxu0 %v3784_v4  ;;  %v3980_v4 = vld [vmem:[#allocation26 + $0x38] sm:$0xff] }
 0x91d   :  { %7818 = vmatpush3.msra.mxu1 %v3674_v5  ;;  %7856 = vmatprep.mubr.f32.mxu0 %v3766_v9  ;;  %v3994_v5 = vld [vmem:[#allocation26 + $0x90] sm:$0xff]  ;;  %v3977_v9 = vld [vmem:[#allocation26 + $0x20] sm:$0xff] }
 0x91e   :  { %7819 = vmatprep.subr.mxu1 %v3673_v7  ;;  %7826 = vmatprep.subr.mxu0 %v3783_v8 }
 0x91f   :  { %7820 = vmatpush3.msra.mxu1 %v3673_v7  ;;  %7827 = vmatpush3.msra.mxu0 %v3783_v8  ;;  %v3978_v7 = vld [vmem:[#allocation26 + $0x28] sm:$0xff] }
 0x920   :  { %7822 = vmatmul.mubr.f32.vlgmr.msra.gmra.mxu1 %v3672_v11  ;;  %7859 = vmatprep.subr.mxu1 %v3880_v10  ;;  %v3993_v8 = vld [vmem:[#allocation26 + $0x88] sm:$0xff]  ;;  %v3976_v11 = vld [vmem:[#allocation26 + $0x18] sm:$0xff] }
 0x921   :  { %7860 = vmatpush3.msra.mxu1 %v3880_v10  ;;  %7891 = vmatprep.mubr.f32.mxu1 %v3862_v14  ;;  %v3992_v10 = vld [vmem:[#allocation26 + $0x80] sm:$0xff]  ;;  %v3974_v14 = vld [vmem:[#allocation26 + $0x8] sm:$0xff] }
 0x922   :  { %7861 = vmatprep.subr.mxu1 %v3879_v12  ;;  %7828 = vmatprep.subr.mxu0 %v3782_v13 }
 0x923   :  { %7862 = vmatpush3.msra.mxu1 %v3879_v12  ;;  %7829 = vmatpush3.msra.mxu0 %v3782_v13  ;;  %v4176_v12 = vld [vmem:[#allocation26 + $0x178] sm:$0xff]  ;;  %v3975_v13 = vld [vmem:[#allocation26 + $0x10] sm:$0xff] }
 0x924   :  { %7863 = vmatprep.subr.mxu1 %v3878_v15  ;;  %7830 = vmatprep.subr.mxu0 %v3781_v16 }
 0x925   :  { %7864 = vmatpush3.msra.mxu1 %v3878_v15  ;;  %7831 = vmatpush3.msra.mxu0 %v3781_v16  ;;  %v3973_v15 = vld [vmem:[#allocation26] sm:$0xff] }
 0x926   :  { %7865 = vmatprep.subr.mxu1 %v3877_v18  ;;  %7832 = vmatprep.subr.mxu0 %v3780_v19 }
 0x927   :  { %7866 = vmatpush3.msra.mxu1 %v3877_v18  ;;  %7833 = vmatpush3.msra.mxu0 %v3780_v19 }
 0x928   :  { %7867 = vmatprep.subr.mxu1 %v3876_v23  ;;  %7834 = vmatprep.subr.mxu0 %v3779_v24 }
 0x929   :  { %7868 = vmatpush3.msra.mxu1 %v3876_v23  ;;  %7835 = vmatpush3.msra.mxu0 %v3779_v24 }
 0x92a   :  { %7869 = vmatprep.subr.mxu1 %v3875_v25  ;;  %7836 = vmatprep.subr.mxu0 %v3778_v26 }
 0x92b   :  { %7870 = vmatpush3.msra.mxu1 %v3875_v25  ;;  %7837 = vmatpush3.msra.mxu0 %v3778_v26 }
 0x92c   :  { %7871 = vmatprep.subr.mxu1 %v3874_v27  ;;  %7838 = vmatprep.subr.mxu0 %v3777_v21 }
 0x92d   :  { %7872 = vmatpush3.msra.mxu1 %v3874_v27  ;;  %7839 = vmatpush3.msra.mxu0 %v3777_v21 }
 0x92e   :  { %7873 = vmatprep.subr.mxu1 %v3873_v22  ;;  %7840 = vmatprep.subr.mxu0 %v3776_v31 }
 0x92f   :  { %7874 = vmatpush3.msra.mxu1 %v3873_v22  ;;  %7841 = vmatpush3.msra.mxu0 %v3776_v31 }
 0x930   :  { %7875 = vmatprep.subr.mxu1 %v3872_v32  ;;  %7842 = vmatprep.subr.mxu0 %v3775_v33 }
 0x931   :  { %7876 = vmatpush3.msra.mxu1 %v3872_v32  ;;  %7843 = vmatpush3.msra.mxu0 %v3775_v33 }
 0x932   :  { %7877 = vmatprep.subr.mxu1 %v3871_v34  ;;  %7844 = vmatprep.subr.mxu0 %v3774_v36 }
 0x933   :  { %7878 = vmatpush3.msra.mxu1 %v3871_v34  ;;  %7845 = vmatpush3.msra.mxu0 %v3774_v36 }
 0x934   :  { %7879 = vmatprep.subr.mxu1 %v3870_v37  ;;  %7846 = vmatprep.subr.mxu0 %v3773_v38 }
 0x935   :  { %7880 = vmatpush3.msra.mxu1 %v3870_v37  ;;  %7847 = vmatpush3.msra.mxu0 %v3773_v38 }
 0x936   :  { %7881 = vmatprep.subr.mxu1 %v3869_v29  ;;  %7848 = vmatprep.subr.mxu0 %v3772_v30 }
 0x937   :  { %7882 = vmatpush3.msra.mxu1 %v3869_v29  ;;  %7849 = vmatpush3.msra.mxu0 %v3772_v30  ;;  %v6222_v29 = vld [vmem:[#allocation24] ss:$0 sm:$0xff] }
 0x938   :  { %7883 = vmatprep.subr.mxu1 %v3868_v39  ;;  %7850 = vmatprep.subr.mxu0 %v3771_v35 }
 0x939   :  { %7884 = vmatpush3.msra.mxu1 %v3868_v39  ;;  %7851 = vmatpush3.msra.mxu0 %v3771_v35 }
 0x93a   :  { %7885 = vmatprep.subr.mxu1 %v3867_v40  ;;  %7852 = vmatprep.subr.mxu0 %v3770_v41 }
 0x93b   :  { %7886 = vmatpush3.msra.mxu1 %v3867_v40  ;;  %7853 = vmatpush3.msra.mxu0 %v3770_v41 }
 0x93c   :  { %7887 = vmatprep.subr.mxu1 %v3866_v42  ;;  %7854 = vmatprep.subr.mxu0 %v3769_v43 }
 0x93d   :  { %7888 = vmatpush3.msra.mxu1 %v3866_v42  ;;  %7855 = vmatpush3.msra.mxu0 %v3769_v43 }
 0x93e   :  { %7889 = vmatprep.subr.mxu1 %v3865_v45  ;;  %7857 = vmatmul.mubr.f32.vlgmr.msra.gmra.mxu0 %v3767_v17 }
 0x93f   :  { %7890 = vmatpush3.msra.mxu1 %v3865_v45  ;;  %7894 = vmatprep.subr.mxu0 %v4007_v47 }
 0x940   :  { %7892 = vmatmul.mubr.f32.vlgmr.msra.gmra.mxu1 %v3863_v46  ;;  %7929 = vmatprep.subr.mxu1 %v3988_v48  ;;  %v4175_v46 = vld [vmem:[#allocation26 + $0x170] sm:$0xff] }
 0x941   :  { %7895 = vmatpush3.msra.mxu0 %v4007_v47  ;;  %7930 = vmatpush3.msra.mxu1 %v3988_v48  ;;  %v4174_v47 = vld [vmem:[#allocation26 + $0x168] sm:$0xff]  ;;  %v4173_v48 = vld [vmem:[#allocation26 + $0x160] sm:$0xff] }
 0x942   :  { %7896 = vmatprep.subr.mxu0 %v4006_v49  ;;  %7931 = vmatprep.subr.mxu1 %v3987_v50 }
 0x943   :  { %7897 = vmatpush3.msra.mxu0 %v4006_v49  ;;  %7932 = vmatpush3.msra.mxu1 %v3987_v50 }
 0x944   :  { %7898 = vmatprep.subr.mxu0 %v4005_v51  ;;  %7933 = vmatprep.subr.mxu1 %v3986_v20 }
 0x945   :  { %7899 = vmatpush3.msra.mxu0 %v4005_v51  ;;  %7934 = vmatpush3.msra.mxu1 %v3986_v20  ;;  %v4172_v51 = vld [vmem:[#allocation26 + $0x158] sm:$0xff] }
 0x946   :  { %7900 = vmatprep.subr.mxu0 %v4004_v58  ;;  %7935 = vmatprep.subr.mxu1 %v3985_v52 }
 0x947   :  { %7901 = vmatpush3.msra.mxu0 %v4004_v58  ;;  %7936 = vmatpush3.msra.mxu1 %v3985_v52  ;;  %v4171_v58 = vld [vmem:[#allocation26 + $0x150] sm:$0xff]  ;;  %v4170_v52 = vld [vmem:[#allocation26 + $0x148] sm:$0xff] }
 0x948   :  { %7902 = vmatprep.subr.mxu0 %v4003_v53  ;;  %7937 = vmatprep.subr.mxu1 %v3984_v54 }
 0x949   :  { %7903 = vmatpush3.msra.mxu0 %v4003_v53  ;;  %7938 = vmatpush3.msra.mxu1 %v3984_v54  ;;  %v4169_v53 = vld [vmem:[#allocation26 + $0x140] sm:$0xff]  ;;  %v4168_v54 = vld [vmem:[#allocation26 + $0x138] sm:$0xff] }
 0x94a   :  { %7904 = vmatprep.subr.mxu0 %v4002_v55  ;;  %7939 = vmatprep.subr.mxu1 %v3983_v56 }
 0x94b   :  { %7905 = vmatpush3.msra.mxu0 %v4002_v55  ;;  %7940 = vmatpush3.msra.mxu1 %v3983_v56  ;;  %v4167_v55 = vld [vmem:[#allocation26 + $0x130] sm:$0xff]  ;;  %v4166_v56 = vld [vmem:[#allocation26 + $0x128] sm:$0xff] }
 0x94c   :  { %7906 = vmatprep.subr.mxu0 %v4001_v57  ;;  %7941 = vmatprep.subr.mxu1 %v3982_v63 }
 0x94d   :  { %7907 = vmatpush3.msra.mxu0 %v4001_v57  ;;  %7942 = vmatpush3.msra.mxu1 %v3982_v63  ;;  %v4165_v57 = vld [vmem:[#allocation26 + $0x120] sm:$0xff] }
 0x94e   :  { %7908 = vmatprep.subr.mxu0 %v4000_v60  ;;  %7943 = vmatprep.subr.mxu1 %v3981_v2 }
 0x94f   :  { %7909 = vmatpush3.msra.mxu0 %v4000_v60  ;;  %7944 = vmatpush3.msra.mxu1 %v3981_v2  ;;  %v4164_v60 = vld [vmem:[#allocation26 + $0x118] sm:$0xff] }
 0x950   :  { %7910 = vmatprep.subr.mxu0 %v3999_v61  ;;  %7945 = vmatprep.subr.mxu1 %v3980_v4  ;;  %v4372_v2 = vld [vmem:[#allocation29 + $0xf8] sm:$0xff] }
 0x951   :  { %7911 = vmatpush3.msra.mxu0 %v3999_v61  ;;  %7946 = vmatpush3.msra.mxu1 %v3980_v4  ;;  %v4163_v61 = vld [vmem:[#allocation26 + $0x110] sm:$0xff] }
 0x952   :  { %7912 = vmatprep.subr.mxu0 %v3998_v62  ;;  %7947 = vmatprep.subr.mxu1 %v3979_v6  ;;  %v4371_v4 = vld [vmem:[#allocation29 + $0xf0] sm:$0xff] }
 0x953   :  { %7913 = vmatpush3.msra.mxu0 %v3998_v62  ;;  %7948 = vmatpush3.msra.mxu1 %v3979_v6  ;;  %v4162_v62 = vld [vmem:[#allocation26 + $0x108] sm:$0xff] }
 0x954   :  { %7914 = vmatprep.subr.mxu0 %v3997_v59  ;;  %7949 = vmatprep.subr.mxu1 %v3978_v7  ;;  %v4370_v6 = vld [vmem:[#allocation29 + $0xe8] sm:$0xff] }
 0x955   :  { %7915 = vmatpush3.msra.mxu0 %v3997_v59  ;;  %7950 = vmatpush3.msra.mxu1 %v3978_v7  ;;  %v4161_v59 = vld [vmem:[#allocation26 + $0x100] sm:$0xff] }
 0x956   :  { %7916 = vmatprep.subr.mxu0 %v3996_v0  ;;  %7951 = vmatprep.subr.mxu1 %v3977_v9  ;;  %v4277_v7 = vld [vmem:[#allocation29 + $0x60] sm:$0xff] }
 0x957   :  { %7917 = vmatpush3.msra.mxu0 %v3996_v0  ;;  %7952 = vmatpush3.msra.mxu1 %v3977_v9  ;;  %v4280_v0 = vld [vmem:[#allocation29 + $0x78] sm:$0xff] }
 0x958   :  { %7918 = vmatprep.subr.mxu0 %v3995_v3  ;;  %7953 = vmatprep.subr.mxu1 %v3976_v11  ;;  %v4276_v9 = vld [vmem:[#allocation29 + $0x58] sm:$0xff] }
 0x959   :  { %7919 = vmatpush3.msra.mxu0 %v3995_v3  ;;  %7954 = vmatpush3.msra.mxu1 %v3976_v11  ;;  %v4279_v3 = vld [vmem:[#allocation29 + $0x70] sm:$0xff] }
 0x95a   :  { %7920 = vmatprep.subr.mxu0 %v3994_v5  ;;  %7955 = vmatprep.subr.mxu1 %v3975_v13  ;;  %v4275_v11 = vld [vmem:[#allocation29 + $0x50] sm:$0xff] }
 0x95b   :  { %7921 = vmatpush3.msra.mxu0 %v3994_v5  ;;  %7956 = vmatpush3.msra.mxu1 %v3975_v13  ;;  %v4278_v5 = vld [vmem:[#allocation29 + $0x68] sm:$0xff] }
 0x95c   :  { %7922 = vmatprep.subr.mxu0 %v3993_v8  ;;  %7957 = vmatprep.subr.mxu1 %v3974_v14  ;;  %v4274_v13 = vld [vmem:[#allocation29 + $0x48] sm:$0xff] }
 0x95d   :  { %7923 = vmatpush3.msra.mxu0 %v3993_v8  ;;  %7958 = vmatpush3.msra.mxu1 %v3974_v14  ;;  %v4369_v8 = vld [vmem:[#allocation29 + $0xe0] sm:$0xff]  ;;  %v4366_v14 = vld [vmem:[#allocation29 + $0xc8] sm:$0xff] }
 0x95e   :  { %7924 = vmatprep.subr.mxu0 %v3992_v10  ;;  %7959 = vmatprep.subr.mxu1 %v3973_v15 }
 0x95f   :  { %7925 = vmatpush3.msra.mxu0 %v3992_v10  ;;  %7960 = vmatpush3.msra.mxu1 %v3973_v15  ;;  %v4368_v10 = vld [vmem:[#allocation29 + $0xd8] sm:$0xff]  ;;  %v4273_v15 = vld [vmem:[#allocation29 + $0x40] sm:$0xff] }
 0x960   :  { %7964 = vmatprep.subr.mxu0 %v4176_v12  ;;  %7999 = vmatprep.subr.mxu1 %v4280_v0 }
 0x9b8   :  { %v7718_v16 = vpop.f32.mrf.mxu0 }
 0x9ba   :  { %v3491_v19 = vpop.f32.mrf.mxu0 }
 0x9c0   :  { %v7753_v18 = vpop.f32.mrf.mxu1 }
 0x9c1   :  { %v3572_v26 = vadd.f32 %v7753_v18, %v7718_v16  ;;  %v4365_v16 = vld [vmem:[#allocation29 + $0xc0] sm:$0xff]  ;;  %v4272_v18 = vld [vmem:[#allocation29 + $0x38] sm:$0xff] }
 0x9c2   :  { %v3566_v23 = vpop.f32.mrf.mxu1 }
 0x9c3   :  { %v3567_v21 = vadd.f32 %v3566_v23, %v3491_v19  ;;  %v4364_v19 = vld [vmem:[#allocation29 + $0xb8] sm:$0xff]  ;;  %v4271_v23 = vld [vmem:[#allocation29 + $0x30] sm:$0xff] }
 0x9da   :  { %v7788_v24 = vpop.f32.mrf.mxu0 }
 0x9db   :  { %v3670_v22 = vadd.f32 %v7788_v24, %v3572_v26  ;;  %v4363_v24 = vld [vmem:[#allocation29 + $0xb0] sm:$0xff]  ;;  %v4362_v26 = vld [vmem:[#allocation29 + $0xa8] sm:$0xff] }
 0x9dc   :  { %v3660_v27 = vpop.f32.mrf.mxu0 }
 0x9dd   :  { %v3669_v33 = vadd.f32 %v3660_v27, %v3567_v21  ;;  %v4269_v27 = vld [vmem:[#allocation29 + $0x20] sm:$0xff] }
 0x9de   :  { %v4361_v21 = vld [vmem:[#allocation29 + $0xa0] sm:$0xff] }
 0x9e0   :  { %v7823_v25 = vpop.f32.mrf.mxu1 }
 0x9e1   :  { %v3765_v32 = vadd.f32 %v7823_v25, %v3670_v22  ;;  %v4270_v25 = vld [vmem:[#allocation29 + $0x28] sm:$0xff]  ;;  %v4268_v22 = vld [vmem:[#allocation29 + $0x18] sm:$0xff] }
 0x9e2   :  { %v3755_v31 = vpop.f32.mrf.mxu1 }
 0x9e3   :  { %v3764_v36 = vadd.f32 %v3755_v31, %v3669_v33  ;;  %v4360_v31 = vld [vmem:[#allocation29 + $0x98] sm:$0xff]  ;;  %v4359_v33 = vld [vmem:[#allocation29 + $0x90] sm:$0xff] }
 0x9fe   :  { %v7858_v34 = vpop.f32.mrf.mxu0 }
 0x9ff   :  { %v3861_v37 = vadd.f32 %v7858_v34, %v3765_v32  ;;  %v4267_v32 = vld [vmem:[#allocation29 + $0x10] sm:$0xff]  ;;  %v4266_v34 = vld [vmem:[#allocation29 + $0x8] sm:$0xff] }
 0xa00   :  { %v7893_v38 = vpop.f32.mrf.mxu1  ;;  %v3851_v30 = vpop.f32.mrf.mxu0 }
 0xa01   :  { %v3957_v39 = vadd.f32 %v7893_v38, %v3861_v37  ;;  %v3860_v35 = vadd.f32 %v3851_v30, %v3764_v36  ;;  %v4358_v36 = vld [vmem:[#allocation29 + $0x88] sm:$0xff]  ;;  %v4265_v37 = vld [vmem:[#allocation29] sm:$0xff] }
 0xa02   :  { %v3947_v40 = vpop.f32.mrf.mxu1  ;;  %v4357_v38 = vld [vmem:[#allocation29 + $0x80] sm:$0xff] }
 0xa03   :  { %v3966_v41 = vadd.f32 %v6222_v29, %v3957_v39  ;;  %v3956_v42 = vadd.f32 %v3947_v40, %v3860_v35  ;;  %v4914_v30 = vld [vmem:[#allocation32 + $0x78] sm:$0xff] }
 0xa05   :  { %v3968_v43 = vmax.f32 %v3966_v41, 0.0  ;;  %v3965_v45 = vadd.f32 %v6222_v29, %v3956_v42  ;;  %v4935_v29 = vld [vmem:[#allocation32 + $0xf8] sm:$0xff] }
 0xa07   :  { %3970 = vst [vmem:[#allocation10 + $0x11] sm:$0xff] %v3968_v43  ;;  %v3967_v17 = vmax.f32 %v3965_v45, 0.0 }
 0xa09   :  { %3969 = vst [vmem:[#allocation10 + $0x1] sm:$0xff] %v3967_v17  ;;  %7926 = vmatprep.mubr.f32.mxu0 %v3967_v17 }
 0xa0a   :  { %7927 = vmatmul.mubr.f32.vlgmr.msra.gmra.mxu0 %v3968_v43 }
 0xa0b   :  { %7965 = vmatpush3.msra.mxu0 %v4176_v12  ;;  %v4367_v12 = vld [vmem:[#allocation29 + $0xd0] sm:$0xff] }
 0xa0c   :  { %7966 = vmatprep.subr.mxu0 %v4175_v46 }
 0xa0d   :  { %7967 = vmatpush3.msra.mxu0 %v4175_v46  ;;  %v6223_v46 = vld [vmem:[#allocation27] ss:$0 sm:$0xff] }
 0xa0e   :  { %7968 = vmatprep.subr.mxu0 %v4174_v47  ;;  %v3972_v20 = vld [vmem:[#allocation10 + $0x10] sm:$0xff] }
 0xa0f   :  { %7969 = vmatpush3.msra.mxu0 %v4174_v47  ;;  %v4159_v63 = vld [vmem:[#allocation10 + $0x12] sm:$0xff] }
 0xa10   :  { %v3971_v49 = vld [vmem:[#allocation10] sm:$0xff]  ;;  %7970 = vmatprep.subr.mxu0 %v4173_v48 }
 0xa11   :  { %v4158_v50 = vld [vmem:[#allocation10 + $0x2] sm:$0xff]  ;;  %7961 = vmatprep.mubr.f32.mxu1 %v3971_v49  ;;  %7971 = vmatpush3.msra.mxu0 %v4173_v48 }
 0xa12   :  { %7996 = vmatprep.mubr.f32.mxu0 %v4158_v50  ;;  %7962 = vmatmul.mubr.f32.vlgmr.msra.gmra.mxu1 %v3972_v20 }
 0xa13   :  { %7972 = vmatprep.subr.mxu0 %v4172_v51  ;;  %8000 = vmatpush3.msra.mxu1 %v4280_v0  ;;  %v4909_v0 = vld [vmem:[#allocation32 + $0x50] sm:$0xff] }
 0xa14   :  { %7973 = vmatpush3.msra.mxu0 %v4172_v51  ;;  %8001 = vmatprep.subr.mxu1 %v4279_v3 }
 0xa15   :  { %7974 = vmatprep.subr.mxu0 %v4171_v58  ;;  %8002 = vmatpush3.msra.mxu1 %v4279_v3  ;;  %v4908_v3 = vld [vmem:[#allocation32 + $0x48] sm:$0xff] }
 0xa16   :  { %7975 = vmatpush3.msra.mxu0 %v4171_v58  ;;  %8003 = vmatprep.subr.mxu1 %v4278_v5  ;;  %v4934_v58 = vld [vmem:[#allocation32 + $0xf0] sm:$0xff] }
 0xa17   :  { %7976 = vmatprep.subr.mxu0 %v4170_v52  ;;  %8004 = vmatpush3.msra.mxu1 %v4278_v5  ;;  %v4907_v5 = vld [vmem:[#allocation32 + $0x40] sm:$0xff] }
 0xa18   :  { %7977 = vmatpush3.msra.mxu0 %v4170_v52  ;;  %8005 = vmatprep.subr.mxu1 %v4277_v7  ;;  %v4913_v52 = vld [vmem:[#allocation32 + $0x70] sm:$0xff] }
 0xa19   :  { %7978 = vmatprep.subr.mxu0 %v4169_v53  ;;  %8006 = vmatpush3.msra.mxu1 %v4277_v7  ;;  %v4906_v7 = vld [vmem:[#allocation32 + $0x38] sm:$0xff] }
 0xa1a   :  { %7979 = vmatpush3.msra.mxu0 %v4169_v53  ;;  %8007 = vmatprep.subr.mxu1 %v4276_v9  ;;  %v4933_v53 = vld [vmem:[#allocation32 + $0xe8] sm:$0xff] }
 0xa1b   :  { %7980 = vmatprep.subr.mxu0 %v4168_v54  ;;  %8008 = vmatpush3.msra.mxu1 %v4276_v9  ;;  %v4905_v9 = vld [vmem:[#allocation32 + $0x30] sm:$0xff] }
 0xa1c   :  { %7981 = vmatpush3.msra.mxu0 %v4168_v54  ;;  %8009 = vmatprep.subr.mxu1 %v4275_v11  ;;  %v4932_v54 = vld [vmem:[#allocation32 + $0xe0] sm:$0xff] }
 0xa1d   :  { %7982 = vmatprep.subr.mxu0 %v4167_v55  ;;  %8010 = vmatpush3.msra.mxu1 %v4275_v11  ;;  %v4904_v11 = vld [vmem:[#allocation32 + $0x28] sm:$0xff] }
 0xa1e   :  { %7983 = vmatpush3.msra.mxu0 %v4167_v55  ;;  %8011 = vmatprep.subr.mxu1 %v4274_v13  ;;  %v4931_v55 = vld [vmem:[#allocation32 + $0xd8] sm:$0xff] }
 0xa1f   :  { %7984 = vmatprep.subr.mxu0 %v4166_v56  ;;  %8012 = vmatpush3.msra.mxu1 %v4274_v13  ;;  %v4903_v13 = vld [vmem:[#allocation32 + $0x20] sm:$0xff] }
 0xa20   :  { %7985 = vmatpush3.msra.mxu0 %v4166_v56  ;;  %8013 = vmatprep.subr.mxu1 %v4273_v15  ;;  %v4930_v56 = vld [vmem:[#allocation32 + $0xd0] sm:$0xff] }
 0xa21   :  { %7986 = vmatprep.subr.mxu0 %v4165_v57  ;;  %8014 = vmatpush3.msra.mxu1 %v4273_v15  ;;  %v4902_v15 = vld [vmem:[#allocation32 + $0x18] sm:$0xff] }
 0xa22   :  { %7987 = vmatpush3.msra.mxu0 %v4165_v57  ;;  %8015 = vmatprep.subr.mxu1 %v4272_v18  ;;  %v4912_v57 = vld [vmem:[#allocation32 + $0x68] sm:$0xff] }
 0xa23   :  { %7988 = vmatprep.subr.mxu0 %v4164_v60  ;;  %8016 = vmatpush3.msra.mxu1 %v4272_v18  ;;  %v9737_v18 = vld [vmem:[#allocation32 + $0x178] sm:$0xff] }
 0xa24   :  { %7989 = vmatpush3.msra.mxu0 %v4164_v60  ;;  %8017 = vmatprep.subr.mxu1 %v4271_v23  ;;  %v4929_v60 = vld [vmem:[#allocation32 + $0xc8] sm:$0xff] }
 0xa25   :  { %7990 = vmatprep.subr.mxu0 %v4163_v61  ;;  %8018 = vmatpush3.msra.mxu1 %v4271_v23  ;;  %v4899_v23 = vld [vmem:[#allocation32] sm:$0xff] }
 0xa26   :  { %7991 = vmatpush3.msra.mxu0 %v4163_v61  ;;  %8019 = vmatprep.subr.mxu1 %v4270_v25  ;;  %v4911_v61 = vld [vmem:[#allocation32 + $0x60] sm:$0xff] }
 0xa27   :  { %7992 = vmatprep.subr.mxu0 %v4162_v62  ;;  %8020 = vmatpush3.msra.mxu1 %v4270_v25  ;;  %v6224_v25 = vld [vmem:[#allocation30] ss:$0 sm:$0xff] }
 0xa28   :  { %7993 = vmatpush3.msra.mxu0 %v4162_v62  ;;  %8021 = vmatprep.subr.mxu1 %v4269_v27  ;;  %v4928_v62 = vld [vmem:[#allocation32 + $0xc0] sm:$0xff] }
 0xa29   :  { %7994 = vmatprep.subr.mxu0 %v4161_v59  ;;  %8022 = vmatpush3.msra.mxu1 %v4269_v27  ;;  %v9744_v27 = vrot.slane %v6224_v25, %v9300_v44 }
 0xa2a   :  { %7995 = vmatpush3.msra.mxu0 %v4161_v59  ;;  %8023 = vmatprep.subr.mxu1 %v4268_v22  ;;  %v4910_v59 = vld [vmem:[#allocation32 + $0x58] sm:$0xff] }
 0xa2b   :  { %7997 = vmatmul.mubr.f32.vlgmr.msra.gmra.mxu0 %v4159_v63  ;;  %8034 = vmatprep.subr.mxu0 %v4372_v2  ;;  %v4927_v63 = vld [vmem:[#allocation32 + $0xb8] sm:$0xff] }
 0xa2c   :  { %8035 = vmatpush3.msra.mxu0 %v4372_v2  ;;  %8024 = vmatpush3.msra.mxu1 %v4268_v22  ;;  %v4926_v2 = vld [vmem:[#allocation32 + $0xb0] sm:$0xff] }
 0xa2d   :  { %8036 = vmatprep.subr.mxu0 %v4371_v4  ;;  %8025 = vmatprep.subr.mxu1 %v4267_v32 }
 0xa2e   :  { %8037 = vmatpush3.msra.mxu0 %v4371_v4  ;;  %8026 = vmatpush3.msra.mxu1 %v4267_v32  ;;  %v4925_v4 = vld [vmem:[#allocation32 + $0xa8] sm:$0xff] }
 0xa2f   :  { %8038 = vmatprep.subr.mxu0 %v4370_v6  ;;  %8027 = vmatprep.subr.mxu1 %v4266_v34 }
 0xa30   :  { %8039 = vmatpush3.msra.mxu0 %v4370_v6  ;;  %8028 = vmatpush3.msra.mxu1 %v4266_v34  ;;  %v4924_v6 = vld [vmem:[#allocation32 + $0xa0] sm:$0xff] }
 0xa31   :  { %8040 = vmatprep.subr.mxu0 %v4369_v8  ;;  %8029 = vmatprep.subr.mxu1 %v4265_v37 }
 0xa32   :  { %8041 = vmatpush3.msra.mxu0 %v4369_v8  ;;  %8030 = vmatpush3.msra.mxu1 %v4265_v37  ;;  %v4923_v8 = vld [vmem:[#allocation32 + $0x98] sm:$0xff]  ;;  %v9753_v37 = vcombine.high %v9744_v27, %v9744_v27 }
 0xa33   :  { %8042 = vmatprep.subr.mxu0 %v4368_v10  ;;  %8069 = vmatprep.subr.mxu1 %v4935_v29 }
 0xa34   :  { %8043 = vmatpush3.msra.mxu0 %v4368_v10  ;;  %v4922_v10 = vld [vmem:[#allocation32 + $0x90] sm:$0xff] }
 0xa35   :  { %8044 = vmatprep.subr.mxu0 %v4367_v12 }
 0xa36   :  { %8045 = vmatpush3.msra.mxu0 %v4367_v12  ;;  %v4921_v12 = vld [vmem:[#allocation32 + $0x88] sm:$0xff] }
 0xa37   :  { %8046 = vmatprep.subr.mxu0 %v4366_v14 }
 0xa38   :  { %8047 = vmatpush3.msra.mxu0 %v4366_v14  ;;  %v4920_v14 = vld [vmem:[#allocation32 + $0x80] sm:$0xff] }
 0xa39   :  { %8048 = vmatprep.subr.mxu0 %v4365_v16 }
 0xa3a   :  { %8049 = vmatpush3.msra.mxu0 %v4365_v16  ;;  %v4901_v16 = vld [vmem:[#allocation32 + $0x10] sm:$0xff] }
 0xa3b   :  { %8050 = vmatprep.subr.mxu0 %v4364_v19 }
 0xa3c   :  { %8051 = vmatpush3.msra.mxu0 %v4364_v19  ;;  %v4900_v19 = vld [vmem:[#allocation32 + $0x8] sm:$0xff] }
 0xa3d   :  { %8052 = vmatprep.subr.mxu0 %v4363_v24 }
 0xa3e   :  { %8053 = vmatpush3.msra.mxu0 %v4363_v24  ;;  %v9740_v24 = vld [vmem:[#allocation33 + $0x78] sm:$0xff] }
 0xa3f   :  { %8054 = vmatprep.subr.mxu0 %v4362_v26 }
 0xa40   :  { %8055 = vmatpush3.msra.mxu0 %v4362_v26  ;;  %v4766_v26 = vcombine.high %v6224_v25, %v6224_v25 }
 0xa41   :  { %8056 = vmatprep.subr.mxu0 %v4361_v21 }
 0xa42   :  { %8057 = vmatpush3.msra.mxu0 %v4361_v21 }
 0xa43   :  { %8058 = vmatprep.subr.mxu0 %v4360_v31 }
 0xa44   :  { %8059 = vmatpush3.msra.mxu0 %v4360_v31  ;;  %v9747_v31 = vrot.slane %v4766_v26, %v9300_v44 }
 0xa45   :  { %8060 = vmatprep.subr.mxu0 %v4359_v33 }
 0xa46   :  { %8061 = vmatpush3.msra.mxu0 %v4359_v33 }
 0xa47   :  { %8062 = vmatprep.subr.mxu0 %v4358_v36 }
 0xa48   :  { %8063 = vmatpush3.msra.mxu0 %v4358_v36 }
 0xa49   :  { %8064 = vmatprep.subr.mxu0 %v4357_v38 }
 0xa4a   :  { %8065 = vmatpush3.msra.mxu0 %v4357_v38 }
 0xa4b   :  { %8107 = vmatprep.subr.mxu0 %v4914_v30 }
 0xaca   :  { %v7928_v39 = vpop.f32.mrf.mxu0 }
 0xacc   :  { %v4074_v40 = vpop.f32.mrf.mxu0 }
 0xad2   :  { %v7963_v35 = vpop.f32.mrf.mxu1 }
 0xad3   :  { %v4155_v42 = vadd.f32 %v7963_v35, %v7928_v39 }
 0xad4   :  { %v4149_v41 = vpop.f32.mrf.mxu1 }
 0xad5   :  { %v4150_v45 = vadd.f32 %v4149_v41, %v4074_v40 }
 0xaeb   :  { %v7998_v43 = vpop.f32.mrf.mxu0 }
 0xaec   :  { %v4253_v17 = vadd.f32 %v7998_v43, %v4155_v42  ;;  %v9761_v42 = vcombine.high %v9747_v31, %v9747_v31 }
 0xaed   :  { %v4243_v47 = vpop.f32.mrf.mxu0 }
 0xaee   :  { %v4252_v48 = vadd.f32 %v4243_v47, %v4150_v45  ;;  %v4262_v49 = vadd.f32 %v6223_v46, %v4253_v17 }
 0xaf0   :  { %v4261_v50 = vadd.f32 %v6223_v46, %v4252_v48  ;;  %v4264_v20 = vmax.f32 %v4262_v49, 0.0 }
 0xaf2   :  { %v4263_v51 = vmax.f32 %v4261_v50, 0.0 }
 0xaf4   :  { %8031 = vmatprep.mubr.f32.mxu1 %v4263_v51  ;;  %8066 = vmatprep.mubr.f32.mxu0 %v4263_v51 }
 0xaf5   :  { %8032 = vmatmul.mubr.f32.vlgmr.msra.gmra.mxu1 %v4264_v20  ;;  %8067 = vmatmul.mubr.f32.vlgmr.msra.gmra.mxu0 %v4264_v20 }
 0xaf6   :  { %8070 = vmatpush3.msra.mxu1 %v4935_v29  ;;  %8108 = vmatpush3.msra.mxu0 %v4914_v30 }
 0xaf7   :  { %8071 = vmatprep.subr.mxu1 %v4934_v58  ;;  %8109 = vmatprep.subr.mxu0 %v4913_v52 }
 0xaf8   :  { %8072 = vmatpush3.msra.mxu1 %v4934_v58  ;;  %8110 = vmatpush3.msra.mxu0 %v4913_v52 }
 0xaf9   :  { %8073 = vmatprep.subr.mxu1 %v4933_v53  ;;  %8111 = vmatprep.subr.mxu0 %v4912_v57 }
 0xafa   :  { %8074 = vmatpush3.msra.mxu1 %v4933_v53  ;;  %8112 = vmatpush3.msra.mxu0 %v4912_v57 }
 0xafb   :  { %8075 = vmatprep.subr.mxu1 %v4932_v54  ;;  %8113 = vmatprep.subr.mxu0 %v4911_v61 }
 0xafc   :  { %8076 = vmatpush3.msra.mxu1 %v4932_v54  ;;  %8114 = vmatpush3.msra.mxu0 %v4911_v61 }
 0xafd   :  { %8077 = vmatprep.subr.mxu1 %v4931_v55  ;;  %8115 = vmatprep.subr.mxu0 %v4910_v59 }
 0xafe   :  { %8078 = vmatpush3.msra.mxu1 %v4931_v55  ;;  %8116 = vmatpush3.msra.mxu0 %v4910_v59 }
 0xaff   :  { %8079 = vmatprep.subr.mxu1 %v4930_v56  ;;  %8117 = vmatprep.subr.mxu0 %v4909_v0 }
 0xb00   :  { %8080 = vmatpush3.msra.mxu1 %v4930_v56  ;;  %8118 = vmatpush3.msra.mxu0 %v4909_v0 }
 0xb01   :  { %8081 = vmatprep.subr.mxu1 %v4929_v60  ;;  %8119 = vmatprep.subr.mxu0 %v4908_v3 }
 0xb02   :  { %8082 = vmatpush3.msra.mxu1 %v4929_v60  ;;  %8120 = vmatpush3.msra.mxu0 %v4908_v3 }
 0xb03   :  { %8083 = vmatprep.subr.mxu1 %v4928_v62  ;;  %8121 = vmatprep.subr.mxu0 %v4907_v5 }
 0xb04   :  { %8084 = vmatpush3.msra.mxu1 %v4928_v62  ;;  %8122 = vmatpush3.msra.mxu0 %v4907_v5 }
 0xb05   :  { %8085 = vmatprep.subr.mxu1 %v4927_v63  ;;  %8123 = vmatprep.subr.mxu0 %v4906_v7 }
 0xb06   :  { %8086 = vmatpush3.msra.mxu1 %v4927_v63  ;;  %8124 = vmatpush3.msra.mxu0 %v4906_v7 }
 0xb07   :  { %8087 = vmatprep.subr.mxu1 %v4926_v2  ;;  %8125 = vmatprep.subr.mxu0 %v4905_v9 }
 0xb08   :  { %8088 = vmatpush3.msra.mxu1 %v4926_v2  ;;  %8126 = vmatpush3.msra.mxu0 %v4905_v9 }
 0xb09   :  { %8089 = vmatprep.subr.mxu1 %v4925_v4  ;;  %8127 = vmatprep.subr.mxu0 %v4904_v11 }
 0xb0a   :  { %8090 = vmatpush3.msra.mxu1 %v4925_v4  ;;  %8128 = vmatpush3.msra.mxu0 %v4904_v11 }
 0xb0b   :  { %8091 = vmatprep.subr.mxu1 %v4924_v6  ;;  %8129 = vmatprep.subr.mxu0 %v4903_v13 }
 0xb0c   :  { %8092 = vmatpush3.msra.mxu1 %v4924_v6  ;;  %8130 = vmatpush3.msra.mxu0 %v4903_v13 }
 0xb0d   :  { %8093 = vmatprep.subr.mxu1 %v4923_v8  ;;  %8131 = vmatprep.subr.mxu0 %v4902_v15 }
 0xb0e   :  { %8094 = vmatpush3.msra.mxu1 %v4923_v8  ;;  %8132 = vmatpush3.msra.mxu0 %v4902_v15 }
 0xb0f   :  { %8095 = vmatprep.subr.mxu1 %v4922_v10  ;;  %8133 = vmatprep.subr.mxu0 %v4901_v16 }
 0xb10   :  { %8096 = vmatpush3.msra.mxu1 %v4922_v10  ;;  %8134 = vmatpush3.msra.mxu0 %v4901_v16 }
 0xb11   :  { %8097 = vmatprep.subr.mxu1 %v4921_v12  ;;  %8135 = vmatprep.subr.mxu0 %v4900_v19 }
 0xb12   :  { %8098 = vmatpush3.msra.mxu1 %v4921_v12  ;;  %8136 = vmatpush3.msra.mxu0 %v4900_v19 }
 0xb13   :  { %8099 = vmatprep.subr.mxu1 %v4920_v14  ;;  %8137 = vmatprep.subr.mxu0 %v4899_v23 }
 0xb14   :  { %8100 = vmatpush3.msra.mxu1 %v4920_v14  ;;  %8138 = vmatpush3.msra.mxu0 %v4899_v23 }
 0xb15   :  { %8145 = vmatprep.subr.mxu1 %v9737_v18  ;;  %8183 = vmatprep.subr.mxu0 %v9740_v24 }
 0xbb5   :  { %v8033_v21 = vpop.f32.mrf.mxu1  ;;  %v8068_v22 = vpop.f32.mrf.mxu0 }
 0xbb6   :  { %v4499_v32 = vcombine.high %v8033_v21, %v8033_v21  ;;  %v4506_v33 = vrot.slane %v8033_v21, %v9699_v28  ;;  %v4615_v34 = vcombine.high %v8068_v22, %v8068_v22  ;;  %v4622_v36 = vrot.slane %v8068_v22, %v9699_v28 }
 0xbb7   :  { %v4347_v38 = vpop.f32.mrf.mxu1 }
 0xbb8   :  { %v4513_v29 = vrot.slane %v4499_v32, %v9699_v28  ;;  %v4514_v30 = vcombine.high %v4506_v33, %v4506_v33  ;;  %v4522_v39 = vrot.slane %v4506_v33, %v9699_v28  ;;  %v4629_v35 = vrot.slane %v4615_v34, %v9699_v28 }
 0xbb9   :  { %v4630_v40 = vcombine.high %v4622_v36, %v4622_v36  ;;  %v4638_v41 = vrot.slane %v4622_v36, %v9699_v28  ;;  %v4450_v43 = vcombine.high %v4347_v38, %v4347_v38  ;;  %v4457_v47 = vrot.slane %v4347_v38, %v9699_v28  ;;  %v4439_v36 = vpop.f32.mrf.mxu0 }
 0xbba   :  { %v4515_v45 = vcombine.high %v4513_v29, %v4513_v29  ;;  %v4529_v17 = vrot.slane %v4513_v29, %v9699_v28  ;;  %v4536_v46 = vrot.slane %v4514_v30, %v9699_v28  ;;  %v4631_v48 = vcombine.high %v4629_v35, %v4629_v35 }
 0xbbb   :  { %v4645_v49 = vrot.slane %v4629_v35, %v9699_v28  ;;  %v4652_v50 = vrot.slane %v4630_v40, %v9699_v28  ;;  %v4660_v51 = vcombine.high %v4638_v41, %v4638_v41  ;;  %v4544_v58 = vcombine.high %v4522_v39, %v4522_v39 }
 0xbbc   :  { %v4543_v20 = vrot.slane %v4515_v45, %v9699_v28  ;;  %v4545_v52 = vcombine.high %v4529_v17, %v4529_v17  ;;  %v4699_v53 = vrot.slane %v4638_v41, %v9307_v1  ;;  %v4659_v54 = vrot.slane %v4631_v48, %v9699_v28 }
 0xbbd   :  { %v4661_v55 = vcombine.high %v4645_v49, %v4645_v49  ;;  %v4662_v56 = vcombine.high %v4652_v50, %v4652_v50  ;;  %v4703_v57 = vrot.slane %v4652_v50, %v9307_v1  ;;  %v4546_v60 = vcombine.high %v4536_v46, %v4536_v46 }
 0xbbe   :  { %v4707_v61 = vrot.slane %v4660_v51, %v9307_v1  ;;  %v4715_v62 = vrot.slane %v4645_v49, %v9307_v1  ;;  %v4752_v59 = vsel %vm3298_vm12, %v4522_v39, %v4699_v53  ;;  %v4663_v63 = vcombine.high %v4659_v54, %v4659_v54 }
 0xbbf   :  { %v4711_v0 = vrot.slane %v4662_v56, %v9307_v1  ;;  %v4719_v2 = vrot.slane %v4659_v54, %v9307_v1  ;;  %v4723_v3 = vrot.slane %v4661_v55, %v9307_v1  ;;  %v4547_v4 = vcombine.high %v4543_v20, %v4543_v20 }
 0xbc0   :  { %v4753_v5 = vsel %vm3298_vm12, %v4536_v46, %v4703_v57  ;;  %v4754_v6 = vsel %vm3298_vm12, %v4544_v58, %v4707_v61  ;;  %v4756_v7 = vsel %vm3298_vm12, %v4529_v17, %v4715_v62  ;;  %v4727_v8 = vrot.slane %v4663_v63, %v9307_v1 }
 0xbc1   :  { %v4755_v9 = vsel %vm3298_vm12, %v4546_v60, %v4711_v0  ;;  %v4757_v10 = vsel %vm3298_vm12, %v4543_v20, %v4719_v2  ;;  %v4758_v11 = vsel %vm3298_vm12, %v4545_v52, %v4723_v3  ;;  %v4795_v12 = vadd.f32 %v9744_v27, %v4752_v59 }
 0xbc2   :  { %v4796_v13 = vadd.f32 %v9753_v37, %v4753_v5  ;;  %v4797_v14 = vadd.f32 %v9747_v31, %v4754_v6  ;;  %v4798_v15 = vadd.f32 %v9761_v42, %v4755_v9  ;;  %v4759_v16 = vsel %vm3298_vm12, %v4547_v4, %v4727_v8 }
 0xbc3   :  { %v4799_v19 = vadd.f32 %v9744_v27, %v4756_v7  ;;  %v4800_v23 = vadd.f32 %v9753_v37, %v4757_v10  ;;  %v4464_v25 = vrot.slane %v4450_v43, %v9699_v28  ;;  %v4801_v26 = vadd.f32 %v9747_v31, %v4758_v11 }
 0xbc4   :  { %v4802_v21 = vadd.f32 %v9761_v42, %v4759_v16  ;;  %v4853_v22 = vcombine.low %v4795_v12, %v4796_v13  ;;  %v4854_v32 = vcombine.low %v4797_v14, %v4798_v15  ;;  %v4465_v34 = vcombine.high %v4457_v47, %v4457_v47 }
 0xbc5   :  { %v4870_v33 = vcombine.low %v4799_v19, %v4800_v23  ;;  %v4466_v39 = vcombine.high %v4464_v25, %v4464_v25  ;;  %v4473_v35 = vrot.slane %v4457_v47, %v9699_v28  ;;  %v4480_v40 = vrot.slane %v4464_v25, %v9699_v28 }
 0xbc6   :  { %v4861_v38 = vrot.slane %v4853_v22, %v9300_v44  ;;  %v4868_v29 = vrot.slane %v4854_v32, %v9300_v44  ;;  %v4871_v30 = vcombine.low %v4801_v26, %v4802_v21  ;;  %v4566_v17 = vcombine.high %v4439_v36, %v4439_v36 }
 0xbc7   :  { %v4878_v43 = vrot.slane %v4870_v33, %v9300_v44  ;;  %v4487_v46 = vrot.slane %v4465_v34, %v9699_v28  ;;  %v4573_v48 = vrot.slane %v4439_v36, %v9699_v28  ;;  %v4494_v50 = vrot.slane %v4466_v39, %v9699_v28 }
 0xbc8   :  { %v9799_v41 = vcombine.low %v4861_v38, %v4868_v29  ;;  %v4885_v45 = vrot.slane %v4871_v30, %v9300_v44  ;;  %v4580_v47 = vrot.slane %v4566_v17, %v9699_v28  ;;  %v4495_v58 = vcombine.high %v4473_v35, %v4473_v35 }
 0xbc9   :  { %v4581_v51 = vcombine.high %v4573_v48, %v4573_v48  ;;  %v4589_v20 = vrot.slane %v4573_v48, %v9699_v28  ;;  %v4496_v52 = vcombine.high %v4480_v40, %v4480_v40  ;;  %v4497_v55 = vcombine.high %v4487_v46, %v4487_v46  ;;  %v5232_v48 = vld [vmem:[#allocation33 + $0x60] sm:$0xff] }
 0xbca   :  { %v9805_v49 = vcombine.low %v4878_v43, %v4885_v45  ;;  %4893 = vst [vmem:[#allocation11 + $0x19] sm:$0xff] %v9799_v41  ;;  %v4582_v53 = vcombine.high %v4580_v47, %v4580_v47  ;;  %v4596_v54 = vrot.slane %v4580_v47, %v9699_v28  ;;  %v4498_v61 = vcombine.high %v4494_v50, %v4494_v50  ;;  %v5234_v45 = vld [vmem:[#allocation33 + $0x70] sm:$0xff]  ;;  %v5231_v47 = vld [vmem:[#allocation33 + $0x58] sm:$0xff] }
 0xbcb   :  { %v4603_v56 = vrot.slane %v4581_v51, %v9699_v28  ;;  %v4611_v57 = vcombine.high %v4589_v20, %v4589_v20  ;;  %v4667_v60 = vrot.slane %v4589_v20, %v9307_v1  ;;  %v5120_v51 = vld [vmem:[#allocation32 + $0x148] sm:$0xff]  ;;  %v5119_v20 = vld [vmem:[#allocation32 + $0x140] sm:$0xff] }
 0xbcc   :  { %4894 = vst [vmem:[#allocation11 + $0x21] sm:$0xff] %v9805_v49  ;;  %v4610_v62 = vrot.slane %v4582_v53, %v9699_v28  ;;  %v4612_v59 = vcombine.high %v4596_v54, %v4596_v54  ;;  %v4683_v63 = vrot.slane %v4596_v54, %v9307_v1  ;;  %v5228_v53 = vld [vmem:[#allocation33 + $0x40] sm:$0xff]  ;;  %v5117_v54 = vld [vmem:[#allocation32 + $0x130] sm:$0xff] }
 0xbcd   :  { %v4613_v0 = vcombine.high %v4603_v56, %v4603_v56  ;;  %v4671_v2 = vrot.slane %v4603_v56, %v9307_v1  ;;  %v4675_v3 = vrot.slane %v4611_v57, %v9307_v1  ;;  %v4744_v4 = vsel %vm3298_vm12, %v4473_v35, %v4667_v60  ;;  %v5125_v35 = vld [vmem:[#allocation32 + $0x170] sm:$0xff]  ;;  %v5116_v56 = vld [vmem:[#allocation32 + $0x128] sm:$0xff]  ;;  %v5115_v60 = vld [vmem:[#allocation32 + $0x120] sm:$0xff] }
 0xbce   :  { %v4614_v5 = vcombine.high %v4610_v62, %v4610_v62  ;;  %v4687_v6 = vrot.slane %v4610_v62, %v9307_v1  ;;  %v4691_v7 = vrot.slane %v4612_v59, %v9307_v1  ;;  %v4748_v8 = vsel %vm3298_vm12, %v4480_v40, %v4683_v63  ;;  %v5122_v40 = vld [vmem:[#allocation32 + $0x158] sm:$0xff]  ;;  %v5226_v57 = vld [vmem:[#allocation33 + $0x30] sm:$0xff]  ;;  %v5224_v59 = vld [vmem:[#allocation33 + $0x20] sm:$0xff] }
 0xbcf   :  { %v4679_v9 = vrot.slane %v4613_v0, %v9307_v1  ;;  %v4745_v28 = vsel %vm3298_vm12, %v4487_v46, %v4671_v2  ;;  %v4746_v10 = vsel %vm3298_vm12, %v4495_v58, %v4675_v3  ;;  %v4787_v11 = vadd.f32 %v9744_v27, %v4744_v4  ;;  %v5229_v58 = vld [vmem:[#allocation33 + $0x48] sm:$0xff]  ;;  %v5114_v62 = vld [vmem:[#allocation32 + $0x118] sm:$0xff]  ;;  %v5113_v63 = vld [vmem:[#allocation32 + $0x110] sm:$0xff] }
 0xbd0   :  { %v4695_v12 = vrot.slane %v4614_v5, %v9307_v1  ;;  %v4749_v13 = vsel %vm3298_vm12, %v4494_v50, %v4687_v6  ;;  %v4750_v14 = vsel %vm3298_vm12, %v4496_v52, %v4691_v7  ;;  %v4788_v15 = vadd.f32 %v9753_v37, %v4745_v28  ;;  %v5216_v50 = vld [vmem:[#allocation3] sm:$0xff]  ;;  %v5112_v2 = vld [vmem:[#allocation32 + $0x108] sm:$0xff]  ;;  %v5111_v4 = vld [vmem:[#allocation32 + $0x100] sm:$0xff] }
 0xbd1   :  { %v4747_v16 = vsel %vm3298_vm12, %v4497_v55, %v4679_v9  ;;  %v4791_v19 = vadd.f32 %v9744_v27, %v4748_v8  ;;  %v4792_v23 = vadd.f32 %v9753_v37, %v4749_v13  ;;  %v4789_v26 = vadd.f32 %v9747_v31, %v4746_v10  ;;  %v5118_v52 = vld [vmem:[#allocation32 + $0x138] sm:$0xff]  ;;  %v5222_v3 = vld [vmem:[#allocation33 + $0x10] sm:$0xff]  ;;  %v5221_v5 = vld [vmem:[#allocation33 + $0x8] sm:$0xff] }
 0xbd2   :  { %v4751_v25 = vsel %vm3298_vm12, %v4498_v61, %v4695_v12  ;;  %v4790_v21 = vadd.f32 %v9761_v42, %v4747_v16  ;;  %v4819_v22 = vcombine.low %v4787_v11, %v4788_v15  ;;  %v4793_v1 = vadd.f32 %v9747_v31, %v4750_v14  ;;  %v5124_v31 = vld [vmem:[#allocation32 + $0x168] sm:$0xff]  ;;  %v5227_v55 = vld [vmem:[#allocation33 + $0x38] sm:$0xff]  ;;  %v5220_v7 = vld [vmem:[#allocation33] sm:$0xff] }
 0xbd3   :  { %v4794_v32 = vadd.f32 %v9761_v42, %v4751_v25  ;;  %v4836_v33 = vcombine.low %v4791_v19, %v4792_v23  ;;  %v5123_v42 = vld [vmem:[#allocation32 + $0x160] sm:$0xff]  ;;  %v5225_v61 = vld [vmem:[#allocation33 + $0x28] sm:$0xff]  ;;  %v5223_v0 = vld [vmem:[#allocation33 + $0x18] sm:$0xff] }
 0xbd4   :  { %v4820_v34 = vcombine.low %v4789_v26, %v4790_v21  ;;  %v4827_v38 = vrot.slane %v4819_v22, %v9300_v44  ;;  %v4898_v46 = vld [vmem:[#allocation11 + $0x20] sm:$0xff]  ;;  %v5345_v6 = vld [vmem:[#allocation33 + $0xf8] sm:$0xff]  ;;  %v5344_v11 = vld [vmem:[#allocation33 + $0xf0] sm:$0xff] }
 0xbd5   :  { %v4837_v36 = vcombine.low %v4793_v1, %v4794_v32  ;;  %v4844_v37 = vrot.slane %v4836_v33, %v9300_v44  ;;  %v5455_v9 = vld [vmem:[#allocation33 + $0x178] sm:$0xff]  ;;  %v5108_v28 = vld [vmem:[#allocation11 + $0x1a] sm:$0xff]  ;;  %v5454_v12 = vld [vmem:[#allocation33 + $0x170] sm:$0xff] }
 0xbd6   :  { %v4834_v27 = vrot.slane %v4820_v34, %v9300_v44  ;;  %v5217_v10 = vld [vmem:[#allocation3 + $0x8] sm:$0xff]  ;;  %v5218_v13 = vld [vmem:[#allocation3 + $0x18] sm:$0xff]  ;;  %v5219_v19 = vld [vmem:[#allocation3 + $0x20] sm:$0xff] }
 0xbd7   :  { %v4851_v29 = vrot.slane %v4837_v36, %v9300_v44  ;;  %v5343_v14 = vld [vmem:[#allocation33 + $0xe8] sm:$0xff]  ;;  %v5325_v23 = vld [vmem:[#allocation3 + $0x1] sm:$0xff]  ;;  %v5342_v25 = vld [vmem:[#allocation33 + $0xe0] sm:$0xff] }
 0xbd8   :  { %v4835_v30 = vcombine.low %v4827_v38, %v4834_v27  ;;  %v5453_v15 = vld [vmem:[#allocation33 + $0x168] sm:$0xff]  ;;  %v5452_v26 = vld [vmem:[#allocation33 + $0x160] sm:$0xff]  ;;  %v5435_v21 = vld [vmem:[#allocation3 + $0x2] sm:$0xff] }
 0xbd9   :  { %v4852_v39 = vcombine.low %v4844_v37, %v4851_v29  ;;  %v5109_v16 = vld [vmem:[#allocation11 + $0x22] sm:$0xff]  ;;  %v5341_v22 = vld [vmem:[#allocation33 + $0xd8] sm:$0xff]  ;;  %v5340_v32 = vld [vmem:[#allocation33 + $0xd0] sm:$0xff] }
 0xbda   :  { %4891 = vst [vmem:[#allocation11 + $0x1] sm:$0xff] %v4835_v30  ;;  %8101 = vmatprep.mubr.f32.mxu1 %v4835_v30  ;;  %v5451_v1 = vld [vmem:[#allocation33 + $0x158] sm:$0xff]  ;;  %v5450_v33 = vld [vmem:[#allocation33 + $0x150] sm:$0xff]  ;;  %v5339_v34 = vld [vmem:[#allocation33 + $0xc8] sm:$0xff] }
 0xbdb   :  { %4892 = vst [vmem:[#allocation11 + $0x9] sm:$0xff] %v4852_v39  ;;  %8102 = vmatmul.mubr.f32.vlgmr.msra.gmra.mxu1 %v4852_v39  ;;  %v5449_v36 = vld [vmem:[#allocation33 + $0x148] sm:$0xff]  ;;  %v5338_v38 = vld [vmem:[#allocation33 + $0xc0] sm:$0xff]  ;;  %v5337_v37 = vld [vmem:[#allocation33 + $0xb8] sm:$0xff] }
 0xbdc   :  { %8146 = vmatpush3.msra.mxu1 %v9737_v18  ;;  %8104 = vmatprep.mubr.f32.mxu1 %v9799_v41  ;;  %v4897_v18 = vld [vmem:[#allocation11 + $0x18] sm:$0xff]  ;;  %v5233_v41 = vld [vmem:[#allocation33 + $0x68] sm:$0xff]  ;;  %v5336_v30 = vld [vmem:[#allocation33 + $0xb0] sm:$0xff] }
 0xbdd   :  { %8147 = vmatprep.subr.mxu1 %v5125_v35  ;;  %v5448_v27 = vld [vmem:[#allocation33 + $0x140] sm:$0xff]  ;;  %v5447_v29 = vld [vmem:[#allocation33 + $0x138] sm:$0xff]  ;;  %v5446_v39 = vld [vmem:[#allocation33 + $0x130] sm:$0xff] }
 0xbde   :  { %8148 = vmatpush3.msra.mxu1 %v5125_v35  ;;  %v5335_v35 = vld [vmem:[#allocation33 + $0xa8] sm:$0xff] }
 0xbdf   :  { %8149 = vmatprep.subr.mxu1 %v5124_v31  ;;  %8105 = vmatmul.mubr.f32.gmra.mxu1 %v9805_v49  ;;  %v5121_v49 = vld [vmem:[#allocation32 + $0x150] sm:$0xff] }
 0xbe0   :  { %8150 = vmatpush3.msra.mxu1 %v5124_v31  ;;  %v5445_v31 = vld [vmem:[#allocation33 + $0x128] sm:$0xff] }
 0xbe1   :  { %v4895_v44 = vld [vmem:[#allocation11] sm:$0xff]  ;;  %8151 = vmatprep.subr.mxu1 %v5123_v42 }
 0xbe2   :  { %8139 = vmatprep.mubr.f32.mxu0 %v4895_v44  ;;  %v4896_v43 = vld [vmem:[#allocation11 + $0x8] sm:$0xff]  ;;  %8152 = vmatpush3.msra.mxu1 %v5123_v42  ;;  %v5334_v42 = vld [vmem:[#allocation33 + $0xa0] sm:$0xff] }
 0xbe3   :  { %v5106_v17 = vld [vmem:[#allocation11 + $0x2] sm:$0xff]  ;;  %8140 = vmatmul.mubr.f32.vlgmr.msra.gmra.mxu0 %v4896_v43  ;;  %8153 = vmatprep.subr.mxu1 %v5122_v40  ;;  %v5107_v8 = vld [vmem:[#allocation11 + $0xa] sm:$0xff]  ;;  %v5444_v44 = vld [vmem:[#allocation33 + $0x120] sm:$0xff] }
 0xbe4   :  { %8177 = vmatprep.mubr.f32.mxu1 %v5106_v17  ;;  %8184 = vmatpush3.msra.mxu0 %v9740_v24  ;;  %v5230_v24 = vld [vmem:[#allocation33 + $0x50] sm:$0xff]  ;;  %v5443_v43 = vld [vmem:[#allocation33 + $0x118] sm:$0xff] }
 0xbe5   :  { %8142 = vmatprep.mubr.f32.mxu0 %v4897_v18  ;;  %8185 = vmatprep.subr.mxu0 %v5234_v45  ;;  %v5442_v17 = vld [vmem:[#allocation33 + $0x110] sm:$0xff]  ;;  %v5331_v18 = vld [vmem:[#allocation33 + $0x88] sm:$0xff] }
 0xbe6   :  { %8186 = vmatpush3.msra.mxu0 %v5234_v45  ;;  %8154 = vmatpush3.msra.mxu1 %v5122_v40  ;;  %v5333_v40 = vld [vmem:[#allocation33 + $0x98] sm:$0xff]  ;;  %v5332_v45 = vld [vmem:[#allocation33 + $0x90] sm:$0xff] }
 0xbe7   :  { %8187 = vmatprep.subr.mxu0 %v5233_v41  ;;  %8143 = vmatmul.mubr.f32.gmra.mxu0 %v4898_v46  ;;  %v5330_v46 = vld [vmem:[#allocation33 + $0x80] sm:$0xff] }
 0xbe8   :  { %8188 = vmatpush3.msra.mxu0 %v5233_v41  ;;  %8215 = vmatprep.mubr.f32.mxu0 %v5216_v50  ;;  %v5441_v41 = vld [vmem:[#allocation33 + $0x108] sm:$0xff]  ;;  %v5436_v50 = vld [vmem:[#allocation3 + $0xa] sm:$0xff] }
 0xbe9   :  { %8189 = vmatprep.subr.mxu0 %v5232_v48  ;;  %8155 = vmatprep.subr.mxu1 %v5121_v49 }
 0xbea   :  { %8190 = vmatpush3.msra.mxu0 %v5232_v48  ;;  %8156 = vmatpush3.msra.mxu1 %v5121_v49  ;;  %v5440_v48 = vld [vmem:[#allocation33 + $0x100] sm:$0xff] }
 0xbeb   :  { %8191 = vmatprep.subr.mxu0 %v5231_v47  ;;  %8157 = vmatprep.subr.mxu1 %v5120_v51  ;;  %v5326_v49 = vld [vmem:[#allocation3 + $0x9] sm:$0xff] }
 0xbec   :  { %8192 = vmatpush3.msra.mxu0 %v5231_v47  ;;  %8158 = vmatpush3.msra.mxu1 %v5120_v51  ;;  %v5327_v47 = vld [vmem:[#allocation3 + $0x19] sm:$0xff] }
 0xbed   :  { %8193 = vmatprep.subr.mxu0 %v5230_v24  ;;  %8159 = vmatprep.subr.mxu1 %v5119_v20  ;;  %v5437_v51 = vld [vmem:[#allocation3 + $0x1a] sm:$0xff] }
 0xbee   :  { %8194 = vmatpush3.msra.mxu0 %v5230_v24  ;;  %8160 = vmatpush3.msra.mxu1 %v5119_v20  ;;  %v5328_v24 = vld [vmem:[#allocation3 + $0x21] sm:$0xff] }
 0xbef   :  { %8195 = vmatprep.subr.mxu0 %v5229_v58  ;;  %8161 = vmatprep.subr.mxu1 %v5118_v52  ;;  %v5438_v20 = vld [vmem:[#allocation3 + $0x22] sm:$0xff] }
 0xbf0   :  { %8196 = vmatpush3.msra.mxu0 %v5229_v58  ;;  %8162 = vmatpush3.msra.mxu1 %v5118_v52  ;;  %v5604_v58 = vld [vmem:[#allocation36 + $0xf8] sm:$0xff] }
 0xbf1   :  { %8197 = vmatprep.subr.mxu0 %v5228_v53  ;;  %8163 = vmatprep.subr.mxu1 %v5117_v54  ;;  %v5583_v52 = vld [vmem:[#allocation36 + $0x78] sm:$0xff] }
 0xbf2   :  { %8198 = vmatpush3.msra.mxu0 %v5228_v53  ;;  %8164 = vmatpush3.msra.mxu1 %v5117_v54  ;;  %v5603_v53 = vld [vmem:[#allocation36 + $0xf0] sm:$0xff] }
 0xbf3   :  { %8199 = vmatprep.subr.mxu0 %v5227_v55  ;;  %8165 = vmatprep.subr.mxu1 %v5116_v56  ;;  %v5582_v54 = vld [vmem:[#allocation36 + $0x70] sm:$0xff] }
 0xbf4   :  { %8200 = vmatpush3.msra.mxu0 %v5227_v55  ;;  %8166 = vmatpush3.msra.mxu1 %v5116_v56  ;;  %v5602_v55 = vld [vmem:[#allocation36 + $0xe8] sm:$0xff] }
 0xbf5   :  { %8201 = vmatprep.subr.mxu0 %v5226_v57  ;;  %8167 = vmatprep.subr.mxu1 %v5115_v60  ;;  %v5581_v56 = vld [vmem:[#allocation36 + $0x68] sm:$0xff] }
 0xbf6   :  { %8202 = vmatpush3.msra.mxu0 %v5226_v57  ;;  %8168 = vmatpush3.msra.mxu1 %v5115_v60  ;;  %v5601_v57 = vld [vmem:[#allocation36 + $0xe0] sm:$0xff] }
 0xbf7   :  { %8203 = vmatprep.subr.mxu0 %v5225_v61  ;;  %8169 = vmatprep.subr.mxu1 %v5114_v62  ;;  %v5580_v60 = vld [vmem:[#allocation36 + $0x60] sm:$0xff] }
 0xbf8   :  { %8204 = vmatpush3.msra.mxu0 %v5225_v61  ;;  %8170 = vmatpush3.msra.mxu1 %v5114_v62  ;;  %v5600_v61 = vld [vmem:[#allocation36 + $0xd8] sm:$0xff] }
 0xbf9   :  { %8205 = vmatprep.subr.mxu0 %v5224_v59  ;;  %8171 = vmatprep.subr.mxu1 %v5113_v63  ;;  %v5579_v62 = vld [vmem:[#allocation36 + $0x58] sm:$0xff] }
 0xbfa   :  { %8206 = vmatpush3.msra.mxu0 %v5224_v59  ;;  %8172 = vmatpush3.msra.mxu1 %v5113_v63  ;;  %v5599_v59 = vld [vmem:[#allocation36 + $0xd0] sm:$0xff] }
 0xbfb   :  { %8207 = vmatprep.subr.mxu0 %v5223_v0  ;;  %8173 = vmatprep.subr.mxu1 %v5112_v2  ;;  %v5578_v63 = vld [vmem:[#allocation36 + $0x50] sm:$0xff] }
 0xbfc   :  { %8208 = vmatpush3.msra.mxu0 %v5223_v0  ;;  %8174 = vmatpush3.msra.mxu1 %v5112_v2  ;;  %v5598_v0 = vld [vmem:[#allocation36 + $0xc8] sm:$0xff]  ;;  %v5597_v2 = vld [vmem:[#allocation36 + $0xc0] sm:$0xff] }
 0xbfd   :  { %8209 = vmatprep.subr.mxu0 %v5222_v3  ;;  %8175 = vmatprep.subr.mxu1 %v5111_v4 }
 0xbfe   :  { %8210 = vmatpush3.msra.mxu0 %v5222_v3  ;;  %8176 = vmatpush3.msra.mxu1 %v5111_v4  ;;  %v5596_v3 = vld [vmem:[#allocation36 + $0xb8] sm:$0xff]  ;;  %v5595_v4 = vld [vmem:[#allocation36 + $0xb0] sm:$0xff] }
 0xbff   :  { %8211 = vmatprep.subr.mxu0 %v5221_v5  ;;  %8178 = vmatmul.mubr.f32.vlgmr.msra.gmra.mxu1 %v5107_v8  ;;  %v5576_v8 = vld [vmem:[#allocation36 + $0x40] sm:$0xff] }
 0xc00   :  { %8212 = vmatpush3.msra.mxu0 %v5221_v5  ;;  %8221 = vmatprep.subr.mxu1 %v5345_v6  ;;  %v5594_v5 = vld [vmem:[#allocation36 + $0xa8] sm:$0xff] }
 0xc01   :  { %8213 = vmatprep.subr.mxu0 %v5220_v7  ;;  %8180 = vmatprep.mubr.f32.mxu1 %v5108_v28  ;;  %v5575_v28 = vld [vmem:[#allocation36 + $0x38] sm:$0xff] }
 0xc02   :  { %8214 = vmatpush3.msra.mxu0 %v5220_v7  ;;  %8222 = vmatpush3.msra.mxu1 %v5345_v6  ;;  %v5577_v6 = vld [vmem:[#allocation36 + $0x48] sm:$0xff]  ;;  %v5593_v7 = vld [vmem:[#allocation36 + $0xa0] sm:$0xff] }
 0xc03   :  { %8216 = vmatmul.mubr.f32.vlgmr.msra.gmra.mxu0 %v5217_v10  ;;  %8259 = vmatprep.subr.mxu0 %v5455_v9  ;;  %v5591_v10 = vld [vmem:[#allocation36 + $0x90] sm:$0xff] }
 0xc04   :  { %8218 = vmatprep.mubr.f32.mxu0 %v5218_v13  ;;  %8260 = vmatpush3.msra.mxu0 %v5455_v9  ;;  %v5592_v9 = vld [vmem:[#allocation36 + $0x98] sm:$0xff]  ;;  %v5573_v13 = vld [vmem:[#allocation36 + $0x28] sm:$0xff] }
 0xc05   :  { %8223 = vmatprep.subr.mxu1 %v5344_v11  ;;  %8261 = vmatprep.subr.mxu0 %v5454_v12 }
 0xc06   :  { %8224 = vmatpush3.msra.mxu1 %v5344_v11  ;;  %8262 = vmatpush3.msra.mxu0 %v5454_v12  ;;  %v5574_v11 = vld [vmem:[#allocation36 + $0x30] sm:$0xff]  ;;  %v5590_v12 = vld [vmem:[#allocation36 + $0x88] sm:$0xff] }
 0xc07   :  { %8181 = vmatmul.mubr.f32.gmra.mxu1 %v5109_v16  ;;  %8219 = vmatmul.mubr.f32.gmra.mxu0 %v5219_v19  ;;  %v5571_v16 = vld [vmem:[#allocation36 + $0x18] sm:$0xff] }
 0xc08   :  { %8225 = vmatprep.subr.mxu1 %v5343_v14  ;;  %8263 = vmatprep.subr.mxu0 %v5453_v15  ;;  %v9847_v19 = vld [vmem:[#allocation36 + $0x178] sm:$0xff] }
 0xc09   :  { %8226 = vmatpush3.msra.mxu1 %v5343_v14  ;;  %8253 = vmatprep.mubr.f32.mxu1 %v5325_v23  ;;  %v5589_v14 = vld [vmem:[#allocation36 + $0x80] sm:$0xff]  ;;  %v5570_v23 = vld [vmem:[#allocation36 + $0x10] sm:$0xff] }
 0xc0a   :  { %8264 = vmatpush3.msra.mxu0 %v5453_v15  ;;  %8291 = vmatprep.mubr.f32.mxu0 %v5435_v21  ;;  %v5572_v15 = vld [vmem:[#allocation36 + $0x20] sm:$0xff] }
 0xc0b   :  { %8227 = vmatprep.subr.mxu1 %v5342_v25  ;;  %8265 = vmatprep.subr.mxu0 %v5452_v26 }
 0xc0c   :  { %8228 = vmatpush3.msra.mxu1 %v5342_v25  ;;  %8266 = vmatpush3.msra.mxu0 %v5452_v26  ;;  %v5569_v25 = vld [vmem:[#allocation36 + $0x8] sm:$0xff]  ;;  %v5568_v26 = vld [vmem:[#allocation36] sm:$0xff] }
 0xc0d   :  { %8229 = vmatprep.subr.mxu1 %v5341_v22  ;;  %8267 = vmatprep.subr.mxu0 %v5451_v1 }
 0xc0e   :  { %8230 = vmatpush3.msra.mxu1 %v5341_v22  ;;  %8268 = vmatpush3.msra.mxu0 %v5451_v1 }
 0xc0f   :  { %8231 = vmatprep.subr.mxu1 %v5340_v32  ;;  %8269 = vmatprep.subr.mxu0 %v5450_v33 }
 0xc10   :  { %8232 = vmatpush3.msra.mxu1 %v5340_v32  ;;  %8270 = vmatpush3.msra.mxu0 %v5450_v33 }
 0xc11   :  { %8233 = vmatprep.subr.mxu1 %v5339_v34  ;;  %8271 = vmatprep.subr.mxu0 %v5449_v36 }
 0xc12   :  { %8234 = vmatpush3.msra.mxu1 %v5339_v34  ;;  %8272 = vmatpush3.msra.mxu0 %v5449_v36 }
 0xc13   :  { %8235 = vmatprep.subr.mxu1 %v5338_v38  ;;  %8273 = vmatprep.subr.mxu0 %v5448_v27 }
 0xc14   :  { %8236 = vmatpush3.msra.mxu1 %v5338_v38  ;;  %8274 = vmatpush3.msra.mxu0 %v5448_v27 }
 0xc15   :  { %8237 = vmatprep.subr.mxu1 %v5337_v37  ;;  %8275 = vmatprep.subr.mxu0 %v5447_v29 }
 0xc16   :  { %8238 = vmatpush3.msra.mxu1 %v5337_v37  ;;  %8276 = vmatpush3.msra.mxu0 %v5447_v29 }
 0xc17   :  { %8239 = vmatprep.subr.mxu1 %v5336_v30  ;;  %8277 = vmatprep.subr.mxu0 %v5446_v39 }
 0xc18   :  { %8240 = vmatpush3.msra.mxu1 %v5336_v30  ;;  %8278 = vmatpush3.msra.mxu0 %v5446_v39 }
 0xc19   :  { %8241 = vmatprep.subr.mxu1 %v5335_v35  ;;  %8279 = vmatprep.subr.mxu0 %v5445_v31 }
 0xc1a   :  { %8242 = vmatpush3.msra.mxu1 %v5335_v35  ;;  %8280 = vmatpush3.msra.mxu0 %v5445_v31 }
 0xc1b   :  { %8243 = vmatprep.subr.mxu1 %v5334_v42  ;;  %8281 = vmatprep.subr.mxu0 %v5444_v44 }
 0xc1c   :  { %8244 = vmatpush3.msra.mxu1 %v5334_v42  ;;  %8282 = vmatpush3.msra.mxu0 %v5444_v44 }
 0xc1d   :  { %8245 = vmatprep.subr.mxu1 %v5333_v40  ;;  %8283 = vmatprep.subr.mxu0 %v5443_v43 }
 0xc1e   :  { %8246 = vmatpush3.msra.mxu1 %v5333_v40  ;;  %8284 = vmatpush3.msra.mxu0 %v5443_v43 }
 0xc1f   :  { %8247 = vmatprep.subr.mxu1 %v5332_v45  ;;  %8285 = vmatprep.subr.mxu0 %v5442_v17 }
 0xc20   :  { %8248 = vmatpush3.msra.mxu1 %v5332_v45  ;;  %8286 = vmatpush3.msra.mxu0 %v5442_v17 }
 0xc21   :  { %8249 = vmatprep.subr.mxu1 %v5331_v18  ;;  %8287 = vmatprep.subr.mxu0 %v5441_v41 }
 0xc22   :  { %8250 = vmatpush3.msra.mxu1 %v5331_v18  ;;  %8288 = vmatpush3.msra.mxu0 %v5441_v41 }
 0xc23   :  { %8251 = vmatprep.subr.mxu1 %v5330_v46  ;;  %8289 = vmatprep.subr.mxu0 %v5440_v48 }
 0xc24   :  { %8252 = vmatpush3.msra.mxu1 %v5330_v46  ;;  %8290 = vmatpush3.msra.mxu0 %v5440_v48 }
 0xc25   :  { %8254 = vmatmul.mubr.f32.vlgmr.msra.gmra.mxu1 %v5326_v49  ;;  %8292 = vmatmul.mubr.f32.vlgmr.msra.gmra.mxu0 %v5436_v50 }
 0xc26   :  { %8256 = vmatprep.mubr.f32.mxu1 %v5327_v47  ;;  %8294 = vmatprep.mubr.f32.mxu0 %v5437_v51  ;;  %v6225_v51 = vld [vmem:[#allocation35] ss:$0 sm:$0xff] }
 0xc27   :  { %8297 = vmatprep.subr.mxu1 %v5604_v58  ;;  %8335 = vmatprep.subr.mxu0 %v5583_v52 }
 0xc28   :  { %8298 = vmatpush3.msra.mxu1 %v5604_v58  ;;  %8336 = vmatpush3.msra.mxu0 %v5583_v52 }
 0xc29   :  { %8257 = vmatmul.mubr.f32.gmra.mxu1 %v5328_v24  ;;  %8295 = vmatmul.mubr.f32.gmra.mxu0 %v5438_v20 }
 0xc2a   :  { %8299 = vmatprep.subr.mxu1 %v5603_v53  ;;  %8337 = vmatprep.subr.mxu0 %v5582_v54 }
 0xc2b   :  { %8300 = vmatpush3.msra.mxu1 %v5603_v53  ;;  %8338 = vmatpush3.msra.mxu0 %v5582_v54 }
 0xc2c   :  { %8301 = vmatprep.subr.mxu1 %v5602_v55  ;;  %8339 = vmatprep.subr.mxu0 %v5581_v56 }
 0xc2d   :  { %8302 = vmatpush3.msra.mxu1 %v5602_v55  ;;  %8340 = vmatpush3.msra.mxu0 %v5581_v56 }
 0xc2e   :  { %8303 = vmatprep.subr.mxu1 %v5601_v57  ;;  %8341 = vmatprep.subr.mxu0 %v5580_v60 }
 0xc2f   :  { %8304 = vmatpush3.msra.mxu1 %v5601_v57  ;;  %8342 = vmatpush3.msra.mxu0 %v5580_v60 }
 0xc30   :  { %8305 = vmatprep.subr.mxu1 %v5600_v61  ;;  %8343 = vmatprep.subr.mxu0 %v5579_v62 }
 0xc31   :  { %8306 = vmatpush3.msra.mxu1 %v5600_v61  ;;  %8344 = vmatpush3.msra.mxu0 %v5579_v62 }
 0xc32   :  { %8307 = vmatprep.subr.mxu1 %v5599_v59  ;;  %8345 = vmatprep.subr.mxu0 %v5578_v63 }
 0xc33   :  { %8308 = vmatpush3.msra.mxu1 %v5599_v59  ;;  %8346 = vmatpush3.msra.mxu0 %v5578_v63 }
 0xc34   :  { %8309 = vmatprep.subr.mxu1 %v5598_v0  ;;  %8347 = vmatprep.subr.mxu0 %v5577_v6 }
 0xc35   :  { %8310 = vmatpush3.msra.mxu1 %v5598_v0  ;;  %8348 = vmatpush3.msra.mxu0 %v5577_v6 }
 0xc36   :  { %8311 = vmatprep.subr.mxu1 %v5597_v2  ;;  %8349 = vmatprep.subr.mxu0 %v5576_v8 }
 0xc37   :  { %8312 = vmatpush3.msra.mxu1 %v5597_v2  ;;  %8350 = vmatpush3.msra.mxu0 %v5576_v8 }
 0xc38   :  { %8313 = vmatprep.subr.mxu1 %v5596_v3  ;;  %8351 = vmatprep.subr.mxu0 %v5575_v28 }
 0xc39   :  { %8314 = vmatpush3.msra.mxu1 %v5596_v3  ;;  %8352 = vmatpush3.msra.mxu0 %v5575_v28  ;;  %v5794_v28 = vld [vmem:[#allocation36 + $0x170] sm:$0xff] }
 0xc3a   :  { %8315 = vmatprep.subr.mxu1 %v5595_v4  ;;  %8353 = vmatprep.subr.mxu0 %v5574_v11 }
 0xc3b   :  { %8316 = vmatpush3.msra.mxu1 %v5595_v4  ;;  %8354 = vmatpush3.msra.mxu0 %v5574_v11  ;;  %v5793_v11 = vld [vmem:[#allocation36 + $0x168] sm:$0xff] }
 0xc3c   :  { %8317 = vmatprep.subr.mxu1 %v5594_v5  ;;  %8355 = vmatprep.subr.mxu0 %v5573_v13 }
 0xc3d   :  { %8318 = vmatpush3.msra.mxu1 %v5594_v5  ;;  %8356 = vmatpush3.msra.mxu0 %v5573_v13  ;;  %v5791_v13 = vld [vmem:[#allocation36 + $0x158] sm:$0xff] }
 0xc3e   :  { %8319 = vmatprep.subr.mxu1 %v5593_v7  ;;  %8357 = vmatprep.subr.mxu0 %v5572_v15 }
 0xc3f   :  { %8320 = vmatpush3.msra.mxu1 %v5593_v7  ;;  %8358 = vmatpush3.msra.mxu0 %v5572_v15 }
 0xc40   :  { %8321 = vmatprep.subr.mxu1 %v5592_v9  ;;  %8359 = vmatprep.subr.mxu0 %v5571_v16 }
 0xc41   :  { %8322 = vmatpush3.msra.mxu1 %v5592_v9  ;;  %8360 = vmatpush3.msra.mxu0 %v5571_v16 }
 0xc42   :  { %8323 = vmatprep.subr.mxu1 %v5591_v10  ;;  %8361 = vmatprep.subr.mxu0 %v5570_v23 }
 0xc43   :  { %8324 = vmatpush3.msra.mxu1 %v5591_v10  ;;  %8362 = vmatpush3.msra.mxu0 %v5570_v23  ;;  %v5790_v23 = vld [vmem:[#allocation36 + $0x150] sm:$0xff] }
 0xc44   :  { %8325 = vmatprep.subr.mxu1 %v5590_v12  ;;  %8363 = vmatprep.subr.mxu0 %v5569_v25 }
 0xc45   :  { %8326 = vmatpush3.msra.mxu1 %v5590_v12  ;;  %8364 = vmatpush3.msra.mxu0 %v5569_v25  ;;  %v5792_v12 = vld [vmem:[#allocation36 + $0x160] sm:$0xff] }
 0xc46   :  { %8327 = vmatprep.subr.mxu1 %v5589_v14  ;;  %8365 = vmatprep.subr.mxu0 %v5568_v26 }
 0xc47   :  { %8328 = vmatpush3.msra.mxu1 %v5589_v14  ;;  %8366 = vmatpush3.msra.mxu0 %v5568_v26  ;;  %v5789_v26 = vld [vmem:[#allocation36 + $0x148] sm:$0xff] }
 0xc48   :  { %8373 = vmatprep.subr.mxu1 %v9847_v19 }
 0xc9b   :  { %v8103_v21 = vpop.f32.mrf.mxu1 }
 0xc9d   :  { %v5002_v1 = vpop.f32.mrf.mxu1 }
 0xc9f   :  { %v8106_v33 = vpop.f32.mrf.mxu1 }
 0xca1   :  { %v5012_v36 = vpop.f32.mrf.mxu1 }
 0xca3   :  { %v8141_v22 = vpop.f32.mrf.mxu0 }
 0xca4   :  { %v5093_v31 = vadd.f32 %v8141_v22, %v8103_v21  ;;  %v5788_v21 = vld [vmem:[#allocation36 + $0x140] sm:$0xff]  ;;  %v5787_v22 = vld [vmem:[#allocation36 + $0x138] sm:$0xff] }
 0xca5   :  { %v5087_v32 = vpop.f32.mrf.mxu0 }
 0xca6   :  { %v5088_v42 = vadd.f32 %v5087_v32, %v5002_v1  ;;  %v5786_v1 = vld [vmem:[#allocation36 + $0x130] sm:$0xff]  ;;  %v5785_v32 = vld [vmem:[#allocation36 + $0x128] sm:$0xff] }
 0xca7   :  { %v8144_v34 = vpop.f32.mrf.mxu0 }
 0xca8   :  { %v5103_v45 = vadd.f32 %v8144_v34, %v8106_v33  ;;  %v5784_v33 = vld [vmem:[#allocation36 + $0x120] sm:$0xff]  ;;  %v5783_v34 = vld [vmem:[#allocation36 + $0x118] sm:$0xff] }
 0xca9   :  { %v5097_v38 = vpop.f32.mrf.mxu0 }
 0xcaa   :  { %v5098_v48 = vadd.f32 %v5097_v38, %v5012_v36  ;;  %v5782_v36 = vld [vmem:[#allocation36 + $0x110] sm:$0xff]  ;;  %v5781_v38 = vld [vmem:[#allocation36 + $0x108] sm:$0xff] }
 0xcbf   :  { %v8179_v27 = vpop.f32.mrf.mxu1 }
 0xcc0   :  { %v5213_v44 = vadd.f32 %v8179_v27, %v5093_v31  ;;  %v5780_v27 = vld [vmem:[#allocation36 + $0x100] sm:$0xff]  ;;  %v5913_v31 = vld [vmem:[%s9088_s5 + $0x68] sm:$0xff] }
 0xcc1   :  { %v5193_v29 = vpop.f32.mrf.mxu1 }
 0xcc2   :  { %v5212_v18 = vadd.f32 %v5193_v29, %v5088_v42  ;;  %v5912_v42 = vld [vmem:[%s9088_s5 + $0x60] sm:$0xff] }
 0xcc3   :  { %v8217_v37 = vpop.f32.mrf.mxu0 }
 0xcc4   :  { %v5322_v17 = vadd.f32 %v8217_v37, %v5213_v44  ;;  %v5911_v44 = vld [vmem:[%s9088_s5 + $0x58] sm:$0xff] }
 0xcc5   :  { %v5302_v30 = vpop.f32.mrf.mxu0 }
 0xcc6   :  { %v5321_v49 = vadd.f32 %v5302_v30, %v5212_v18  ;;  %v5906_v18 = vld [vmem:[%s9088_s5 + $0x30] sm:$0xff] }
 0xcc7   :  { %v8182_v39 = vpop.f32.mrf.mxu1  ;;  %v8220_v35 = vpop.f32.mrf.mxu0 }
 0xcc8   :  { %v5215_v50 = vadd.f32 %v8182_v39, %v5103_v45  ;;  %v5915_v39 = vld [vmem:[%s9088_s5 + $0x78] sm:$0xff]  ;;  %v5908_v45 = vld [vmem:[%s9088_s5 + $0x40] sm:$0xff] }
 0xcc9   :  { %v5203_v40 = vpop.f32.mrf.mxu1  ;;  %v5312_v43 = vpop.f32.mrf.mxu0  ;;  %8411 = vmatprep.subr.mxu0 %v5915_v39 }
 0xcca   :  { %v5324_v58 = vadd.f32 %v8220_v35, %v5215_v50  ;;  %v5214_v52 = vadd.f32 %v5203_v40, %v5098_v48  ;;  %v5914_v35 = vld [vmem:[%s9088_s5 + $0x70] sm:$0xff]  ;;  %v5903_v48 = vld [vmem:[%s9088_s5 + $0x18] sm:$0xff]  ;;  %v5901_v50 = vld [vmem:[%s9088_s5 + $0x8] sm:$0xff] }
 0xccb   :  { %v5910_v40 = vld [vmem:[%s9088_s5 + $0x50] sm:$0xff] }
 0xccc   :  { %v5323_v57 = vadd.f32 %v5312_v43, %v5214_v52  ;;  %v5909_v43 = vld [vmem:[%s9088_s5 + $0x48] sm:$0xff] }
 0xce5   :  { %v8255_v41 = vpop.f32.mrf.mxu1  ;;  %v8293_v46 = vpop.f32.mrf.mxu0 }
 0xce6   :  { %v5432_v47 = vadd.f32 %v8255_v41, %v5322_v17  ;;  %v5907_v17 = vld [vmem:[%s9088_s5 + $0x38] sm:$0xff]  ;;  %v5905_v41 = vld [vmem:[%s9088_s5 + $0x28] sm:$0xff] }
 0xce7   :  { %v5412_v24 = vpop.f32.mrf.mxu1  ;;  %v5522_v20 = vpop.f32.mrf.mxu0 }
 0xce8   :  { %v5542_v53 = vadd.f32 %v8293_v46, %v5432_v47  ;;  %v5431_v54 = vadd.f32 %v5412_v24, %v5321_v49  ;;  %v5904_v46 = vld [vmem:[%s9088_s5 + $0x20] sm:$0xff]  ;;  %v5902_v49 = vld [vmem:[%s9088_s5 + $0x10] sm:$0xff] }
 0xce9   :  { %v8258_v55 = vpop.f32.mrf.mxu1  ;;  %v8296_v56 = vpop.f32.mrf.mxu0  ;;  %v5900_v47 = vld [vmem:[%s9088_s5] sm:$0xff] }
 0xcea   :  { %v5553_v60 = vadd.f32 %v6225_v51, %v5542_v53  ;;  %v5541_v61 = vadd.f32 %v5522_v20, %v5431_v54  ;;  %v5434_v62 = vadd.f32 %v8258_v55, %v5324_v58 }
 0xceb   :  { %v5422_v59 = vpop.f32.mrf.mxu1  ;;  %v5532_v63 = vpop.f32.mrf.mxu0 }
 0xcec   :  { %v5557_v0 = vmax.f32 %v5553_v60, 0.0  ;;  %v5552_v2 = vadd.f32 %v6225_v51, %v5541_v61  ;;  %v5544_v3 = vadd.f32 %v8296_v56, %v5434_v62  ;;  %v5433_v4 = vadd.f32 %v5422_v59, %v5323_v57  ;;  %v6226_v61 = vld [vmem:[#allocation38] ss:$0 sm:$0xff] }
 0xcee   :  { %5561 = vst [vmem:[#allocation12 + $0x9] sm:$0xff] %v5557_v0  ;;  %v5556_v5 = vmax.f32 %v5552_v2, 0.0  ;;  %v5555_v6 = vadd.f32 %v6225_v51, %v5544_v3  ;;  %v5543_v7 = vadd.f32 %v5532_v63, %v5433_v4 }
 0xcf0   :  { %5560 = vst [vmem:[#allocation12 + $0x1] sm:$0xff] %v5556_v5  ;;  %v5559_v8 = vmax.f32 %v5555_v6, 0.0  ;;  %v5554_v9 = vadd.f32 %v6225_v51, %v5543_v7  ;;  %8329 = vmatprep.mubr.f32.mxu1 %v5556_v5 }
 0xcf1   :  { %8330 = vmatmul.mubr.f32.vlgmr.msra.gmra.mxu1 %v5557_v0 }
 0xcf2   :  { %5563 = vst [vmem:[#allocation12 + $0x21] sm:$0xff] %v5559_v8  ;;  %v5558_v10 = vmax.f32 %v5554_v9, 0.0  ;;  %8374 = vmatpush3.msra.mxu1 %v9847_v19 }
 0xcf3   :  { %8375 = vmatprep.subr.mxu1 %v5794_v28 }
 0xcf4   :  { %5562 = vst [vmem:[#allocation12 + $0x19] sm:$0xff] %v5558_v10  ;;  %8376 = vmatpush3.msra.mxu1 %v5794_v28  ;;  %8332 = vmatprep.mubr.f32.mxu1 %v5558_v10 }
 0xcf5   :  { %8377 = vmatprep.subr.mxu1 %v5793_v11  ;;  %8333 = vmatmul.mubr.f32.gmra.mxu1 %v5559_v8  ;;  %v5776_v37 = vld [vmem:[#allocation12 + $0xa] sm:$0xff] }
 0xcf6   :  { %8378 = vmatpush3.msra.mxu1 %v5793_v11 }
 0xcf7   :  { %v5564_v14 = vld [vmem:[#allocation12] sm:$0xff]  ;;  %v5565_v15 = vld [vmem:[#allocation12 + $0x8] sm:$0xff]  ;;  %8379 = vmatprep.subr.mxu1 %v5792_v12 }
 0xcf8   :  { %v5775_v16 = vld [vmem:[#allocation12 + $0x2] sm:$0xff]  ;;  %8367 = vmatprep.mubr.f32.mxu0 %v5564_v14  ;;  %8380 = vmatpush3.msra.mxu1 %v5792_v12  ;;  %v6227_v14 = vld [vmem:[%s9093_s25] ss:$0 sm:$0xff] }
 0xcf9   :  { %8405 = vmatprep.mubr.f32.mxu1 %v5775_v16  ;;  %8368 = vmatmul.mubr.f32.vlgmr.msra.gmra.mxu0 %v5565_v15  ;;  %v5778_v30 = vld [vmem:[#allocation12 + $0x22] sm:$0xff] }
 0xcfa   :  { %8381 = vmatprep.subr.mxu1 %v5791_v13  ;;  %8412 = vmatpush3.msra.mxu0 %v5915_v39 }
 0xcfb   :  { %v5566_v19 = vld [vmem:[#allocation12 + $0x18] sm:$0xff]  ;;  %v5567_v25 = vld [vmem:[#allocation12 + $0x20] sm:$0xff]  ;;  %8382 = vmatpush3.msra.mxu1 %v5791_v13  ;;  %8413 = vmatprep.subr.mxu0 %v5914_v35 }
 0xcfc   :  { %8370 = vmatprep.mubr.f32.mxu0 %v5566_v19  ;;  %8383 = vmatprep.subr.mxu1 %v5790_v23  ;;  %v5777_v29 = vld [vmem:[#allocation12 + $0x1a] sm:$0xff] }
 0xcfd   :  { %8371 = vmatmul.mubr.f32.gmra.mxu0 %v5567_v25  ;;  %8384 = vmatpush3.msra.mxu1 %v5790_v23 }
 0xcfe   :  { %8385 = vmatprep.subr.mxu1 %v5789_v26  ;;  %8414 = vmatpush3.msra.mxu0 %v5914_v35 }
 0xcff   :  { %8386 = vmatpush3.msra.mxu1 %v5789_v26  ;;  %8415 = vmatprep.subr.mxu0 %v5913_v31 }
 0xd00   :  { %8387 = vmatprep.subr.mxu1 %v5788_v21  ;;  %8416 = vmatpush3.msra.mxu0 %v5913_v31 }
 0xd01   :  { %8388 = vmatpush3.msra.mxu1 %v5788_v21  ;;  %8417 = vmatprep.subr.mxu0 %v5912_v42 }
 0xd02   :  { %8389 = vmatprep.subr.mxu1 %v5787_v22  ;;  %8418 = vmatpush3.msra.mxu0 %v5912_v42 }
 0xd03   :  { %8390 = vmatpush3.msra.mxu1 %v5787_v22  ;;  %8419 = vmatprep.subr.mxu0 %v5911_v44 }
 0xd04   :  { %8391 = vmatprep.subr.mxu1 %v5786_v1  ;;  %8420 = vmatpush3.msra.mxu0 %v5911_v44 }
 0xd05   :  { %8392 = vmatpush3.msra.mxu1 %v5786_v1  ;;  %8421 = vmatprep.subr.mxu0 %v5910_v40 }
 0xd06   :  { %8393 = vmatprep.subr.mxu1 %v5785_v32  ;;  %8422 = vmatpush3.msra.mxu0 %v5910_v40 }
 0xd07   :  { %8394 = vmatpush3.msra.mxu1 %v5785_v32  ;;  %8423 = vmatprep.subr.mxu0 %v5909_v43 }
 0xd08   :  { %8395 = vmatprep.subr.mxu1 %v5784_v33  ;;  %8424 = vmatpush3.msra.mxu0 %v5909_v43 }
 0xd09   :  { %8396 = vmatpush3.msra.mxu1 %v5784_v33  ;;  %8425 = vmatprep.subr.mxu0 %v5908_v45 }
 0xd0a   :  { %8397 = vmatprep.subr.mxu1 %v5783_v34  ;;  %8426 = vmatpush3.msra.mxu0 %v5908_v45 }
 0xd0b   :  { %8398 = vmatpush3.msra.mxu1 %v5783_v34  ;;  %8427 = vmatprep.subr.mxu0 %v5907_v17 }
 0xd0c   :  { %8399 = vmatprep.subr.mxu1 %v5782_v36  ;;  %8428 = vmatpush3.msra.mxu0 %v5907_v17 }
 0xd0d   :  { %8400 = vmatpush3.msra.mxu1 %v5782_v36  ;;  %8429 = vmatprep.subr.mxu0 %v5906_v18 }
 0xd0e   :  { %8401 = vmatprep.subr.mxu1 %v5781_v38  ;;  %8430 = vmatpush3.msra.mxu0 %v5906_v18 }
 0xd0f   :  { %8402 = vmatpush3.msra.mxu1 %v5781_v38  ;;  %8431 = vmatprep.subr.mxu0 %v5905_v41 }
 0xd10   :  { %8403 = vmatprep.subr.mxu1 %v5780_v27  ;;  %8432 = vmatpush3.msra.mxu0 %v5905_v41 }
 0xd11   :  { %8404 = vmatpush3.msra.mxu1 %v5780_v27  ;;  %8433 = vmatprep.subr.mxu0 %v5904_v46 }
 0xd12   :  { %8406 = vmatmul.mubr.f32.vlgmr.msra.gmra.mxu1 %v5776_v37  ;;  %8434 = vmatpush3.msra.mxu0 %v5904_v46 }
 0xd13   :  { %8408 = vmatprep.mubr.f32.mxu1 %v5777_v29  ;;  %8435 = vmatprep.subr.mxu0 %v5903_v48 }
 0xd14   :  { %8436 = vmatpush3.msra.mxu0 %v5903_v48 }
 0xd15   :  { %8437 = vmatprep.subr.mxu0 %v5902_v49 }
 0xd16   :  { %8409 = vmatmul.mubr.f32.gmra.mxu1 %v5778_v30  ;;  %8438 = vmatpush3.msra.mxu0 %v5902_v49 }
 0xd17   :  { %8439 = vmatprep.subr.mxu0 %v5901_v50 }
 0xd18   :  { %8440 = vmatpush3.msra.mxu0 %v5901_v50 }
 0xd19   :  { %8441 = vmatprep.subr.mxu0 %v5900_v47 }
 0xd1a   :  { %8442 = vmatpush3.msra.mxu0 %v5900_v47 }
 0xdb1   :  { %v8331_v51 = vpop.f32.mrf.mxu1 }
 0xdb3   :  { %v5671_v20 = vpop.f32.mrf.mxu1 }
 0xdb5   :  { %v8334_v52 = vpop.f32.mrf.mxu1 }
 0xdb7   :  { %v5681_v54 = vpop.f32.mrf.mxu1 }
 0xdb9   :  { %v8369_v24 = vpop.f32.mrf.mxu0 }
 0xdba   :  { %v5762_v55 = vadd.f32 %v8369_v24, %v8331_v51 }
 0xdbb   :  { %v5756_v58 = vpop.f32.mrf.mxu0 }
 0xdbc   :  { %v5757_v57 = vadd.f32 %v5756_v58, %v5671_v20 }
 0xdbd   :  { %v8372_v53 = vpop.f32.mrf.mxu0 }
 0xdbe   :  { %v5772_v63 = vadd.f32 %v8372_v53, %v8334_v52 }
 0xdbf   :  { %v5766_v62 = vpop.f32.mrf.mxu0 }
 0xdc0   :  { %v5767_v4 = vadd.f32 %v5766_v62, %v5681_v54 }
 0xdd2   :  { %v8407_v56 = vpop.f32.mrf.mxu1 }
 0xdd3   :  { %v5882_v60 = vadd.f32 %v8407_v56, %v5762_v55 }
 0xdd4   :  { %v5862_v59 = vpop.f32.mrf.mxu1 }
 0xdd5   :  { %v5881_v0 = vadd.f32 %v5862_v59, %v5757_v57  ;;  %v5893_v2 = vadd.f32 %v6226_v61, %v5882_v60 }
 0xdd6   :  { %v8410_v3 = vpop.f32.mrf.mxu1 }
 0xdd7   :  { %v5892_v5 = vadd.f32 %v6226_v61, %v5881_v0  ;;  %v5884_v6 = vadd.f32 %v8410_v3, %v5772_v63  ;;  %v5897_v28 = vmax.f32 %v5893_v2, 0.0 }
 0xdd8   :  { %v5872_v7 = vpop.f32.mrf.mxu1 }
 0xdd9   :  { %v5896_v8 = vmax.f32 %v5892_v5, 0.0  ;;  %v5883_v9 = vadd.f32 %v5872_v7, %v5767_v4  ;;  %v5895_v10 = vadd.f32 %v6226_v61, %v5884_v6 }
 0xddb   :  { %v5894_v11 = vadd.f32 %v6226_v61, %v5883_v9  ;;  %8443 = vmatprep.mubr.f32.mxu0 %v5896_v8  ;;  %v5899_v13 = vmax.f32 %v5895_v10, 0.0 }
 0xddc   :  { %8444 = vmatmul.mubr.f32.vlgmr.msra.gmra.mxu0 %v5897_v28 }
 0xddd   :  { %v5898_v12 = vmax.f32 %v5894_v11, 0.0 }
 0xddf   :  { %8446 = vmatprep.mubr.f32.mxu0 %v5898_v12 }
 0xde0   :  { %8447 = vmatmul.mubr.f32.gmra.mxu0 %v5899_v13 }
 0xe9c   :  { %v8445_v15 = vpop.f32.mrf.mxu0 }
 0xe9d   :  { %v5995_v16 = vadd.f32 %v8445_v15, %v6227_v14 }
 0xe9e   :  { %v5989_v23 = vpop.f32.mrf.mxu0 }
 0xe9f   :  { %6009 = vst.msk [vmem:[%s9098_s3 + $0x8] sm:$0xff] %vm420_vm0, %v5995_v16  ;;  %v5990_v19 = vadd.f32 %v6227_v14, %v5989_v23 }
 0xea0   :  { %v8448_v25 = vpop.f32.mrf.mxu0 }
 0xea1   :  { %6008 = vst.msk [vmem:[%s9098_s3] sm:$0xff] %vm420_vm0, %v5990_v19  ;;  %v6005_v26 = vadd.f32 %v8448_v25, %v6227_v14 }
 0xea2   :  { %v5999_v21 = vpop.f32.mrf.mxu0 }
 0xea3   :  { %6011 = vst.msk [vmem:[%s9098_s3 + $0x18] sm:$0xff] %vm420_vm0, %v6005_v26  ;;  %v6000_v22 = vadd.f32 %v6227_v14, %v5999_v21 }
 0xea5   :  { %6010 = vst.msk [vmem:[%s9098_s3 + $0x10] sm:$0xff] %vm420_vm0, %v6000_v22 }
 0xea6   :  { %6016 = vsyncpa [#allocation14], 1 }
 0xea7   :  { %6017 = vsyncpa [#allocation16], 1 }
 0xea8   :  { %6018 = vsyncpa [#allocation19], 1 }
 0xea9   :  { %6019 = vsyncpa [#allocation22], 1 }
 0xeaa   :  { %6020 = vsyncpa [#allocation25], 1 }
 0xeab   :  { %6021 = vsyncpa [#allocation28], 1 }
 0xeac   :  { %6022 = vsyncpa [#allocation31], 1 }
 0xead   :  { %6023 = vsyncpa [#allocation34], 1 }
 0xeae   :  { %6024 = vsyncpa [#allocation37], 1 }

</bundles_post_ra>
